<compile_context>
chip_gen: v7x
topology: tpu7x:2x2x1
jax: 0.10.0
libtpu: 0.0.40
codegen_flags: <defaults>
</compile_context>

<pallas_src>
import functools
import math

import jax
import jax.numpy as jnp
from jax.experimental import pallas as pl
from jax.experimental.pallas import tpu as pltpu


# ---------------------------------------------------------------------------
# Fused DecoderBlock kernel: one grid step per batch element.
# ---------------------------------------------------------------------------
def _decoder_block_kernel(
    evl_ref,                                    # SMEM (B,) int32 encoder valid lens
    x_ref, kv_ref, enc_ref,                     # (1,T,D) (1,T,D) (1,Te,D)
    wq1_ref, wk1_ref, wv1_ref, wo1_ref, g1_ref, be1_ref,
    wq2_ref, wk2_ref, wv2_ref, wo2_ref, g2_ref, be2_ref,
    w1_ref, bf1_ref, w2_ref, bf2_ref, g3_ref, be3_ref,
    o_ref,                                      # (1,T,D)
    *, num_heads):
    b = pl.program_id(0)
    x = x_ref[0]                                # (T, D)  block input
    kv = kv_ref[0]                              # (T, D)  self-attn key/value source
    enc = enc_ref[0]                            # (Te, D) encoder outputs
    T, D = x.shape
    Te = enc.shape[0]
    dh = D // num_heads
    scale = 1.0 / math.sqrt(dh)

    # (1, D) lane index used to build per-head lane masks (no reshapes / slices).
    lane = jax.lax.broadcasted_iota(jnp.int32, (1, D), 1)

    def layer_norm(s, g, beta):
        mu = jnp.mean(s, axis=-1, keepdims=True)
        var = jnp.mean(jnp.square(s - mu), axis=-1, keepdims=True)  # biased, like torch LN
        return (s - mu) * jax.lax.rsqrt(var + 1e-5) * g + beta

    def mha(q_src, kv_src, mask, wq, wk, wv, wo):
        # bias=False projections (no zero-bias DMA/add).
        q = jnp.dot(q_src, wq[...], preferred_element_type=jnp.float32)   # (Tq, D)
        k = jnp.dot(kv_src, wk[...], preferred_element_type=jnp.float32)  # (Tk, D)
        v = jnp.dot(kv_src, wv[...], preferred_element_type=jnp.float32)  # (Tk, D)
        concat = jnp.zeros((q_src.shape[0], D), jnp.float32)
        for h in range(num_heads):
            lo = h * dh
            head = ((lane >= lo) & (lane < lo + dh)).astype(jnp.float32)  # (1, D)
            # Masking Q's lanes zeroes every other head's contribution to the
            # contraction, giving the exact per-head scores with no lane slices.
            s = jax.lax.dot_general(
                q * head, k, (((1,), (1,)), ((), ())),
                preferred_element_type=jnp.float32) * scale               # (Tq, Tk)
            s = jnp.where(mask, s, -1000000.0)       # same mask value as torch ref
            m = jnp.max(s, axis=-1, keepdims=True)
            p = jnp.exp(s - m)
            denom = jnp.sum(p, axis=-1, keepdims=True)
            w = p * pl.reciprocal(denom, approx=True)                     # EUP slot
            # Masking V's lanes places this head's output in its own column block,
            # so accumulation rebuilds the concatenated multi-head output exactly.
            concat = concat + jnp.dot(w, v * head,
                                      preferred_element_type=jnp.float32)
        return jnp.dot(concat, wo[...], preferred_element_type=jnp.float32)

    # ---- self-attention: causal mask == dec_valid_lens (training mode) ----
    qpos = jax.lax.broadcasted_iota(jnp.int32, (T, T), 0)
    kpos = jax.lax.broadcasted_iota(jnp.int32, (T, T), 1)
    x2 = mha(x, kv, kpos <= qpos, wq1_ref, wk1_ref, wv1_ref, wo1_ref)
    y = layer_norm(x + x2, g1_ref[...], be1_ref[...])

    # ---- cross-attention over encoder outputs (per-batch valid length) ----
    evl = evl_ref[b]
    kpos_e = jax.lax.broadcasted_iota(jnp.int32, (T, Te), 1)
    y2 = mha(y, enc, kpos_e < evl, wq2_ref, wk2_ref, wv2_ref, wo2_ref)
    z = layer_norm(y + y2, g2_ref[...], be2_ref[...])

    # ---- position-wise FFN + final add&norm ----
    hdn = jnp.maximum(
        jnp.dot(z, w1_ref[...], preferred_element_type=jnp.float32) + bf1_ref[...],
        0.0)
    f = jnp.dot(hdn, w2_ref[...], preferred_element_type=jnp.float32) + bf2_ref[...]
    o_ref[0] = layer_norm(z + f, g3_ref[...], be3_ref[...])


def decoder_block(X, kv_attend, enc, enc_vl_i32, blk, num_heads):
    """One fused pallas_call for a whole DecoderBlock forward."""
    B, T, D = X.shape
    Te = enc.shape[1]
    F = blk["W1"].shape[1]

    act3 = lambda b, evl: (b, 0, 0)          # per-batch activation blocks
    rep2 = lambda b, evl: (0, 0)             # weights: same block every step (stay resident)
    wspec = lambda shp: pl.BlockSpec(shp, rep2)

    grid_spec = pltpu.PrefetchScalarGridSpec(
        num_scalar_prefetch=1,
        grid=(B,),
        in_specs=[
            pl.BlockSpec((1, T, D), act3),    # X
            pl.BlockSpec((1, T, D), act3),    # self-attn key/value source
            pl.BlockSpec((1, Te, D), act3),   # encoder outputs
            wspec((D, D)), wspec((D, D)), wspec((D, D)), wspec((D, D)),   # Wq1 Wk1 Wv1 Wo1
            wspec((1, D)), wspec((1, D)),                                 # ln1 g, b
            wspec((D, D)), wspec((D, D)), wspec((D, D)), wspec((D, D)),   # Wq2 Wk2 Wv2 Wo2
            wspec((1, D)), wspec((1, D)),                                 # ln2 g, b
            wspec((D, F)), wspec((1, F)), wspec((F, D)), wspec((1, D)),   # W1 b1 W2 b2
            wspec((1, D)), wspec((1, D)),                                 # ln3 g, b
        ],
        out_specs=pl.BlockSpec((1, T, D), act3),
    )
    return pl.pallas_call(
        functools.partial(_decoder_block_kernel, num_heads=num_heads),
        out_shape=jax.ShapeDtypeStruct((B, T, D), jnp.float32),
        grid_spec=grid_spec,
        compiler_params=pltpu.CompilerParams(dimension_semantics=("parallel",)),
    )(enc_vl_i32, X, kv_attend, enc,
      blk["Wq1"], blk["Wk1"], blk["Wv1"], blk["Wo1"], blk["ln1_g"], blk["ln1_b"],
      blk["Wq2"], blk["Wk2"], blk["Wv2"], blk["Wo2"], blk["ln2_g"], blk["ln2_b"],
      blk["W1"], blk["b1"], blk["W2"], blk["b2"], blk["ln3_g"], blk["ln3_b"])


# ---------------------------------------------------------------------------
# Full BERTDecoder forward (embedding + kv-cache bookkeeping in plain JAX).
# ---------------------------------------------------------------------------
def bert_decoder_forward(tokens, params, enc_outputs, enc_valid_lens, num_heads):
    B, T = tokens.shape
    X = jnp.take(params["tok_emb"], tokens, axis=0) + params["pos_emb"][:, :T, :]
    enc_vl_i32 = enc_valid_lens.astype(jnp.int32)

    # state[2]: every block was built with i=True -> all share slot 1 (reference behaviour).
    kv_cache = [None, None]
    for blk in params["blocks"]:
        full_kv = X if kv_cache[1] is None else jnp.concatenate([kv_cache[1], X], axis=1)
        kv_cache[1] = full_kv
        # dec_valid_lens never exceeds T and the -1e6 mask underflows to an exact 0
        # softmax weight in f32, so attending only over the first T cached positions
        # is numerically identical to the reference attention over the full concat
        # while skipping the always-masked half of the work for blocks > 0.
        kv_attend = full_kv[:, :T, :]
        X = decoder_block(X, kv_attend, enc_outputs, enc_vl_i32, blk, num_heads)
    return X, (enc_outputs, enc_valid_lens, kv_cache)


def init_params(key, vocab_size, num_hiddens, ffn_hiddens, num_layers, max_len):
    def nrm(k, shape, scale=0.02):
        return scale * jax.random.normal(k, shape, jnp.float32)

    keys = jax.random.split(key, 2 + num_layers)
    D, F = num_hiddens, ffn_hiddens
    params = {
        "tok_emb": nrm(keys[0], (vocab_size, D), 1.0),
        "pos_emb": nrm(keys[1], (1, max_len, D), 1.0),
        "blocks": [],
    }
    # TODO(synk): segment_embedding is defined in the reference __init__ but never
    # used in its forward pass, so it is intentionally omitted here.
    for li in range(num_layers):
        k = jax.random.split(keys[2 + li], 10)
        blk = {
            "Wq1": nrm(k[0], (D, D)), "Wk1": nrm(k[1], (D, D)),
            "Wv1": nrm(k[2], (D, D)), "Wo1": nrm(k[3], (D, D)),
            "Wq2": nrm(k[4], (D, D)), "Wk2": nrm(k[5], (D, D)),
            "Wv2": nrm(k[6], (D, D)), "Wo2": nrm(k[7], (D, D)),
            "ln1_g": jnp.ones((1, D), jnp.float32), "ln1_b": jnp.zeros((1, D), jnp.float32),
            "ln2_g": jnp.ones((1, D), jnp.float32), "ln2_b": jnp.zeros((1, D), jnp.float32),
            "ln3_g": jnp.ones((1, D), jnp.float32), "ln3_b": jnp.zeros((1, D), jnp.float32),
            "W1": nrm(k[8], (D, F)), "b1": jnp.zeros((1, F), jnp.float32),
            "W2": nrm(k[9], (F, D)), "b2": jnp.zeros((1, D), jnp.float32),
        }
        params["blocks"].append(blk)
    return params


if __name__ == "__main__":
    vocab_size, num_hiddens, ffn_hiddens = 50, 32, 64
    num_heads, num_layers, max_len = 4, 2, 64
    B, T, T_enc = 2, 8, 8

    key = jax.random.PRNGKey(0)
    k_par, k_tok, k_enc = jax.random.split(key, 3)
    params = init_params(k_par, vocab_size, num_hiddens, ffn_hiddens, num_layers, max_len)

    tokens = jax.random.randint(k_tok, (B, T), 0, vocab_size, dtype=jnp.int32)
    enc_outputs = jax.random.normal(k_enc, (B, T_enc, num_hiddens), jnp.float32)
    enc_valid_lens = jnp.array([T_enc, T_enc - 2], dtype=jnp.float32)

    fwd = jax.jit(functools.partial(bert_decoder_forward, num_heads=num_heads))
    out, state = fwd(tokens, params, enc_outputs, enc_valid_lens)
    out = jax.block_until_ready(out)
    assert out.shape == (B, T, num_hiddens)
    assert bool(jnp.all(jnp.isfinite(out)))
    print("KERNEL_OK")
</pallas_src>

<mosaic_0001>
module attributes {stable_mosaic.version = 11 : i64} {
  func.func @_decoder_block_kernel(%arg0: i32, %arg1: memref<2xi32, #tpu.memory_space<smem>>, %arg2: memref<1x8x32xf32, #tpu.memory_space<vmem>>, %arg3: memref<1x8x32xf32, #tpu.memory_space<vmem>>, %arg4: memref<1x8x32xf32, #tpu.memory_space<vmem>>, %arg5: memref<32x32xf32, #tpu.memory_space<vmem>>, %arg6: memref<32x32xf32, #tpu.memory_space<vmem>>, %arg7: memref<32x32xf32, #tpu.memory_space<vmem>>, %arg8: memref<32x32xf32, #tpu.memory_space<vmem>>, %arg9: memref<1x32xf32, #tpu.memory_space<vmem>>, %arg10: memref<1x32xf32, #tpu.memory_space<vmem>>, %arg11: memref<32x32xf32, #tpu.memory_space<vmem>>, %arg12: memref<32x32xf32, #tpu.memory_space<vmem>>, %arg13: memref<32x32xf32, #tpu.memory_space<vmem>>, %arg14: memref<32x32xf32, #tpu.memory_space<vmem>>, %arg15: memref<1x32xf32, #tpu.memory_space<vmem>>, %arg16: memref<1x32xf32, #tpu.memory_space<vmem>>, %arg17: memref<32x64xf32, #tpu.memory_space<vmem>>, %arg18: memref<1x64xf32, #tpu.memory_space<vmem>>, %arg19: memref<64x32xf32, #tpu.memory_space<vmem>>, %arg20: memref<1x32xf32, #tpu.memory_space<vmem>>, %arg21: memref<1x32xf32, #tpu.memory_space<vmem>>, %arg22: memref<1x32xf32, #tpu.memory_space<vmem>>, %arg23: memref<1x8x32xf32, #tpu.memory_space<vmem>>) attributes {dimension_semantics = [#tpu.dimension_semantics<parallel>], iteration_bounds = array<i64: 2>, scalar_prefetch = 1 : i64, scratch_operands = 0 : i64, tpu.core_type = #tpu.core_type<tc>, window_params = [{transform_indices = @transform_0, window_bounds = array<i64: 1, 8, 32>}, {transform_indices = @transform_1, window_bounds = array<i64: 1, 8, 32>}, {transform_indices = @transform_2, window_bounds = array<i64: 1, 8, 32>}, {pipeline_mode = #tpu.pipeline_mode<synchronous>, transform_indices = @transform_3, window_bounds = array<i64: 32, 32>}, {pipeline_mode = #tpu.pipeline_mode<synchronous>, transform_indices = @transform_4, window_bounds = array<i64: 32, 32>}, {pipeline_mode = #tpu.pipeline_mode<synchronous>, transform_indices = @transform_5, window_bounds = array<i64: 32, 32>}, {pipeline_mode = #tpu.pipeline_mode<synchronous>, transform_indices = @transform_6, window_bounds = array<i64: 32, 32>}, {pipeline_mode = #tpu.pipeline_mode<synchronous>, transform_indices = @transform_7, window_bounds = array<i64: 1, 32>}, {pipeline_mode = #tpu.pipeline_mode<synchronous>, transform_indices = @transform_8, window_bounds = array<i64: 1, 32>}, {pipeline_mode = #tpu.pipeline_mode<synchronous>, transform_indices = @transform_9, window_bounds = array<i64: 32, 32>}, {pipeline_mode = #tpu.pipeline_mode<synchronous>, transform_indices = @transform_10, window_bounds = array<i64: 32, 32>}, {pipeline_mode = #tpu.pipeline_mode<synchronous>, transform_indices = @transform_11, window_bounds = array<i64: 32, 32>}, {pipeline_mode = #tpu.pipeline_mode<synchronous>, transform_indices = @transform_12, window_bounds = array<i64: 32, 32>}, {pipeline_mode = #tpu.pipeline_mode<synchronous>, transform_indices = @transform_13, window_bounds = array<i64: 1, 32>}, {pipeline_mode = #tpu.pipeline_mode<synchronous>, transform_indices = @transform_14, window_bounds = array<i64: 1, 32>}, {pipeline_mode = #tpu.pipeline_mode<synchronous>, transform_indices = @transform_15, window_bounds = array<i64: 32, 64>}, {pipeline_mode = #tpu.pipeline_mode<synchronous>, transform_indices = @transform_16, window_bounds = array<i64: 1, 64>}, {pipeline_mode = #tpu.pipeline_mode<synchronous>, transform_indices = @transform_17, window_bounds = array<i64: 64, 32>}, {pipeline_mode = #tpu.pipeline_mode<synchronous>, transform_indices = @transform_18, window_bounds = array<i64: 1, 32>}, {pipeline_mode = #tpu.pipeline_mode<synchronous>, transform_indices = @transform_19, window_bounds = array<i64: 1, 32>}, {pipeline_mode = #tpu.pipeline_mode<synchronous>, transform_indices = @transform_20, window_bounds = array<i64: 1, 32>}, {transform_indices = @transform_21, window_bounds = array<i64: 1, 8, 32>}]} {
    %c0 = arith.constant 0 : index
    %c0_0 = arith.constant 0 : index
    %c0_1 = arith.constant 0 : index
    %0 = vector.load %arg2[%c0, %c0_0, %c0_1] : memref<1x8x32xf32, #tpu.memory_space<vmem>>, vector<1x8x32xf32>
    %1 = vector.shape_cast %0 : vector<1x8x32xf32> to vector<8x32xf32>
    %c0_2 = arith.constant 0 : index
    %c0_3 = arith.constant 0 : index
    %c0_4 = arith.constant 0 : index
    %2 = vector.load %arg3[%c0_2, %c0_3, %c0_4] : memref<1x8x32xf32, #tpu.memory_space<vmem>>, vector<1x8x32xf32>
    %3 = vector.shape_cast %2 : vector<1x8x32xf32> to vector<8x32xf32>
    %c0_5 = arith.constant 0 : index
    %c0_6 = arith.constant 0 : index
    %c0_7 = arith.constant 0 : index
    %4 = vector.load %arg4[%c0_5, %c0_6, %c0_7] : memref<1x8x32xf32, #tpu.memory_space<vmem>>, vector<1x8x32xf32>
    %5 = vector.shape_cast %4 : vector<1x8x32xf32> to vector<8x32xf32>
    %6 = tpu.iota {dimensions = array<i32: 1>} : vector<1x32xi32>
    %7 = tpu.iota {dimensions = array<i32: 0>} : vector<8x8xi32>
    %8 = tpu.iota {dimensions = array<i32: 1>} : vector<8x8xi32>
    %9 = arith.cmpi sle, %8, %7 : vector<8x8xi32>
    %c0_8 = arith.constant 0 : index
    %c0_9 = arith.constant 0 : index
    %10 = vector.load %arg5[%c0_8, %c0_9] : memref<32x32xf32, #tpu.memory_space<vmem>>, vector<32x32xf32>
    %cst = arith.constant dense<0.000000e+00> : vector<8x32xf32>
    %11 = tpu.matmul %1, %10, %cst {dimension_numbers = #tpu.dot_dimension_numbers<[1], [0], [0], [1], [0, 0, 1, 1], [], []>} : vector<8x32xf32>, vector<32x32xf32>, vector<8x32xf32> -> vector<8x32xf32>
    %c0_10 = arith.constant 0 : index
    %c0_11 = arith.constant 0 : index
    %12 = vector.load %arg6[%c0_10, %c0_11] : memref<32x32xf32, #tpu.memory_space<vmem>>, vector<32x32xf32>
    %cst_12 = arith.constant dense<0.000000e+00> : vector<8x32xf32>
    %13 = tpu.matmul %3, %12, %cst_12 {dimension_numbers = #tpu.dot_dimension_numbers<[1], [0], [0], [1], [0, 0, 1, 1], [], []>} : vector<8x32xf32>, vector<32x32xf32>, vector<8x32xf32> -> vector<8x32xf32>
    %c0_13 = arith.constant 0 : index
    %c0_14 = arith.constant 0 : index
    %14 = vector.load %arg7[%c0_13, %c0_14] : memref<32x32xf32, #tpu.memory_space<vmem>>, vector<32x32xf32>
    %cst_15 = arith.constant dense<0.000000e+00> : vector<8x32xf32>
    %15 = tpu.matmul %3, %14, %cst_15 {dimension_numbers = #tpu.dot_dimension_numbers<[1], [0], [0], [1], [0, 0, 1, 1], [], []>} : vector<8x32xf32>, vector<32x32xf32>, vector<8x32xf32> -> vector<8x32xf32>
    %cst_16 = arith.constant 0.000000e+00 : f32
    %16 = vector.broadcast %cst_16 : f32 to vector<8x32xf32>
    %c0_i32 = arith.constant 0 : i32
    %17 = vector.broadcast %c0_i32 : i32 to vector<1x32xi32>
    %18 = arith.cmpi sge, %6, %17 : vector<1x32xi32>
    %c8_i32 = arith.constant 8 : i32
    %19 = vector.broadcast %c8_i32 : i32 to vector<1x32xi32>
    %20 = arith.cmpi slt, %6, %19 : vector<1x32xi32>
    %21 = arith.andi %18, %20 : vector<1x32xi1>
    %22 = arith.extui %21 : vector<1x32xi1> to vector<1x32xi32>
    %23 = arith.sitofp %22 : vector<1x32xi32> to vector<1x32xf32>
    %24 = vector.broadcast %23 : vector<1x32xf32> to vector<8x32xf32>
    %25 = arith.mulf %11, %24 : vector<8x32xf32>
    %cst_17 = arith.constant dense<0.000000e+00> : vector<8x8xf32>
    %26 = tpu.matmul %25, %13, %cst_17 {dimension_numbers = #tpu.dot_dimension_numbers<[1], [1], [0], [0], [0, 0, 1, 0], [], []>} : vector<8x32xf32>, vector<8x32xf32>, vector<8x8xf32> -> vector<8x8xf32>
    %cst_18 = arith.constant 0.353553385 : f32
    %27 = vector.broadcast %cst_18 : f32 to vector<8x8xf32>
    %28 = arith.mulf %26, %27 : vector<8x8xf32>
    %cst_19 = arith.constant -1.000000e+06 : f32
    %29 = vector.broadcast %cst_19 : f32 to vector<8x8xf32>
    %30 = arith.select %9, %28, %29 : vector<8x8xi1>, vector<8x8xf32>
    %cst_20 = arith.constant dense<0xFF800000> : vector<8xf32>
    %31 = vector.multi_reduction <maximumf>, %30, %cst_20 [1] : vector<8x8xf32> to vector<8xf32>
    %32 = vector.shape_cast %31 : vector<8xf32> to vector<8x1xf32>
    %33 = vector.broadcast %32 : vector<8x1xf32> to vector<8x8xf32>
    %34 = arith.subf %30, %33 : vector<8x8xf32>
    %35 = math.exp %34 : vector<8x8xf32>
    %cst_21 = arith.constant dense<0.000000e+00> : vector<8xf32>
    %36 = vector.multi_reduction <add>, %35, %cst_21 [1] : vector<8x8xf32> to vector<8xf32>
    %37 = vector.shape_cast %36 : vector<8xf32> to vector<8x1xf32>
    %38 = tpu.reciprocal %37 {approx = true} : vector<8x1xf32> -> vector<8x1xf32>
    %39 = vector.broadcast %38 : vector<8x1xf32> to vector<8x8xf32>
    %40 = arith.mulf %35, %39 : vector<8x8xf32>
    %41 = vector.broadcast %23 : vector<1x32xf32> to vector<8x32xf32>
    %42 = arith.mulf %15, %41 : vector<8x32xf32>
    %cst_22 = arith.constant dense<0.000000e+00> : vector<8x32xf32>
    %43 = tpu.matmul %40, %42, %cst_22 {dimension_numbers = #tpu.dot_dimension_numbers<[1], [0], [0], [1], [0, 0, 1, 1], [], []>} : vector<8x8xf32>, vector<8x32xf32>, vector<8x32xf32> -> vector<8x32xf32>
    %44 = arith.addf %16, %43 : vector<8x32xf32>
    %c8_i32_23 = arith.constant 8 : i32
    %45 = vector.broadcast %c8_i32_23 : i32 to vector<1x32xi32>
    %46 = arith.cmpi sge, %6, %45 : vector<1x32xi32>
    %c16_i32 = arith.constant 16 : i32
    %47 = vector.broadcast %c16_i32 : i32 to vector<1x32xi32>
    %48 = arith.cmpi slt, %6, %47 : vector<1x32xi32>
    %49 = arith.andi %46, %48 : vector<1x32xi1>
    %50 = arith.extui %49 : vector<1x32xi1> to vector<1x32xi32>
    %51 = arith.sitofp %50 : vector<1x32xi32> to vector<1x32xf32>
    %52 = vector.broadcast %51 : vector<1x32xf32> to vector<8x32xf32>
    %53 = arith.mulf %11, %52 : vector<8x32xf32>
    %cst_24 = arith.constant dense<0.000000e+00> : vector<8x8xf32>
    %54 = tpu.matmul %53, %13, %cst_24 {dimension_numbers = #tpu.dot_dimension_numbers<[1], [1], [0], [0], [0, 0, 1, 0], [], []>} : vector<8x32xf32>, vector<8x32xf32>, vector<8x8xf32> -> vector<8x8xf32>
    %cst_25 = arith.constant 0.353553385 : f32
    %55 = vector.broadcast %cst_25 : f32 to vector<8x8xf32>
    %56 = arith.mulf %54, %55 : vector<8x8xf32>
    %cst_26 = arith.constant -1.000000e+06 : f32
    %57 = vector.broadcast %cst_26 : f32 to vector<8x8xf32>
    %58 = arith.select %9, %56, %57 : vector<8x8xi1>, vector<8x8xf32>
    %cst_27 = arith.constant dense<0xFF800000> : vector<8xf32>
    %59 = vector.multi_reduction <maximumf>, %58, %cst_27 [1] : vector<8x8xf32> to vector<8xf32>
    %60 = vector.shape_cast %59 : vector<8xf32> to vector<8x1xf32>
    %61 = vector.broadcast %60 : vector<8x1xf32> to vector<8x8xf32>
    %62 = arith.subf %58, %61 : vector<8x8xf32>
    %63 = math.exp %62 : vector<8x8xf32>
    %cst_28 = arith.constant dense<0.000000e+00> : vector<8xf32>
    %64 = vector.multi_reduction <add>, %63, %cst_28 [1] : vector<8x8xf32> to vector<8xf32>
    %65 = vector.shape_cast %64 : vector<8xf32> to vector<8x1xf32>
    %66 = tpu.reciprocal %65 {approx = true} : vector<8x1xf32> -> vector<8x1xf32>
    %67 = vector.broadcast %66 : vector<8x1xf32> to vector<8x8xf32>
    %68 = arith.mulf %63, %67 : vector<8x8xf32>
    %69 = vector.broadcast %51 : vector<1x32xf32> to vector<8x32xf32>
    %70 = arith.mulf %15, %69 : vector<8x32xf32>
    %cst_29 = arith.constant dense<0.000000e+00> : vector<8x32xf32>
    %71 = tpu.matmul %68, %70, %cst_29 {dimension_numbers = #tpu.dot_dimension_numbers<[1], [0], [0], [1], [0, 0, 1, 1], [], []>} : vector<8x8xf32>, vector<8x32xf32>, vector<8x32xf32> -> vector<8x32xf32>
    %72 = arith.addf %44, %71 : vector<8x32xf32>
    %c16_i32_30 = arith.constant 16 : i32
    %73 = vector.broadcast %c16_i32_30 : i32 to vector<1x32xi32>
    %74 = arith.cmpi sge, %6, %73 : vector<1x32xi32>
    %c24_i32 = arith.constant 24 : i32
    %75 = vector.broadcast %c24_i32 : i32 to vector<1x32xi32>
    %76 = arith.cmpi slt, %6, %75 : vector<1x32xi32>
    %77 = arith.andi %74, %76 : vector<1x32xi1>
    %78 = arith.extui %77 : vector<1x32xi1> to vector<1x32xi32>
    %79 = arith.sitofp %78 : vector<1x32xi32> to vector<1x32xf32>
    %80 = vector.broadcast %79 : vector<1x32xf32> to vector<8x32xf32>
    %81 = arith.mulf %11, %80 : vector<8x32xf32>
    %cst_31 = arith.constant dense<0.000000e+00> : vector<8x8xf32>
    %82 = tpu.matmul %81, %13, %cst_31 {dimension_numbers = #tpu.dot_dimension_numbers<[1], [1], [0], [0], [0, 0, 1, 0], [], []>} : vector<8x32xf32>, vector<8x32xf32>, vector<8x8xf32> -> vector<8x8xf32>
    %cst_32 = arith.constant 0.353553385 : f32
    %83 = vector.broadcast %cst_32 : f32 to vector<8x8xf32>
    %84 = arith.mulf %82, %83 : vector<8x8xf32>
    %cst_33 = arith.constant -1.000000e+06 : f32
    %85 = vector.broadcast %cst_33 : f32 to vector<8x8xf32>
    %86 = arith.select %9, %84, %85 : vector<8x8xi1>, vector<8x8xf32>
    %cst_34 = arith.constant dense<0xFF800000> : vector<8xf32>
    %87 = vector.multi_reduction <maximumf>, %86, %cst_34 [1] : vector<8x8xf32> to vector<8xf32>
    %88 = vector.shape_cast %87 : vector<8xf32> to vector<8x1xf32>
    %89 = vector.broadcast %88 : vector<8x1xf32> to vector<8x8xf32>
    %90 = arith.subf %86, %89 : vector<8x8xf32>
    %91 = math.exp %90 : vector<8x8xf32>
    %cst_35 = arith.constant dense<0.000000e+00> : vector<8xf32>
    %92 = vector.multi_reduction <add>, %91, %cst_35 [1] : vector<8x8xf32> to vector<8xf32>
    %93 = vector.shape_cast %92 : vector<8xf32> to vector<8x1xf32>
    %94 = tpu.reciprocal %93 {approx = true} : vector<8x1xf32> -> vector<8x1xf32>
    %95 = vector.broadcast %94 : vector<8x1xf32> to vector<8x8xf32>
    %96 = arith.mulf %91, %95 : vector<8x8xf32>
    %97 = vector.broadcast %79 : vector<1x32xf32> to vector<8x32xf32>
    %98 = arith.mulf %15, %97 : vector<8x32xf32>
    %cst_36 = arith.constant dense<0.000000e+00> : vector<8x32xf32>
    %99 = tpu.matmul %96, %98, %cst_36 {dimension_numbers = #tpu.dot_dimension_numbers<[1], [0], [0], [1], [0, 0, 1, 1], [], []>} : vector<8x8xf32>, vector<8x32xf32>, vector<8x32xf32> -> vector<8x32xf32>
    %100 = arith.addf %72, %99 : vector<8x32xf32>
    %c24_i32_37 = arith.constant 24 : i32
    %101 = vector.broadcast %c24_i32_37 : i32 to vector<1x32xi32>
    %102 = arith.cmpi sge, %6, %101 : vector<1x32xi32>
    %c32_i32 = arith.constant 32 : i32
    %103 = vector.broadcast %c32_i32 : i32 to vector<1x32xi32>
    %104 = arith.cmpi slt, %6, %103 : vector<1x32xi32>
    %105 = arith.andi %102, %104 : vector<1x32xi1>
    %106 = arith.extui %105 : vector<1x32xi1> to vector<1x32xi32>
    %107 = arith.sitofp %106 : vector<1x32xi32> to vector<1x32xf32>
    %108 = vector.broadcast %107 : vector<1x32xf32> to vector<8x32xf32>
    %109 = arith.mulf %11, %108 : vector<8x32xf32>
    %cst_38 = arith.constant dense<0.000000e+00> : vector<8x8xf32>
    %110 = tpu.matmul %109, %13, %cst_38 {dimension_numbers = #tpu.dot_dimension_numbers<[1], [1], [0], [0], [0, 0, 1, 0], [], []>} : vector<8x32xf32>, vector<8x32xf32>, vector<8x8xf32> -> vector<8x8xf32>
    %cst_39 = arith.constant 0.353553385 : f32
    %111 = vector.broadcast %cst_39 : f32 to vector<8x8xf32>
    %112 = arith.mulf %110, %111 : vector<8x8xf32>
    %cst_40 = arith.constant -1.000000e+06 : f32
    %113 = vector.broadcast %cst_40 : f32 to vector<8x8xf32>
    %114 = arith.select %9, %112, %113 : vector<8x8xi1>, vector<8x8xf32>
    %cst_41 = arith.constant dense<0xFF800000> : vector<8xf32>
    %115 = vector.multi_reduction <maximumf>, %114, %cst_41 [1] : vector<8x8xf32> to vector<8xf32>
    %116 = vector.shape_cast %115 : vector<8xf32> to vector<8x1xf32>
    %117 = vector.broadcast %116 : vector<8x1xf32> to vector<8x8xf32>
    %118 = arith.subf %114, %117 : vector<8x8xf32>
    %119 = math.exp %118 : vector<8x8xf32>
    %cst_42 = arith.constant dense<0.000000e+00> : vector<8xf32>
    %120 = vector.multi_reduction <add>, %119, %cst_42 [1] : vector<8x8xf32> to vector<8xf32>
    %121 = vector.shape_cast %120 : vector<8xf32> to vector<8x1xf32>
    %122 = tpu.reciprocal %121 {approx = true} : vector<8x1xf32> -> vector<8x1xf32>
    %123 = vector.broadcast %122 : vector<8x1xf32> to vector<8x8xf32>
    %124 = arith.mulf %119, %123 : vector<8x8xf32>
    %125 = vector.broadcast %107 : vector<1x32xf32> to vector<8x32xf32>
    %126 = arith.mulf %15, %125 : vector<8x32xf32>
    %cst_43 = arith.constant dense<0.000000e+00> : vector<8x32xf32>
    %127 = tpu.matmul %124, %126, %cst_43 {dimension_numbers = #tpu.dot_dimension_numbers<[1], [0], [0], [1], [0, 0, 1, 1], [], []>} : vector<8x8xf32>, vector<8x32xf32>, vector<8x32xf32> -> vector<8x32xf32>
    %128 = arith.addf %100, %127 : vector<8x32xf32>
    %c0_44 = arith.constant 0 : index
    %c0_45 = arith.constant 0 : index
    %129 = vector.load %arg8[%c0_44, %c0_45] : memref<32x32xf32, #tpu.memory_space<vmem>>, vector<32x32xf32>
    %cst_46 = arith.constant dense<0.000000e+00> : vector<8x32xf32>
    %130 = tpu.matmul %128, %129, %cst_46 {dimension_numbers = #tpu.dot_dimension_numbers<[1], [0], [0], [1], [0, 0, 1, 1], [], []>} : vector<8x32xf32>, vector<32x32xf32>, vector<8x32xf32> -> vector<8x32xf32>
    %131 = arith.addf %1, %130 : vector<8x32xf32>
    %c0_47 = arith.constant 0 : index
    %c0_48 = arith.constant 0 : index
    %132 = vector.load %arg9[%c0_47, %c0_48] : memref<1x32xf32, #tpu.memory_space<vmem>>, vector<1x32xf32>
    %c0_49 = arith.constant 0 : index
    %c0_50 = arith.constant 0 : index
    %133 = vector.load %arg10[%c0_49, %c0_50] : memref<1x32xf32, #tpu.memory_space<vmem>>, vector<1x32xf32>
    %cst_51 = arith.constant dense<0.000000e+00> : vector<8xf32>
    %134 = vector.multi_reduction <add>, %131, %cst_51 [1] : vector<8x32xf32> to vector<8xf32>
    %135 = vector.shape_cast %134 : vector<8xf32> to vector<8x1xf32>
    %cst_52 = arith.constant 3.200000e+01 : f32
    %136 = vector.broadcast %cst_52 : f32 to vector<8x1xf32>
    %137 = arith.divf %135, %136 : vector<8x1xf32>
    %138 = vector.broadcast %137 : vector<8x1xf32> to vector<8x32xf32>
    %139 = arith.subf %131, %138 : vector<8x32xf32>
    %140 = arith.mulf %139, %139 : vector<8x32xf32>
    %cst_53 = arith.constant dense<0.000000e+00> : vector<8xf32>
    %141 = vector.multi_reduction <add>, %140, %cst_53 [1] : vector<8x32xf32> to vector<8xf32>
    %142 = vector.shape_cast %141 : vector<8xf32> to vector<8x1xf32>
    %cst_54 = arith.constant 3.200000e+01 : f32
    %143 = vector.broadcast %cst_54 : f32 to vector<8x1xf32>
    %144 = arith.divf %142, %143 : vector<8x1xf32>
    %145 = vector.broadcast %137 : vector<8x1xf32> to vector<8x32xf32>
    %146 = arith.subf %131, %145 : vector<8x32xf32>
    %cst_55 = arith.constant 9.99999974E-6 : f32
    %147 = vector.broadcast %cst_55 : f32 to vector<8x1xf32>
    %148 = arith.addf %144, %147 : vector<8x1xf32>
    %149 = math.rsqrt %148 : vector<8x1xf32>
    %150 = vector.broadcast %149 : vector<8x1xf32> to vector<8x32xf32>
    %151 = arith.mulf %146, %150 : vector<8x32xf32>
    %152 = vector.broadcast %132 : vector<1x32xf32> to vector<8x32xf32>
    %153 = arith.mulf %151, %152 : vector<8x32xf32>
    %154 = vector.broadcast %133 : vector<1x32xf32> to vector<8x32xf32>
    %155 = arith.addf %153, %154 : vector<8x32xf32>
    %156 = arith.index_cast %arg0 : i32 to index
    %157 = memref.load %arg1[%156] : memref<2xi32, #tpu.memory_space<smem>>
    %158 = tpu.iota {dimensions = array<i32: 1>} : vector<8x8xi32>
    %159 = vector.broadcast %157 : i32 to vector<8x8xi32>
    %160 = arith.cmpi slt, %158, %159 : vector<8x8xi32>
    %c0_56 = arith.constant 0 : index
    %c0_57 = arith.constant 0 : index
    %161 = vector.load %arg11[%c0_56, %c0_57] : memref<32x32xf32, #tpu.memory_space<vmem>>, vector<32x32xf32>
    %cst_58 = arith.constant dense<0.000000e+00> : vector<8x32xf32>
    %162 = tpu.matmul %155, %161, %cst_58 {dimension_numbers = #tpu.dot_dimension_numbers<[1], [0], [0], [1], [0, 0, 1, 1], [], []>} : vector<8x32xf32>, vector<32x32xf32>, vector<8x32xf32> -> vector<8x32xf32>
    %c0_59 = arith.constant 0 : index
    %c0_60 = arith.constant 0 : index
    %163 = vector.load %arg12[%c0_59, %c0_60] : memref<32x32xf32, #tpu.memory_space<vmem>>, vector<32x32xf32>
    %cst_61 = arith.constant dense<0.000000e+00> : vector<8x32xf32>
    %164 = tpu.matmul %5, %163, %cst_61 {dimension_numbers = #tpu.dot_dimension_numbers<[1], [0], [0], [1], [0, 0, 1, 1], [], []>} : vector<8x32xf32>, vector<32x32xf32>, vector<8x32xf32> -> vector<8x32xf32>
    %c0_62 = arith.constant 0 : index
    %c0_63 = arith.constant 0 : index
    %165 = vector.load %arg13[%c0_62, %c0_63] : memref<32x32xf32, #tpu.memory_space<vmem>>, vector<32x32xf32>
    %cst_64 = arith.constant dense<0.000000e+00> : vector<8x32xf32>
    %166 = tpu.matmul %5, %165, %cst_64 {dimension_numbers = #tpu.dot_dimension_numbers<[1], [0], [0], [1], [0, 0, 1, 1], [], []>} : vector<8x32xf32>, vector<32x32xf32>, vector<8x32xf32> -> vector<8x32xf32>
    %cst_65 = arith.constant 0.000000e+00 : f32
    %167 = vector.broadcast %cst_65 : f32 to vector<8x32xf32>
    %c0_i32_66 = arith.constant 0 : i32
    %168 = vector.broadcast %c0_i32_66 : i32 to vector<1x32xi32>
    %169 = arith.cmpi sge, %6, %168 : vector<1x32xi32>
    %c8_i32_67 = arith.constant 8 : i32
    %170 = vector.broadcast %c8_i32_67 : i32 to vector<1x32xi32>
    %171 = arith.cmpi slt, %6, %170 : vector<1x32xi32>
    %172 = arith.andi %169, %171 : vector<1x32xi1>
    %173 = arith.extui %172 : vector<1x32xi1> to vector<1x32xi32>
    %174 = arith.sitofp %173 : vector<1x32xi32> to vector<1x32xf32>
    %175 = vector.broadcast %174 : vector<1x32xf32> to vector<8x32xf32>
    %176 = arith.mulf %162, %175 : vector<8x32xf32>
    %cst_68 = arith.constant dense<0.000000e+00> : vector<8x8xf32>
    %177 = tpu.matmul %176, %164, %cst_68 {dimension_numbers = #tpu.dot_dimension_numbers<[1], [1], [0], [0], [0, 0, 1, 0], [], []>} : vector<8x32xf32>, vector<8x32xf32>, vector<8x8xf32> -> vector<8x8xf32>
    %cst_69 = arith.constant 0.353553385 : f32
    %178 = vector.broadcast %cst_69 : f32 to vector<8x8xf32>
    %179 = arith.mulf %177, %178 : vector<8x8xf32>
    %cst_70 = arith.constant -1.000000e+06 : f32
    %180 = vector.broadcast %cst_70 : f32 to vector<8x8xf32>
    %181 = arith.select %160, %179, %180 : vector<8x8xi1>, vector<8x8xf32>
    %cst_71 = arith.constant dense<0xFF800000> : vector<8xf32>
    %182 = vector.multi_reduction <maximumf>, %181, %cst_71 [1] : vector<8x8xf32> to vector<8xf32>
    %183 = vector.shape_cast %182 : vector<8xf32> to vector<8x1xf32>
    %184 = vector.broadcast %183 : vector<8x1xf32> to vector<8x8xf32>
    %185 = arith.subf %181, %184 : vector<8x8xf32>
    %186 = math.exp %185 : vector<8x8xf32>
    %cst_72 = arith.constant dense<0.000000e+00> : vector<8xf32>
    %187 = vector.multi_reduction <add>, %186, %cst_72 [1] : vector<8x8xf32> to vector<8xf32>
    %188 = vector.shape_cast %187 : vector<8xf32> to vector<8x1xf32>
    %189 = tpu.reciprocal %188 {approx = true} : vector<8x1xf32> -> vector<8x1xf32>
    %190 = vector.broadcast %189 : vector<8x1xf32> to vector<8x8xf32>
    %191 = arith.mulf %186, %190 : vector<8x8xf32>
    %192 = vector.broadcast %174 : vector<1x32xf32> to vector<8x32xf32>
    %193 = arith.mulf %166, %192 : vector<8x32xf32>
    %cst_73 = arith.constant dense<0.000000e+00> : vector<8x32xf32>
    %194 = tpu.matmul %191, %193, %cst_73 {dimension_numbers = #tpu.dot_dimension_numbers<[1], [0], [0], [1], [0, 0, 1, 1], [], []>} : vector<8x8xf32>, vector<8x32xf32>, vector<8x32xf32> -> vector<8x32xf32>
    %195 = arith.addf %167, %194 : vector<8x32xf32>
    %c8_i32_74 = arith.constant 8 : i32
    %196 = vector.broadcast %c8_i32_74 : i32 to vector<1x32xi32>
    %197 = arith.cmpi sge, %6, %196 : vector<1x32xi32>
    %c16_i32_75 = arith.constant 16 : i32
    %198 = vector.broadcast %c16_i32_75 : i32 to vector<1x32xi32>
    %199 = arith.cmpi slt, %6, %198 : vector<1x32xi32>
    %200 = arith.andi %197, %199 : vector<1x32xi1>
    %201 = arith.extui %200 : vector<1x32xi1> to vector<1x32xi32>
    %202 = arith.sitofp %201 : vector<1x32xi32> to vector<1x32xf32>
    %203 = vector.broadcast %202 : vector<1x32xf32> to vector<8x32xf32>
    %204 = arith.mulf %162, %203 : vector<8x32xf32>
    %cst_76 = arith.constant dense<0.000000e+00> : vector<8x8xf32>
    %205 = tpu.matmul %204, %164, %cst_76 {dimension_numbers = #tpu.dot_dimension_numbers<[1], [1], [0], [0], [0, 0, 1, 0], [], []>} : vector<8x32xf32>, vector<8x32xf32>, vector<8x8xf32> -> vector<8x8xf32>
    %cst_77 = arith.constant 0.353553385 : f32
    %206 = vector.broadcast %cst_77 : f32 to vector<8x8xf32>
    %207 = arith.mulf %205, %206 : vector<8x8xf32>
    %cst_78 = arith.constant -1.000000e+06 : f32
    %208 = vector.broadcast %cst_78 : f32 to vector<8x8xf32>
    %209 = arith.select %160, %207, %208 : vector<8x8xi1>, vector<8x8xf32>
    %cst_79 = arith.constant dense<0xFF800000> : vector<8xf32>
    %210 = vector.multi_reduction <maximumf>, %209, %cst_79 [1] : vector<8x8xf32> to vector<8xf32>
    %211 = vector.shape_cast %210 : vector<8xf32> to vector<8x1xf32>
    %212 = vector.broadcast %211 : vector<8x1xf32> to vector<8x8xf32>
    %213 = arith.subf %209, %212 : vector<8x8xf32>
    %214 = math.exp %213 : vector<8x8xf32>
    %cst_80 = arith.constant dense<0.000000e+00> : vector<8xf32>
    %215 = vector.multi_reduction <add>, %214, %cst_80 [1] : vector<8x8xf32> to vector<8xf32>
    %216 = vector.shape_cast %215 : vector<8xf32> to vector<8x1xf32>
    %217 = tpu.reciprocal %216 {approx = true} : vector<8x1xf32> -> vector<8x1xf32>
    %218 = vector.broadcast %217 : vector<8x1xf32> to vector<8x8xf32>
    %219 = arith.mulf %214, %218 : vector<8x8xf32>
    %220 = vector.broadcast %202 : vector<1x32xf32> to vector<8x32xf32>
    %221 = arith.mulf %166, %220 : vector<8x32xf32>
    %cst_81 = arith.constant dense<0.000000e+00> : vector<8x32xf32>
    %222 = tpu.matmul %219, %221, %cst_81 {dimension_numbers = #tpu.dot_dimension_numbers<[1], [0], [0], [1], [0, 0, 1, 1], [], []>} : vector<8x8xf32>, vector<8x32xf32>, vector<8x32xf32> -> vector<8x32xf32>
    %223 = arith.addf %195, %222 : vector<8x32xf32>
    %c16_i32_82 = arith.constant 16 : i32
    %224 = vector.broadcast %c16_i32_82 : i32 to vector<1x32xi32>
    %225 = arith.cmpi sge, %6, %224 : vector<1x32xi32>
    %c24_i32_83 = arith.constant 24 : i32
    %226 = vector.broadcast %c24_i32_83 : i32 to vector<1x32xi32>
    %227 = arith.cmpi slt, %6, %226 : vector<1x32xi32>
    %228 = arith.andi %225, %227 : vector<1x32xi1>
    %229 = arith.extui %228 : vector<1x32xi1> to vector<1x32xi32>
    %230 = arith.sitofp %229 : vector<1x32xi32> to vector<1x32xf32>
    %231 = vector.broadcast %230 : vector<1x32xf32> to vector<8x32xf32>
    %232 = arith.mulf %162, %231 : vector<8x32xf32>
    %cst_84 = arith.constant dense<0.000000e+00> : vector<8x8xf32>
    %233 = tpu.matmul %232, %164, %cst_84 {dimension_numbers = #tpu.dot_dimension_numbers<[1], [1], [0], [0], [0, 0, 1, 0], [], []>} : vector<8x32xf32>, vector<8x32xf32>, vector<8x8xf32> -> vector<8x8xf32>
    %cst_85 = arith.constant 0.353553385 : f32
    %234 = vector.broadcast %cst_85 : f32 to vector<8x8xf32>
    %235 = arith.mulf %233, %234 : vector<8x8xf32>
    %cst_86 = arith.constant -1.000000e+06 : f32
    %236 = vector.broadcast %cst_86 : f32 to vector<8x8xf32>
    %237 = arith.select %160, %235, %236 : vector<8x8xi1>, vector<8x8xf32>
    %cst_87 = arith.constant dense<0xFF800000> : vector<8xf32>
    %238 = vector.multi_reduction <maximumf>, %237, %cst_87 [1] : vector<8x8xf32> to vector<8xf32>
    %239 = vector.shape_cast %238 : vector<8xf32> to vector<8x1xf32>
    %240 = vector.broadcast %239 : vector<8x1xf32> to vector<8x8xf32>
    %241 = arith.subf %237, %240 : vector<8x8xf32>
    %242 = math.exp %241 : vector<8x8xf32>
    %cst_88 = arith.constant dense<0.000000e+00> : vector<8xf32>
    %243 = vector.multi_reduction <add>, %242, %cst_88 [1] : vector<8x8xf32> to vector<8xf32>
    %244 = vector.shape_cast %243 : vector<8xf32> to vector<8x1xf32>
    %245 = tpu.reciprocal %244 {approx = true} : vector<8x1xf32> -> vector<8x1xf32>
    %246 = vector.broadcast %245 : vector<8x1xf32> to vector<8x8xf32>
    %247 = arith.mulf %242, %246 : vector<8x8xf32>
    %248 = vector.broadcast %230 : vector<1x32xf32> to vector<8x32xf32>
    %249 = arith.mulf %166, %248 : vector<8x32xf32>
    %cst_89 = arith.constant dense<0.000000e+00> : vector<8x32xf32>
    %250 = tpu.matmul %247, %249, %cst_89 {dimension_numbers = #tpu.dot_dimension_numbers<[1], [0], [0], [1], [0, 0, 1, 1], [], []>} : vector<8x8xf32>, vector<8x32xf32>, vector<8x32xf32> -> vector<8x32xf32>
    %251 = arith.addf %223, %250 : vector<8x32xf32>
    %c24_i32_90 = arith.constant 24 : i32
    %252 = vector.broadcast %c24_i32_90 : i32 to vector<1x32xi32>
    %253 = arith.cmpi sge, %6, %252 : vector<1x32xi32>
    %c32_i32_91 = arith.constant 32 : i32
    %254 = vector.broadcast %c32_i32_91 : i32 to vector<1x32xi32>
    %255 = arith.cmpi slt, %6, %254 : vector<1x32xi32>
    %256 = arith.andi %253, %255 : vector<1x32xi1>
    %257 = arith.extui %256 : vector<1x32xi1> to vector<1x32xi32>
    %258 = arith.sitofp %257 : vector<1x32xi32> to vector<1x32xf32>
    %259 = vector.broadcast %258 : vector<1x32xf32> to vector<8x32xf32>
    %260 = arith.mulf %162, %259 : vector<8x32xf32>
    %cst_92 = arith.constant dense<0.000000e+00> : vector<8x8xf32>
    %261 = tpu.matmul %260, %164, %cst_92 {dimension_numbers = #tpu.dot_dimension_numbers<[1], [1], [0], [0], [0, 0, 1, 0], [], []>} : vector<8x32xf32>, vector<8x32xf32>, vector<8x8xf32> -> vector<8x8xf32>
    %cst_93 = arith.constant 0.353553385 : f32
    %262 = vector.broadcast %cst_93 : f32 to vector<8x8xf32>
    %263 = arith.mulf %261, %262 : vector<8x8xf32>
    %cst_94 = arith.constant -1.000000e+06 : f32
    %264 = vector.broadcast %cst_94 : f32 to vector<8x8xf32>
    %265 = arith.select %160, %263, %264 : vector<8x8xi1>, vector<8x8xf32>
    %cst_95 = arith.constant dense<0xFF800000> : vector<8xf32>
    %266 = vector.multi_reduction <maximumf>, %265, %cst_95 [1] : vector<8x8xf32> to vector<8xf32>
    %267 = vector.shape_cast %266 : vector<8xf32> to vector<8x1xf32>
    %268 = vector.broadcast %267 : vector<8x1xf32> to vector<8x8xf32>
    %269 = arith.subf %265, %268 : vector<8x8xf32>
    %270 = math.exp %269 : vector<8x8xf32>
    %cst_96 = arith.constant dense<0.000000e+00> : vector<8xf32>
    %271 = vector.multi_reduction <add>, %270, %cst_96 [1] : vector<8x8xf32> to vector<8xf32>
    %272 = vector.shape_cast %271 : vector<8xf32> to vector<8x1xf32>
    %273 = tpu.reciprocal %272 {approx = true} : vector<8x1xf32> -> vector<8x1xf32>
    %274 = vector.broadcast %273 : vector<8x1xf32> to vector<8x8xf32>
    %275 = arith.mulf %270, %274 : vector<8x8xf32>
    %276 = vector.broadcast %258 : vector<1x32xf32> to vector<8x32xf32>
    %277 = arith.mulf %166, %276 : vector<8x32xf32>
    %cst_97 = arith.constant dense<0.000000e+00> : vector<8x32xf32>
    %278 = tpu.matmul %275, %277, %cst_97 {dimension_numbers = #tpu.dot_dimension_numbers<[1], [0], [0], [1], [0, 0, 1, 1], [], []>} : vector<8x8xf32>, vector<8x32xf32>, vector<8x32xf32> -> vector<8x32xf32>
    %279 = arith.addf %251, %278 : vector<8x32xf32>
    %c0_98 = arith.constant 0 : index
    %c0_99 = arith.constant 0 : index
    %280 = vector.load %arg14[%c0_98, %c0_99] : memref<32x32xf32, #tpu.memory_space<vmem>>, vector<32x32xf32>
    %cst_100 = arith.constant dense<0.000000e+00> : vector<8x32xf32>
    %281 = tpu.matmul %279, %280, %cst_100 {dimension_numbers = #tpu.dot_dimension_numbers<[1], [0], [0], [1], [0, 0, 1, 1], [], []>} : vector<8x32xf32>, vector<32x32xf32>, vector<8x32xf32> -> vector<8x32xf32>
    %282 = arith.addf %155, %281 : vector<8x32xf32>
    %c0_101 = arith.constant 0 : index
    %c0_102 = arith.constant 0 : index
    %283 = vector.load %arg15[%c0_101, %c0_102] : memref<1x32xf32, #tpu.memory_space<vmem>>, vector<1x32xf32>
    %c0_103 = arith.constant 0 : index
    %c0_104 = arith.constant 0 : index
    %284 = vector.load %arg16[%c0_103, %c0_104] : memref<1x32xf32, #tpu.memory_space<vmem>>, vector<1x32xf32>
    %cst_105 = arith.constant dense<0.000000e+00> : vector<8xf32>
    %285 = vector.multi_reduction <add>, %282, %cst_105 [1] : vector<8x32xf32> to vector<8xf32>
    %286 = vector.shape_cast %285 : vector<8xf32> to vector<8x1xf32>
    %cst_106 = arith.constant 3.200000e+01 : f32
    %287 = vector.broadcast %cst_106 : f32 to vector<8x1xf32>
    %288 = arith.divf %286, %287 : vector<8x1xf32>
    %289 = vector.broadcast %288 : vector<8x1xf32> to vector<8x32xf32>
    %290 = arith.subf %282, %289 : vector<8x32xf32>
    %291 = arith.mulf %290, %290 : vector<8x32xf32>
    %cst_107 = arith.constant dense<0.000000e+00> : vector<8xf32>
    %292 = vector.multi_reduction <add>, %291, %cst_107 [1] : vector<8x32xf32> to vector<8xf32>
    %293 = vector.shape_cast %292 : vector<8xf32> to vector<8x1xf32>
    %cst_108 = arith.constant 3.200000e+01 : f32
    %294 = vector.broadcast %cst_108 : f32 to vector<8x1xf32>
    %295 = arith.divf %293, %294 : vector<8x1xf32>
    %296 = vector.broadcast %288 : vector<8x1xf32> to vector<8x32xf32>
    %297 = arith.subf %282, %296 : vector<8x32xf32>
    %cst_109 = arith.constant 9.99999974E-6 : f32
    %298 = vector.broadcast %cst_109 : f32 to vector<8x1xf32>
    %299 = arith.addf %295, %298 : vector<8x1xf32>
    %300 = math.rsqrt %299 : vector<8x1xf32>
    %301 = vector.broadcast %300 : vector<8x1xf32> to vector<8x32xf32>
    %302 = arith.mulf %297, %301 : vector<8x32xf32>
    %303 = vector.broadcast %283 : vector<1x32xf32> to vector<8x32xf32>
    %304 = arith.mulf %302, %303 : vector<8x32xf32>
    %305 = vector.broadcast %284 : vector<1x32xf32> to vector<8x32xf32>
    %306 = arith.addf %304, %305 : vector<8x32xf32>
    %c0_110 = arith.constant 0 : index
    %c0_111 = arith.constant 0 : index
    %307 = vector.load %arg17[%c0_110, %c0_111] : memref<32x64xf32, #tpu.memory_space<vmem>>, vector<32x64xf32>
    %cst_112 = arith.constant dense<0.000000e+00> : vector<8x64xf32>
    %308 = tpu.matmul %306, %307, %cst_112 {dimension_numbers = #tpu.dot_dimension_numbers<[1], [0], [0], [1], [0, 0, 1, 1], [], []>} : vector<8x32xf32>, vector<32x64xf32>, vector<8x64xf32> -> vector<8x64xf32>
    %c0_113 = arith.constant 0 : index
    %c0_114 = arith.constant 0 : index
    %309 = vector.load %arg18[%c0_113, %c0_114] : memref<1x64xf32, #tpu.memory_space<vmem>>, vector<1x64xf32>
    %310 = vector.broadcast %309 : vector<1x64xf32> to vector<8x64xf32>
    %311 = arith.addf %308, %310 : vector<8x64xf32>
    %cst_115 = arith.constant 0.000000e+00 : f32
    %312 = vector.broadcast %cst_115 : f32 to vector<8x64xf32>
    %313 = arith.maximumf %311, %312 : vector<8x64xf32>
    %c0_116 = arith.constant 0 : index
    %c0_117 = arith.constant 0 : index
    %314 = vector.load %arg19[%c0_116, %c0_117] : memref<64x32xf32, #tpu.memory_space<vmem>>, vector<64x32xf32>
    %cst_118 = arith.constant dense<0.000000e+00> : vector<8x32xf32>
    %315 = tpu.matmul %313, %314, %cst_118 {dimension_numbers = #tpu.dot_dimension_numbers<[1], [0], [0], [1], [0, 0, 1, 1], [], []>} : vector<8x64xf32>, vector<64x32xf32>, vector<8x32xf32> -> vector<8x32xf32>
    %c0_119 = arith.constant 0 : index
    %c0_120 = arith.constant 0 : index
    %316 = vector.load %arg20[%c0_119, %c0_120] : memref<1x32xf32, #tpu.memory_space<vmem>>, vector<1x32xf32>
    %317 = vector.broadcast %316 : vector<1x32xf32> to vector<8x32xf32>
    %318 = arith.addf %315, %317 : vector<8x32xf32>
    %319 = arith.addf %306, %318 : vector<8x32xf32>
    %c0_121 = arith.constant 0 : index
    %c0_122 = arith.constant 0 : index
    %320 = vector.load %arg21[%c0_121, %c0_122] : memref<1x32xf32, #tpu.memory_space<vmem>>, vector<1x32xf32>
    %c0_123 = arith.constant 0 : index
    %c0_124 = arith.constant 0 : index
    %321 = vector.load %arg22[%c0_123, %c0_124] : memref<1x32xf32, #tpu.memory_space<vmem>>, vector<1x32xf32>
    %cst_125 = arith.constant dense<0.000000e+00> : vector<8xf32>
    %322 = vector.multi_reduction <add>, %319, %cst_125 [1] : vector<8x32xf32> to vector<8xf32>
    %323 = vector.shape_cast %322 : vector<8xf32> to vector<8x1xf32>
    %cst_126 = arith.constant 3.200000e+01 : f32
    %324 = vector.broadcast %cst_126 : f32 to vector<8x1xf32>
    %325 = arith.divf %323, %324 : vector<8x1xf32>
    %326 = vector.broadcast %325 : vector<8x1xf32> to vector<8x32xf32>
    %327 = arith.subf %319, %326 : vector<8x32xf32>
    %328 = arith.mulf %327, %327 : vector<8x32xf32>
    %cst_127 = arith.constant dense<0.000000e+00> : vector<8xf32>
    %329 = vector.multi_reduction <add>, %328, %cst_127 [1] : vector<8x32xf32> to vector<8xf32>
    %330 = vector.shape_cast %329 : vector<8xf32> to vector<8x1xf32>
    %cst_128 = arith.constant 3.200000e+01 : f32
    %331 = vector.broadcast %cst_128 : f32 to vector<8x1xf32>
    %332 = arith.divf %330, %331 : vector<8x1xf32>
    %333 = vector.broadcast %325 : vector<8x1xf32> to vector<8x32xf32>
    %334 = arith.subf %319, %333 : vector<8x32xf32>
    %cst_129 = arith.constant 9.99999974E-6 : f32
    %335 = vector.broadcast %cst_129 : f32 to vector<8x1xf32>
    %336 = arith.addf %332, %335 : vector<8x1xf32>
    %337 = math.rsqrt %336 : vector<8x1xf32>
    %338 = vector.broadcast %337 : vector<8x1xf32> to vector<8x32xf32>
    %339 = arith.mulf %334, %338 : vector<8x32xf32>
    %340 = vector.broadcast %320 : vector<1x32xf32> to vector<8x32xf32>
    %341 = arith.mulf %339, %340 : vector<8x32xf32>
    %342 = vector.broadcast %321 : vector<1x32xf32> to vector<8x32xf32>
    %343 = arith.addf %341, %342 : vector<8x32xf32>
    %c0_130 = arith.constant 0 : index
    %c0_131 = arith.constant 0 : index
    %c0_132 = arith.constant 0 : index
    %344 = vector.load %arg23[%c0_130, %c0_131, %c0_132] : memref<1x8x32xf32, #tpu.memory_space<vmem>>, vector<1x8x32xf32>
    %345 = vector.shape_cast %344 : vector<1x8x32xf32> to vector<8x32xf32>
    %346 = vector.shape_cast %343 : vector<8x32xf32> to vector<1x8x32xf32>
    tpu.vector_store %arg23[%c0_130, %c0_131, %c0_132], %346 {strides = array<i32>} : memref<1x8x32xf32, #tpu.memory_space<vmem>>, vector<1x8x32xf32>,
    return
  }
  func.func @transform_0(%arg0: i32, %arg1: memref<2xi32, #tpu.memory_space<smem>>) -> (i32, i32, i32) {
    %c0_i32 = arith.constant 0 : i32
    %c0_i32_0 = arith.constant 0 : i32
    %c0_i32_1 = arith.constant 0 : i32
    return %arg0, %c0_i32, %c0_i32_0 : i32, i32, i32
  }
  func.func @transform_1(%arg0: i32, %arg1: memref<2xi32, #tpu.memory_space<smem>>) -> (i32, i32, i32) {
    %c0_i32 = arith.constant 0 : i32
    %c0_i32_0 = arith.constant 0 : i32
    %c0_i32_1 = arith.constant 0 : i32
    return %arg0, %c0_i32, %c0_i32_0 : i32, i32, i32
  }
  func.func @transform_2(%arg0: i32, %arg1: memref<2xi32, #tpu.memory_space<smem>>) -> (i32, i32, i32) {
    %c0_i32 = arith.constant 0 : i32
    %c0_i32_0 = arith.constant 0 : i32
    %c0_i32_1 = arith.constant 0 : i32
    return %arg0, %c0_i32, %c0_i32_0 : i32, i32, i32
  }
  func.func @transform_3(%arg0: i32, %arg1: memref<2xi32, #tpu.memory_space<smem>>) -> (i32, i32) {
    %c0_i32 = arith.constant 0 : i32
    %c0_i32_0 = arith.constant 0 : i32
    %c0_i32_1 = arith.constant 0 : i32
    return %c0_i32, %c0_i32_0 : i32, i32
  }
  func.func @transform_4(%arg0: i32, %arg1: memref<2xi32, #tpu.memory_space<smem>>) -> (i32, i32) {
    %c0_i32 = arith.constant 0 : i32
    %c0_i32_0 = arith.constant 0 : i32
    %c0_i32_1 = arith.constant 0 : i32
    return %c0_i32, %c0_i32_0 : i32, i32
  }
  func.func @transform_5(%arg0: i32, %arg1: memref<2xi32, #tpu.memory_space<smem>>) -> (i32, i32) {
    %c0_i32 = arith.constant 0 : i32
    %c0_i32_0 = arith.constant 0 : i32
    %c0_i32_1 = arith.constant 0 : i32
    return %c0_i32, %c0_i32_0 : i32, i32
  }
  func.func @transform_6(%arg0: i32, %arg1: memref<2xi32, #tpu.memory_space<smem>>) -> (i32, i32) {
    %c0_i32 = arith.constant 0 : i32
    %c0_i32_0 = arith.constant 0 : i32
    %c0_i32_1 = arith.constant 0 : i32
    return %c0_i32, %c0_i32_0 : i32, i32
  }
  func.func @transform_7(%arg0: i32, %arg1: memref<2xi32, #tpu.memory_space<smem>>) -> (i32, i32) {
    %c0_i32 = arith.constant 0 : i32
    %c0_i32_0 = arith.constant 0 : i32
    %c0_i32_1 = arith.constant 0 : i32
    return %c0_i32, %c0_i32_0 : i32, i32
  }
  func.func @transform_8(%arg0: i32, %arg1: memref<2xi32, #tpu.memory_space<smem>>) -> (i32, i32) {
    %c0_i32 = arith.constant 0 : i32
    %c0_i32_0 = arith.constant 0 : i32
    %c0_i32_1 = arith.constant 0 : i32
    return %c0_i32, %c0_i32_0 : i32, i32
  }
  func.func @transform_9(%arg0: i32, %arg1: memref<2xi32, #tpu.memory_space<smem>>) -> (i32, i32) {
    %c0_i32 = arith.constant 0 : i32
    %c0_i32_0 = arith.constant 0 : i32
    %c0_i32_1 = arith.constant 0 : i32
    return %c0_i32, %c0_i32_0 : i32, i32
  }
  func.func @transform_10(%arg0: i32, %arg1: memref<2xi32, #tpu.memory_space<smem>>) -> (i32, i32) {
    %c0_i32 = arith.constant 0 : i32
    %c0_i32_0 = arith.constant 0 : i32
    %c0_i32_1 = arith.constant 0 : i32
    return %c0_i32, %c0_i32_0 : i32, i32
  }
  func.func @transform_11(%arg0: i32, %arg1: memref<2xi32, #tpu.memory_space<smem>>) -> (i32, i32) {
    %c0_i32 = arith.constant 0 : i32
    %c0_i32_0 = arith.constant 0 : i32
    %c0_i32_1 = arith.constant 0 : i32
    return %c0_i32, %c0_i32_0 : i32, i32
  }
  func.func @transform_12(%arg0: i32, %arg1: memref<2xi32, #tpu.memory_space<smem>>) -> (i32, i32) {
    %c0_i32 = arith.constant 0 : i32
    %c0_i32_0 = arith.constant 0 : i32
    %c0_i32_1 = arith.constant 0 : i32
    return %c0_i32, %c0_i32_0 : i32, i32
  }
  func.func @transform_13(%arg0: i32, %arg1: memref<2xi32, #tpu.memory_space<smem>>) -> (i32, i32) {
    %c0_i32 = arith.constant 0 : i32
    %c0_i32_0 = arith.constant 0 : i32
    %c0_i32_1 = arith.constant 0 : i32
    return %c0_i32, %c0_i32_0 : i32, i32
  }
  func.func @transform_14(%arg0: i32, %arg1: memref<2xi32, #tpu.memory_space<smem>>) -> (i32, i32) {
    %c0_i32 = arith.constant 0 : i32
    %c0_i32_0 = arith.constant 0 : i32
    %c0_i32_1 = arith.constant 0 : i32
    return %c0_i32, %c0_i32_0 : i32, i32
  }
  func.func @transform_15(%arg0: i32, %arg1: memref<2xi32, #tpu.memory_space<smem>>) -> (i32, i32) {
    %c0_i32 = arith.constant 0 : i32
    %c0_i32_0 = arith.constant 0 : i32
    %c0_i32_1 = arith.constant 0 : i32
    return %c0_i32, %c0_i32_0 : i32, i32
  }
  func.func @transform_16(%arg0: i32, %arg1: memref<2xi32, #tpu.memory_space<smem>>) -> (i32, i32) {
    %c0_i32 = arith.constant 0 : i32
    %c0_i32_0 = arith.constant 0 : i32
    %c0_i32_1 = arith.constant 0 : i32
    return %c0_i32, %c0_i32_0 : i32, i32
  }
  func.func @transform_17(%arg0: i32, %arg1: memref<2xi32, #tpu.memory_space<smem>>) -> (i32, i32) {
    %c0_i32 = arith.constant 0 : i32
    %c0_i32_0 = arith.constant 0 : i32
    %c0_i32_1 = arith.constant 0 : i32
    return %c0_i32, %c0_i32_0 : i32, i32
  }
  func.func @transform_18(%arg0: i32, %arg1: memref<2xi32, #tpu.memory_space<smem>>) -> (i32, i32) {
    %c0_i32 = arith.constant 0 : i32
    %c0_i32_0 = arith.constant 0 : i32
    %c0_i32_1 = arith.constant 0 : i32
    return %c0_i32, %c0_i32_0 : i32, i32
  }
  func.func @transform_19(%arg0: i32, %arg1: memref<2xi32, #tpu.memory_space<smem>>) -> (i32, i32) {
    %c0_i32 = arith.constant 0 : i32
    %c0_i32_0 = arith.constant 0 : i32
    %c0_i32_1 = arith.constant 0 : i32
    return %c0_i32, %c0_i32_0 : i32, i32
  }
  func.func @transform_20(%arg0: i32, %arg1: memref<2xi32, #tpu.memory_space<smem>>) -> (i32, i32) {
    %c0_i32 = arith.constant 0 : i32
    %c0_i32_0 = arith.constant 0 : i32
    %c0_i32_1 = arith.constant 0 : i32
    return %c0_i32, %c0_i32_0 : i32, i32
  }
  func.func @transform_21(%arg0: i32, %arg1: memref<2xi32, #tpu.memory_space<smem>>) -> (i32, i32, i32) {
    %c0_i32 = arith.constant 0 : i32
    %c0_i32_0 = arith.constant 0 : i32
    %c0_i32_1 = arith.constant 0 : i32
    return %arg0, %c0_i32, %c0_i32_0 : i32, i32, i32
  }
}

module attributes {stable_mosaic.version = 11 : i64} {
  func.func @_decoder_block_kernel(%arg0: i32, %arg1: memref<2xi32, #tpu.memory_space<smem>>, %arg2: memref<1x8x32xf32, #tpu.memory_space<vmem>>, %arg3: memref<1x8x32xf32, #tpu.memory_space<vmem>>, %arg4: memref<1x8x32xf32, #tpu.memory_space<vmem>>, %arg5: memref<32x32xf32, #tpu.memory_space<vmem>>, %arg6: memref<32x32xf32, #tpu.memory_space<vmem>>, %arg7: memref<32x32xf32, #tpu.memory_space<vmem>>, %arg8: memref<32x32xf32, #tpu.memory_space<vmem>>, %arg9: memref<1x32xf32, #tpu.memory_space<vmem>>, %arg10: memref<1x32xf32, #tpu.memory_space<vmem>>, %arg11: memref<32x32xf32, #tpu.memory_space<vmem>>, %arg12: memref<32x32xf32, #tpu.memory_space<vmem>>, %arg13: memref<32x32xf32, #tpu.memory_space<vmem>>, %arg14: memref<32x32xf32, #tpu.memory_space<vmem>>, %arg15: memref<1x32xf32, #tpu.memory_space<vmem>>, %arg16: memref<1x32xf32, #tpu.memory_space<vmem>>, %arg17: memref<32x64xf32, #tpu.memory_space<vmem>>, %arg18: memref<1x64xf32, #tpu.memory_space<vmem>>, %arg19: memref<64x32xf32, #tpu.memory_space<vmem>>, %arg20: memref<1x32xf32, #tpu.memory_space<vmem>>, %arg21: memref<1x32xf32, #tpu.memory_space<vmem>>, %arg22: memref<1x32xf32, #tpu.memory_space<vmem>>, %arg23: memref<1x8x32xf32, #tpu.memory_space<vmem>>) attributes {dimension_semantics = [#tpu.dimension_semantics<parallel>], iteration_bounds = array<i64: 2>, scalar_prefetch = 1 : i64, scratch_operands = 0 : i64, tpu.core_type = #tpu.core_type<tc>, window_params = [{transform_indices = @transform_0, window_bounds = array<i64: 1, 8, 32>}, {transform_indices = @transform_1, window_bounds = array<i64: 1, 8, 32>}, {transform_indices = @transform_2, window_bounds = array<i64: 1, 8, 32>}, {pipeline_mode = #tpu.pipeline_mode<synchronous>, transform_indices = @transform_3, window_bounds = array<i64: 32, 32>}, {pipeline_mode = #tpu.pipeline_mode<synchronous>, transform_indices = @transform_4, window_bounds = array<i64: 32, 32>}, {pipeline_mode = #tpu.pipeline_mode<synchronous>, transform_indices = @transform_5, window_bounds = array<i64: 32, 32>}, {pipeline_mode = #tpu.pipeline_mode<synchronous>, transform_indices = @transform_6, window_bounds = array<i64: 32, 32>}, {pipeline_mode = #tpu.pipeline_mode<synchronous>, transform_indices = @transform_7, window_bounds = array<i64: 1, 32>}, {pipeline_mode = #tpu.pipeline_mode<synchronous>, transform_indices = @transform_8, window_bounds = array<i64: 1, 32>}, {pipeline_mode = #tpu.pipeline_mode<synchronous>, transform_indices = @transform_9, window_bounds = array<i64: 32, 32>}, {pipeline_mode = #tpu.pipeline_mode<synchronous>, transform_indices = @transform_10, window_bounds = array<i64: 32, 32>}, {pipeline_mode = #tpu.pipeline_mode<synchronous>, transform_indices = @transform_11, window_bounds = array<i64: 32, 32>}, {pipeline_mode = #tpu.pipeline_mode<synchronous>, transform_indices = @transform_12, window_bounds = array<i64: 32, 32>}, {pipeline_mode = #tpu.pipeline_mode<synchronous>, transform_indices = @transform_13, window_bounds = array<i64: 1, 32>}, {pipeline_mode = #tpu.pipeline_mode<synchronous>, transform_indices = @transform_14, window_bounds = array<i64: 1, 32>}, {pipeline_mode = #tpu.pipeline_mode<synchronous>, transform_indices = @transform_15, window_bounds = array<i64: 32, 64>}, {pipeline_mode = #tpu.pipeline_mode<synchronous>, transform_indices = @transform_16, window_bounds = array<i64: 1, 64>}, {pipeline_mode = #tpu.pipeline_mode<synchronous>, transform_indices = @transform_17, window_bounds = array<i64: 64, 32>}, {pipeline_mode = #tpu.pipeline_mode<synchronous>, transform_indices = @transform_18, window_bounds = array<i64: 1, 32>}, {pipeline_mode = #tpu.pipeline_mode<synchronous>, transform_indices = @transform_19, window_bounds = array<i64: 1, 32>}, {pipeline_mode = #tpu.pipeline_mode<synchronous>, transform_indices = @transform_20, window_bounds = array<i64: 1, 32>}, {transform_indices = @transform_21, window_bounds = array<i64: 1, 8, 32>}]} {
    %c0 = arith.constant 0 : index
    %c0_0 = arith.constant 0 : index
    %c0_1 = arith.constant 0 : index
    %0 = vector.load %arg2[%c0, %c0_0, %c0_1] : memref<1x8x32xf32, #tpu.memory_space<vmem>>, vector<1x8x32xf32>
    %1 = vector.shape_cast %0 : vector<1x8x32xf32> to vector<8x32xf32>
    %c0_2 = arith.constant 0 : index
    %c0_3 = arith.constant 0 : index
    %c0_4 = arith.constant 0 : index
    %2 = vector.load %arg3[%c0_2, %c0_3, %c0_4] : memref<1x8x32xf32, #tpu.memory_space<vmem>>, vector<1x8x32xf32>
    %3 = vector.shape_cast %2 : vector<1x8x32xf32> to vector<8x32xf32>
    %c0_5 = arith.constant 0 : index
    %c0_6 = arith.constant 0 : index
    %c0_7 = arith.constant 0 : index
    %4 = vector.load %arg4[%c0_5, %c0_6, %c0_7] : memref<1x8x32xf32, #tpu.memory_space<vmem>>, vector<1x8x32xf32>
    %5 = vector.shape_cast %4 : vector<1x8x32xf32> to vector<8x32xf32>
    %6 = tpu.iota {dimensions = array<i32: 1>} : vector<1x32xi32>
    %7 = tpu.iota {dimensions = array<i32: 0>} : vector<8x8xi32>
    %8 = tpu.iota {dimensions = array<i32: 1>} : vector<8x8xi32>
    %9 = arith.cmpi sle, %8, %7 : vector<8x8xi32>
    %c0_8 = arith.constant 0 : index
    %c0_9 = arith.constant 0 : index
    %10 = vector.load %arg5[%c0_8, %c0_9] : memref<32x32xf32, #tpu.memory_space<vmem>>, vector<32x32xf32>
    %cst = arith.constant dense<0.000000e+00> : vector<8x32xf32>
    %11 = tpu.matmul %1, %10, %cst {dimension_numbers = #tpu.dot_dimension_numbers<[1], [0], [0], [1], [0, 0, 1, 1], [], []>} : vector<8x32xf32>, vector<32x32xf32>, vector<8x32xf32> -> vector<8x32xf32>
    %c0_10 = arith.constant 0 : index
    %c0_11 = arith.constant 0 : index
    %12 = vector.load %arg6[%c0_10, %c0_11] : memref<32x32xf32, #tpu.memory_space<vmem>>, vector<32x32xf32>
    %cst_12 = arith.constant dense<0.000000e+00> : vector<8x32xf32>
    %13 = tpu.matmul %3, %12, %cst_12 {dimension_numbers = #tpu.dot_dimension_numbers<[1], [0], [0], [1], [0, 0, 1, 1], [], []>} : vector<8x32xf32>, vector<32x32xf32>, vector<8x32xf32> -> vector<8x32xf32>
    %c0_13 = arith.constant 0 : index
    %c0_14 = arith.constant 0 : index
    %14 = vector.load %arg7[%c0_13, %c0_14] : memref<32x32xf32, #tpu.memory_space<vmem>>, vector<32x32xf32>
    %cst_15 = arith.constant dense<0.000000e+00> : vector<8x32xf32>
    %15 = tpu.matmul %3, %14, %cst_15 {dimension_numbers = #tpu.dot_dimension_numbers<[1], [0], [0], [1], [0, 0, 1, 1], [], []>} : vector<8x32xf32>, vector<32x32xf32>, vector<8x32xf32> -> vector<8x32xf32>
    %cst_16 = arith.constant 0.000000e+00 : f32
    %16 = vector.broadcast %cst_16 : f32 to vector<8x32xf32>
    %c0_i32 = arith.constant 0 : i32
    %17 = vector.broadcast %c0_i32 : i32 to vector<1x32xi32>
    %18 = arith.cmpi sge, %6, %17 : vector<1x32xi32>
    %c8_i32 = arith.constant 8 : i32
    %19 = vector.broadcast %c8_i32 : i32 to vector<1x32xi32>
    %20 = arith.cmpi slt, %6, %19 : vector<1x32xi32>
    %21 = arith.andi %18, %20 : vector<1x32xi1>
    %22 = arith.extui %21 : vector<1x32xi1> to vector<1x32xi32>
    %23 = arith.sitofp %22 : vector<1x32xi32> to vector<1x32xf32>
    %24 = vector.broadcast %23 : vector<1x32xf32> to vector<8x32xf32>
    %25 = arith.mulf %11, %24 : vector<8x32xf32>
    %cst_17 = arith.constant dense<0.000000e+00> : vector<8x8xf32>
    %26 = tpu.matmul %25, %13, %cst_17 {dimension_numbers = #tpu.dot_dimension_numbers<[1], [1], [0], [0], [0, 0, 1, 0], [], []>} : vector<8x32xf32>, vector<8x32xf32>, vector<8x8xf32> -> vector<8x8xf32>
    %cst_18 = arith.constant 0.353553385 : f32
    %27 = vector.broadcast %cst_18 : f32 to vector<8x8xf32>
    %28 = arith.mulf %26, %27 : vector<8x8xf32>
    %cst_19 = arith.constant -1.000000e+06 : f32
    %29 = vector.broadcast %cst_19 : f32 to vector<8x8xf32>
    %30 = arith.select %9, %28, %29 : vector<8x8xi1>, vector<8x8xf32>
    %cst_20 = arith.constant dense<0xFF800000> : vector<8xf32>
    %31 = vector.multi_reduction <maximumf>, %30, %cst_20 [1] : vector<8x8xf32> to vector<8xf32>
    %32 = vector.shape_cast %31 : vector<8xf32> to vector<8x1xf32>
    %33 = vector.broadcast %32 : vector<8x1xf32> to vector<8x8xf32>
    %34 = arith.subf %30, %33 : vector<8x8xf32>
    %35 = math.exp %34 : vector<8x8xf32>
    %cst_21 = arith.constant dense<0.000000e+00> : vector<8xf32>
    %36 = vector.multi_reduction <add>, %35, %cst_21 [1] : vector<8x8xf32> to vector<8xf32>
    %37 = vector.shape_cast %36 : vector<8xf32> to vector<8x1xf32>
    %38 = tpu.reciprocal %37 {approx = true} : vector<8x1xf32> -> vector<8x1xf32>
    %39 = vector.broadcast %38 : vector<8x1xf32> to vector<8x8xf32>
    %40 = arith.mulf %35, %39 : vector<8x8xf32>
    %41 = vector.broadcast %23 : vector<1x32xf32> to vector<8x32xf32>
    %42 = arith.mulf %15, %41 : vector<8x32xf32>
    %cst_22 = arith.constant dense<0.000000e+00> : vector<8x32xf32>
    %43 = tpu.matmul %40, %42, %cst_22 {dimension_numbers = #tpu.dot_dimension_numbers<[1], [0], [0], [1], [0, 0, 1, 1], [], []>} : vector<8x8xf32>, vector<8x32xf32>, vector<8x32xf32> -> vector<8x32xf32>
    %44 = arith.addf %16, %43 : vector<8x32xf32>
    %c8_i32_23 = arith.constant 8 : i32
    %45 = vector.broadcast %c8_i32_23 : i32 to vector<1x32xi32>
    %46 = arith.cmpi sge, %6, %45 : vector<1x32xi32>
    %c16_i32 = arith.constant 16 : i32
    %47 = vector.broadcast %c16_i32 : i32 to vector<1x32xi32>
    %48 = arith.cmpi slt, %6, %47 : vector<1x32xi32>
    %49 = arith.andi %46, %48 : vector<1x32xi1>
    %50 = arith.extui %49 : vector<1x32xi1> to vector<1x32xi32>
    %51 = arith.sitofp %50 : vector<1x32xi32> to vector<1x32xf32>
    %52 = vector.broadcast %51 : vector<1x32xf32> to vector<8x32xf32>
    %53 = arith.mulf %11, %52 : vector<8x32xf32>
    %cst_24 = arith.constant dense<0.000000e+00> : vector<8x8xf32>
    %54 = tpu.matmul %53, %13, %cst_24 {dimension_numbers = #tpu.dot_dimension_numbers<[1], [1], [0], [0], [0, 0, 1, 0], [], []>} : vector<8x32xf32>, vector<8x32xf32>, vector<8x8xf32> -> vector<8x8xf32>
    %cst_25 = arith.constant 0.353553385 : f32
    %55 = vector.broadcast %cst_25 : f32 to vector<8x8xf32>
    %56 = arith.mulf %54, %55 : vector<8x8xf32>
    %cst_26 = arith.constant -1.000000e+06 : f32
    %57 = vector.broadcast %cst_26 : f32 to vector<8x8xf32>
    %58 = arith.select %9, %56, %57 : vector<8x8xi1>, vector<8x8xf32>
    %cst_27 = arith.constant dense<0xFF800000> : vector<8xf32>
    %59 = vector.multi_reduction <maximumf>, %58, %cst_27 [1] : vector<8x8xf32> to vector<8xf32>
    %60 = vector.shape_cast %59 : vector<8xf32> to vector<8x1xf32>
    %61 = vector.broadcast %60 : vector<8x1xf32> to vector<8x8xf32>
    %62 = arith.subf %58, %61 : vector<8x8xf32>
    %63 = math.exp %62 : vector<8x8xf32>
    %cst_28 = arith.constant dense<0.000000e+00> : vector<8xf32>
    %64 = vector.multi_reduction <add>, %63, %cst_28 [1] : vector<8x8xf32> to vector<8xf32>
    %65 = vector.shape_cast %64 : vector<8xf32> to vector<8x1xf32>
    %66 = tpu.reciprocal %65 {approx = true} : vector<8x1xf32> -> vector<8x1xf32>
    %67 = vector.broadcast %66 : vector<8x1xf32> to vector<8x8xf32>
    %68 = arith.mulf %63, %67 : vector<8x8xf32>
    %69 = vector.broadcast %51 : vector<1x32xf32> to vector<8x32xf32>
    %70 = arith.mulf %15, %69 : vector<8x32xf32>
    %cst_29 = arith.constant dense<0.000000e+00> : vector<8x32xf32>
    %71 = tpu.matmul %68, %70, %cst_29 {dimension_numbers = #tpu.dot_dimension_numbers<[1], [0], [0], [1], [0, 0, 1, 1], [], []>} : vector<8x8xf32>, vector<8x32xf32>, vector<8x32xf32> -> vector<8x32xf32>
    %72 = arith.addf %44, %71 : vector<8x32xf32>
    %c16_i32_30 = arith.constant 16 : i32
    %73 = vector.broadcast %c16_i32_30 : i32 to vector<1x32xi32>
    %74 = arith.cmpi sge, %6, %73 : vector<1x32xi32>
    %c24_i32 = arith.constant 24 : i32
    %75 = vector.broadcast %c24_i32 : i32 to vector<1x32xi32>
    %76 = arith.cmpi slt, %6, %75 : vector<1x32xi32>
    %77 = arith.andi %74, %76 : vector<1x32xi1>
    %78 = arith.extui %77 : vector<1x32xi1> to vector<1x32xi32>
    %79 = arith.sitofp %78 : vector<1x32xi32> to vector<1x32xf32>
    %80 = vector.broadcast %79 : vector<1x32xf32> to vector<8x32xf32>
    %81 = arith.mulf %11, %80 : vector<8x32xf32>
    %cst_31 = arith.constant dense<0.000000e+00> : vector<8x8xf32>
    %82 = tpu.matmul %81, %13, %cst_31 {dimension_numbers = #tpu.dot_dimension_numbers<[1], [1], [0], [0], [0, 0, 1, 0], [], []>} : vector<8x32xf32>, vector<8x32xf32>, vector<8x8xf32> -> vector<8x8xf32>
    %cst_32 = arith.constant 0.353553385 : f32
    %83 = vector.broadcast %cst_32 : f32 to vector<8x8xf32>
    %84 = arith.mulf %82, %83 : vector<8x8xf32>
    %cst_33 = arith.constant -1.000000e+06 : f32
    %85 = vector.broadcast %cst_33 : f32 to vector<8x8xf32>
    %86 = arith.select %9, %84, %85 : vector<8x8xi1>, vector<8x8xf32>
    %cst_34 = arith.constant dense<0xFF800000> : vector<8xf32>
    %87 = vector.multi_reduction <maximumf>, %86, %cst_34 [1] : vector<8x8xf32> to vector<8xf32>
    %88 = vector.shape_cast %87 : vector<8xf32> to vector<8x1xf32>
    %89 = vector.broadcast %88 : vector<8x1xf32> to vector<8x8xf32>
    %90 = arith.subf %86, %89 : vector<8x8xf32>
    %91 = math.exp %90 : vector<8x8xf32>
    %cst_35 = arith.constant dense<0.000000e+00> : vector<8xf32>
    %92 = vector.multi_reduction <add>, %91, %cst_35 [1] : vector<8x8xf32> to vector<8xf32>
    %93 = vector.shape_cast %92 : vector<8xf32> to vector<8x1xf32>
    %94 = tpu.reciprocal %93 {approx = true} : vector<8x1xf32> -> vector<8x1xf32>
    %95 = vector.broadcast %94 : vector<8x1xf32> to vector<8x8xf32>
    %96 = arith.mulf %91, %95 : vector<8x8xf32>
    %97 = vector.broadcast %79 : vector<1x32xf32> to vector<8x32xf32>
    %98 = arith.mulf %15, %97 : vector<8x32xf32>
    %cst_36 = arith.constant dense<0.000000e+00> : vector<8x32xf32>
    %99 = tpu.matmul %96, %98, %cst_36 {dimension_numbers = #tpu.dot_dimension_numbers<[1], [0], [0], [1], [0, 0, 1, 1], [], []>} : vector<8x8xf32>, vector<8x32xf32>, vector<8x32xf32> -> vector<8x32xf32>
    %100 = arith.addf %72, %99 : vector<8x32xf32>
    %c24_i32_37 = arith.constant 24 : i32
    %101 = vector.broadcast %c24_i32_37 : i32 to vector<1x32xi32>
    %102 = arith.cmpi sge, %6, %101 : vector<1x32xi32>
    %c32_i32 = arith.constant 32 : i32
    %103 = vector.broadcast %c32_i32 : i32 to vector<1x32xi32>
    %104 = arith.cmpi slt, %6, %103 : vector<1x32xi32>
    %105 = arith.andi %102, %104 : vector<1x32xi1>
    %106 = arith.extui %105 : vector<1x32xi1> to vector<1x32xi32>
    %107 = arith.sitofp %106 : vector<1x32xi32> to vector<1x32xf32>
    %108 = vector.broadcast %107 : vector<1x32xf32> to vector<8x32xf32>
    %109 = arith.mulf %11, %108 : vector<8x32xf32>
    %cst_38 = arith.constant dense<0.000000e+00> : vector<8x8xf32>
    %110 = tpu.matmul %109, %13, %cst_38 {dimension_numbers = #tpu.dot_dimension_numbers<[1], [1], [0], [0], [0, 0, 1, 0], [], []>} : vector<8x32xf32>, vector<8x32xf32>, vector<8x8xf32> -> vector<8x8xf32>
    %cst_39 = arith.constant 0.353553385 : f32
    %111 = vector.broadcast %cst_39 : f32 to vector<8x8xf32>
    %112 = arith.mulf %110, %111 : vector<8x8xf32>
    %cst_40 = arith.constant -1.000000e+06 : f32
    %113 = vector.broadcast %cst_40 : f32 to vector<8x8xf32>
    %114 = arith.select %9, %112, %113 : vector<8x8xi1>, vector<8x8xf32>
    %cst_41 = arith.constant dense<0xFF800000> : vector<8xf32>
    %115 = vector.multi_reduction <maximumf>, %114, %cst_41 [1] : vector<8x8xf32> to vector<8xf32>
    %116 = vector.shape_cast %115 : vector<8xf32> to vector<8x1xf32>
    %117 = vector.broadcast %116 : vector<8x1xf32> to vector<8x8xf32>
    %118 = arith.subf %114, %117 : vector<8x8xf32>
    %119 = math.exp %118 : vector<8x8xf32>
    %cst_42 = arith.constant dense<0.000000e+00> : vector<8xf32>
    %120 = vector.multi_reduction <add>, %119, %cst_42 [1] : vector<8x8xf32> to vector<8xf32>
    %121 = vector.shape_cast %120 : vector<8xf32> to vector<8x1xf32>
    %122 = tpu.reciprocal %121 {approx = true} : vector<8x1xf32> -> vector<8x1xf32>
    %123 = vector.broadcast %122 : vector<8x1xf32> to vector<8x8xf32>
    %124 = arith.mulf %119, %123 : vector<8x8xf32>
    %125 = vector.broadcast %107 : vector<1x32xf32> to vector<8x32xf32>
    %126 = arith.mulf %15, %125 : vector<8x32xf32>
    %cst_43 = arith.constant dense<0.000000e+00> : vector<8x32xf32>
    %127 = tpu.matmul %124, %126, %cst_43 {dimension_numbers = #tpu.dot_dimension_numbers<[1], [0], [0], [1], [0, 0, 1, 1], [], []>} : vector<8x8xf32>, vector<8x32xf32>, vector<8x32xf32> -> vector<8x32xf32>
    %128 = arith.addf %100, %127 : vector<8x32xf32>
    %c0_44 = arith.constant 0 : index
    %c0_45 = arith.constant 0 : index
    %129 = vector.load %arg8[%c0_44, %c0_45] : memref<32x32xf32, #tpu.memory_space<vmem>>, vector<32x32xf32>
    %cst_46 = arith.constant dense<0.000000e+00> : vector<8x32xf32>
    %130 = tpu.matmul %128, %129, %cst_46 {dimension_numbers = #tpu.dot_dimension_numbers<[1], [0], [0], [1], [0, 0, 1, 1], [], []>} : vector<8x32xf32>, vector<32x32xf32>, vector<8x32xf32> -> vector<8x32xf32>
    %131 = arith.addf %1, %130 : vector<8x32xf32>
    %c0_47 = arith.constant 0 : index
    %c0_48 = arith.constant 0 : index
    %132 = vector.load %arg9[%c0_47, %c0_48] : memref<1x32xf32, #tpu.memory_space<vmem>>, vector<1x32xf32>
    %c0_49 = arith.constant 0 : index
    %c0_50 = arith.constant 0 : index
    %133 = vector.load %arg10[%c0_49, %c0_50] : memref<1x32xf32, #tpu.memory_space<vmem>>, vector<1x32xf32>
    %cst_51 = arith.constant dense<0.000000e+00> : vector<8xf32>
    %134 = vector.multi_reduction <add>, %131, %cst_51 [1] : vector<8x32xf32> to vector<8xf32>
    %135 = vector.shape_cast %134 : vector<8xf32> to vector<8x1xf32>
    %cst_52 = arith.constant 3.200000e+01 : f32
    %136 = vector.broadcast %cst_52 : f32 to vector<8x1xf32>
    %137 = arith.divf %135, %136 : vector<8x1xf32>
    %138 = vector.broadcast %137 : vector<8x1xf32> to vector<8x32xf32>
    %139 = arith.subf %131, %138 : vector<8x32xf32>
    %140 = arith.mulf %139, %139 : vector<8x32xf32>
    %cst_53 = arith.constant dense<0.000000e+00> : vector<8xf32>
    %141 = vector.multi_reduction <add>, %140, %cst_53 [1] : vector<8x32xf32> to vector<8xf32>
    %142 = vector.shape_cast %141 : vector<8xf32> to vector<8x1xf32>
    %cst_54 = arith.constant 3.200000e+01 : f32
    %143 = vector.broadcast %cst_54 : f32 to vector<8x1xf32>
    %144 = arith.divf %142, %143 : vector<8x1xf32>
    %145 = vector.broadcast %137 : vector<8x1xf32> to vector<8x32xf32>
    %146 = arith.subf %131, %145 : vector<8x32xf32>
    %cst_55 = arith.constant 9.99999974E-6 : f32
    %147 = vector.broadcast %cst_55 : f32 to vector<8x1xf32>
    %148 = arith.addf %144, %147 : vector<8x1xf32>
    %149 = math.rsqrt %148 : vector<8x1xf32>
    %150 = vector.broadcast %149 : vector<8x1xf32> to vector<8x32xf32>
    %151 = arith.mulf %146, %150 : vector<8x32xf32>
    %152 = vector.broadcast %132 : vector<1x32xf32> to vector<8x32xf32>
    %153 = arith.mulf %151, %152 : vector<8x32xf32>
    %154 = vector.broadcast %133 : vector<1x32xf32> to vector<8x32xf32>
    %155 = arith.addf %153, %154 : vector<8x32xf32>
    %156 = arith.index_cast %arg0 : i32 to index
    %157 = memref.load %arg1[%156] : memref<2xi32, #tpu.memory_space<smem>>
    %158 = tpu.iota {dimensions = array<i32: 1>} : vector<8x8xi32>
    %159 = vector.broadcast %157 : i32 to vector<8x8xi32>
    %160 = arith.cmpi slt, %158, %159 : vector<8x8xi32>
    %c0_56 = arith.constant 0 : index
    %c0_57 = arith.constant 0 : index
    %161 = vector.load %arg11[%c0_56, %c0_57] : memref<32x32xf32, #tpu.memory_space<vmem>>, vector<32x32xf32>
    %cst_58 = arith.constant dense<0.000000e+00> : vector<8x32xf32>
    %162 = tpu.matmul %155, %161, %cst_58 {dimension_numbers = #tpu.dot_dimension_numbers<[1], [0], [0], [1], [0, 0, 1, 1], [], []>} : vector<8x32xf32>, vector<32x32xf32>, vector<8x32xf32> -> vector<8x32xf32>
    %c0_59 = arith.constant 0 : index
    %c0_60 = arith.constant 0 : index
    %163 = vector.load %arg12[%c0_59, %c0_60] : memref<32x32xf32, #tpu.memory_space<vmem>>, vector<32x32xf32>
    %cst_61 = arith.constant dense<0.000000e+00> : vector<8x32xf32>
    %164 = tpu.matmul %5, %163, %cst_61 {dimension_numbers = #tpu.dot_dimension_numbers<[1], [0], [0], [1], [0, 0, 1, 1], [], []>} : vector<8x32xf32>, vector<32x32xf32>, vector<8x32xf32> -> vector<8x32xf32>
    %c0_62 = arith.constant 0 : index
    %c0_63 = arith.constant 0 : index
    %165 = vector.load %arg13[%c0_62, %c0_63] : memref<32x32xf32, #tpu.memory_space<vmem>>, vector<32x32xf32>
    %cst_64 = arith.constant dense<0.000000e+00> : vector<8x32xf32>
    %166 = tpu.matmul %5, %165, %cst_64 {dimension_numbers = #tpu.dot_dimension_numbers<[1], [0], [0], [1], [0, 0, 1, 1], [], []>} : vector<8x32xf32>, vector<32x32xf32>, vector<8x32xf32> -> vector<8x32xf32>
    %cst_65 = arith.constant 0.000000e+00 : f32
    %167 = vector.broadcast %cst_65 : f32 to vector<8x32xf32>
    %c0_i32_66 = arith.constant 0 : i32
    %168 = vector.broadcast %c0_i32_66 : i32 to vector<1x32xi32>
    %169 = arith.cmpi sge, %6, %168 : vector<1x32xi32>
    %c8_i32_67 = arith.constant 8 : i32
    %170 = vector.broadcast %c8_i32_67 : i32 to vector<1x32xi32>
    %171 = arith.cmpi slt, %6, %170 : vector<1x32xi32>
    %172 = arith.andi %169, %171 : vector<1x32xi1>
    %173 = arith.extui %172 : vector<1x32xi1> to vector<1x32xi32>
    %174 = arith.sitofp %173 : vector<1x32xi32> to vector<1x32xf32>
    %175 = vector.broadcast %174 : vector<1x32xf32> to vector<8x32xf32>
    %176 = arith.mulf %162, %175 : vector<8x32xf32>
    %cst_68 = arith.constant dense<0.000000e+00> : vector<8x8xf32>
    %177 = tpu.matmul %176, %164, %cst_68 {dimension_numbers = #tpu.dot_dimension_numbers<[1], [1], [0], [0], [0, 0, 1, 0], [], []>} : vector<8x32xf32>, vector<8x32xf32>, vector<8x8xf32> -> vector<8x8xf32>
    %cst_69 = arith.constant 0.353553385 : f32
    %178 = vector.broadcast %cst_69 : f32 to vector<8x8xf32>
    %179 = arith.mulf %177, %178 : vector<8x8xf32>
    %cst_70 = arith.constant -1.000000e+06 : f32
    %180 = vector.broadcast %cst_70 : f32 to vector<8x8xf32>
    %181 = arith.select %160, %179, %180 : vector<8x8xi1>, vector<8x8xf32>
    %cst_71 = arith.constant dense<0xFF800000> : vector<8xf32>
    %182 = vector.multi_reduction <maximumf>, %181, %cst_71 [1] : vector<8x8xf32> to vector<8xf32>
    %183 = vector.shape_cast %182 : vector<8xf32> to vector<8x1xf32>
    %184 = vector.broadcast %183 : vector<8x1xf32> to vector<8x8xf32>
    %185 = arith.subf %181, %184 : vector<8x8xf32>
    %186 = math.exp %185 : vector<8x8xf32>
    %cst_72 = arith.constant dense<0.000000e+00> : vector<8xf32>
    %187 = vector.multi_reduction <add>, %186, %cst_72 [1] : vector<8x8xf32> to vector<8xf32>
    %188 = vector.shape_cast %187 : vector<8xf32> to vector<8x1xf32>
    %189 = tpu.reciprocal %188 {approx = true} : vector<8x1xf32> -> vector<8x1xf32>
    %190 = vector.broadcast %189 : vector<8x1xf32> to vector<8x8xf32>
    %191 = arith.mulf %186, %190 : vector<8x8xf32>
    %192 = vector.broadcast %174 : vector<1x32xf32> to vector<8x32xf32>
    %193 = arith.mulf %166, %192 : vector<8x32xf32>
    %cst_73 = arith.constant dense<0.000000e+00> : vector<8x32xf32>
    %194 = tpu.matmul %191, %193, %cst_73 {dimension_numbers = #tpu.dot_dimension_numbers<[1], [0], [0], [1], [0, 0, 1, 1], [], []>} : vector<8x8xf32>, vector<8x32xf32>, vector<8x32xf32> -> vector<8x32xf32>
    %195 = arith.addf %167, %194 : vector<8x32xf32>
    %c8_i32_74 = arith.constant 8 : i32
    %196 = vector.broadcast %c8_i32_74 : i32 to vector<1x32xi32>
    %197 = arith.cmpi sge, %6, %196 : vector<1x32xi32>
    %c16_i32_75 = arith.constant 16 : i32
    %198 = vector.broadcast %c16_i32_75 : i32 to vector<1x32xi32>
    %199 = arith.cmpi slt, %6, %198 : vector<1x32xi32>
    %200 = arith.andi %197, %199 : vector<1x32xi1>
    %201 = arith.extui %200 : vector<1x32xi1> to vector<1x32xi32>
    %202 = arith.sitofp %201 : vector<1x32xi32> to vector<1x32xf32>
    %203 = vector.broadcast %202 : vector<1x32xf32> to vector<8x32xf32>
    %204 = arith.mulf %162, %203 : vector<8x32xf32>
    %cst_76 = arith.constant dense<0.000000e+00> : vector<8x8xf32>
    %205 = tpu.matmul %204, %164, %cst_76 {dimension_numbers = #tpu.dot_dimension_numbers<[1], [1], [0], [0], [0, 0, 1, 0], [], []>} : vector<8x32xf32>, vector<8x32xf32>, vector<8x8xf32> -> vector<8x8xf32>
    %cst_77 = arith.constant 0.353553385 : f32
    %206 = vector.broadcast %cst_77 : f32 to vector<8x8xf32>
    %207 = arith.mulf %205, %206 : vector<8x8xf32>
    %cst_78 = arith.constant -1.000000e+06 : f32
    %208 = vector.broadcast %cst_78 : f32 to vector<8x8xf32>
    %209 = arith.select %160, %207, %208 : vector<8x8xi1>, vector<8x8xf32>
    %cst_79 = arith.constant dense<0xFF800000> : vector<8xf32>
    %210 = vector.multi_reduction <maximumf>, %209, %cst_79 [1] : vector<8x8xf32> to vector<8xf32>
    %211 = vector.shape_cast %210 : vector<8xf32> to vector<8x1xf32>
    %212 = vector.broadcast %211 : vector<8x1xf32> to vector<8x8xf32>
    %213 = arith.subf %209, %212 : vector<8x8xf32>
    %214 = math.exp %213 : vector<8x8xf32>
    %cst_80 = arith.constant dense<0.000000e+00> : vector<8xf32>
    %215 = vector.multi_reduction <add>, %214, %cst_80 [1] : vector<8x8xf32> to vector<8xf32>
    %216 = vector.shape_cast %215 : vector<8xf32> to vector<8x1xf32>
    %217 = tpu.reciprocal %216 {approx = true} : vector<8x1xf32> -> vector<8x1xf32>
    %218 = vector.broadcast %217 : vector<8x1xf32> to vector<8x8xf32>
    %219 = arith.mulf %214, %218 : vector<8x8xf32>
    %220 = vector.broadcast %202 : vector<1x32xf32> to vector<8x32xf32>
    %221 = arith.mulf %166, %220 : vector<8x32xf32>
    %cst_81 = arith.constant dense<0.000000e+00> : vector<8x32xf32>
    %222 = tpu.matmul %219, %221, %cst_81 {dimension_numbers = #tpu.dot_dimension_numbers<[1], [0], [0], [1], [0, 0, 1, 1], [], []>} : vector<8x8xf32>, vector<8x32xf32>, vector<8x32xf32> -> vector<8x32xf32>
    %223 = arith.addf %195, %222 : vector<8x32xf32>
    %c16_i32_82 = arith.constant 16 : i32
    %224 = vector.broadcast %c16_i32_82 : i32 to vector<1x32xi32>
    %225 = arith.cmpi sge, %6, %224 : vector<1x32xi32>
    %c24_i32_83 = arith.constant 24 : i32
    %226 = vector.broadcast %c24_i32_83 : i32 to vector<1x32xi32>
    %227 = arith.cmpi slt, %6, %226 : vector<1x32xi32>
    %228 = arith.andi %225, %227 : vector<1x32xi1>
    %229 = arith.extui %228 : vector<1x32xi1> to vector<1x32xi32>
    %230 = arith.sitofp %229 : vector<1x32xi32> to vector<1x32xf32>
    %231 = vector.broadcast %230 : vector<1x32xf32> to vector<8x32xf32>
    %232 = arith.mulf %162, %231 : vector<8x32xf32>
    %cst_84 = arith.constant dense<0.000000e+00> : vector<8x8xf32>
    %233 = tpu.matmul %232, %164, %cst_84 {dimension_numbers = #tpu.dot_dimension_numbers<[1], [1], [0], [0], [0, 0, 1, 0], [], []>} : vector<8x32xf32>, vector<8x32xf32>, vector<8x8xf32> -> vector<8x8xf32>
    %cst_85 = arith.constant 0.353553385 : f32
    %234 = vector.broadcast %cst_85 : f32 to vector<8x8xf32>
    %235 = arith.mulf %233, %234 : vector<8x8xf32>
    %cst_86 = arith.constant -1.000000e+06 : f32
    %236 = vector.broadcast %cst_86 : f32 to vector<8x8xf32>
    %237 = arith.select %160, %235, %236 : vector<8x8xi1>, vector<8x8xf32>
    %cst_87 = arith.constant dense<0xFF800000> : vector<8xf32>
    %238 = vector.multi_reduction <maximumf>, %237, %cst_87 [1] : vector<8x8xf32> to vector<8xf32>
    %239 = vector.shape_cast %238 : vector<8xf32> to vector<8x1xf32>
    %240 = vector.broadcast %239 : vector<8x1xf32> to vector<8x8xf32>
    %241 = arith.subf %237, %240 : vector<8x8xf32>
    %242 = math.exp %241 : vector<8x8xf32>
    %cst_88 = arith.constant dense<0.000000e+00> : vector<8xf32>
    %243 = vector.multi_reduction <add>, %242, %cst_88 [1] : vector<8x8xf32> to vector<8xf32>
    %244 = vector.shape_cast %243 : vector<8xf32> to vector<8x1xf32>
    %245 = tpu.reciprocal %244 {approx = true} : vector<8x1xf32> -> vector<8x1xf32>
    %246 = vector.broadcast %245 : vector<8x1xf32> to vector<8x8xf32>
    %247 = arith.mulf %242, %246 : vector<8x8xf32>
    %248 = vector.broadcast %230 : vector<1x32xf32> to vector<8x32xf32>
    %249 = arith.mulf %166, %248 : vector<8x32xf32>
    %cst_89 = arith.constant dense<0.000000e+00> : vector<8x32xf32>
    %250 = tpu.matmul %247, %249, %cst_89 {dimension_numbers = #tpu.dot_dimension_numbers<[1], [0], [0], [1], [0, 0, 1, 1], [], []>} : vector<8x8xf32>, vector<8x32xf32>, vector<8x32xf32> -> vector<8x32xf32>
    %251 = arith.addf %223, %250 : vector<8x32xf32>
    %c24_i32_90 = arith.constant 24 : i32
    %252 = vector.broadcast %c24_i32_90 : i32 to vector<1x32xi32>
    %253 = arith.cmpi sge, %6, %252 : vector<1x32xi32>
    %c32_i32_91 = arith.constant 32 : i32
    %254 = vector.broadcast %c32_i32_91 : i32 to vector<1x32xi32>
    %255 = arith.cmpi slt, %6, %254 : vector<1x32xi32>
    %256 = arith.andi %253, %255 : vector<1x32xi1>
    %257 = arith.extui %256 : vector<1x32xi1> to vector<1x32xi32>
    %258 = arith.sitofp %257 : vector<1x32xi32> to vector<1x32xf32>
    %259 = vector.broadcast %258 : vector<1x32xf32> to vector<8x32xf32>
    %260 = arith.mulf %162, %259 : vector<8x32xf32>
    %cst_92 = arith.constant dense<0.000000e+00> : vector<8x8xf32>
    %261 = tpu.matmul %260, %164, %cst_92 {dimension_numbers = #tpu.dot_dimension_numbers<[1], [1], [0], [0], [0, 0, 1, 0], [], []>} : vector<8x32xf32>, vector<8x32xf32>, vector<8x8xf32> -> vector<8x8xf32>
    %cst_93 = arith.constant 0.353553385 : f32
    %262 = vector.broadcast %cst_93 : f32 to vector<8x8xf32>
    %263 = arith.mulf %261, %262 : vector<8x8xf32>
    %cst_94 = arith.constant -1.000000e+06 : f32
    %264 = vector.broadcast %cst_94 : f32 to vector<8x8xf32>
    %265 = arith.select %160, %263, %264 : vector<8x8xi1>, vector<8x8xf32>
    %cst_95 = arith.constant dense<0xFF800000> : vector<8xf32>
    %266 = vector.multi_reduction <maximumf>, %265, %cst_95 [1] : vector<8x8xf32> to vector<8xf32>
    %267 = vector.shape_cast %266 : vector<8xf32> to vector<8x1xf32>
    %268 = vector.broadcast %267 : vector<8x1xf32> to vector<8x8xf32>
    %269 = arith.subf %265, %268 : vector<8x8xf32>
    %270 = math.exp %269 : vector<8x8xf32>
    %cst_96 = arith.constant dense<0.000000e+00> : vector<8xf32>
    %271 = vector.multi_reduction <add>, %270, %cst_96 [1] : vector<8x8xf32> to vector<8xf32>
    %272 = vector.shape_cast %271 : vector<8xf32> to vector<8x1xf32>
    %273 = tpu.reciprocal %272 {approx = true} : vector<8x1xf32> -> vector<8x1xf32>
    %274 = vector.broadcast %273 : vector<8x1xf32> to vector<8x8xf32>
    %275 = arith.mulf %270, %274 : vector<8x8xf32>
    %276 = vector.broadcast %258 : vector<1x32xf32> to vector<8x32xf32>
    %277 = arith.mulf %166, %276 : vector<8x32xf32>
    %cst_97 = arith.constant dense<0.000000e+00> : vector<8x32xf32>
    %278 = tpu.matmul %275, %277, %cst_97 {dimension_numbers = #tpu.dot_dimension_numbers<[1], [0], [0], [1], [0, 0, 1, 1], [], []>} : vector<8x8xf32>, vector<8x32xf32>, vector<8x32xf32> -> vector<8x32xf32>
    %279 = arith.addf %251, %278 : vector<8x32xf32>
    %c0_98 = arith.constant 0 : index
    %c0_99 = arith.constant 0 : index
    %280 = vector.load %arg14[%c0_98, %c0_99] : memref<32x32xf32, #tpu.memory_space<vmem>>, vector<32x32xf32>
    %cst_100 = arith.constant dense<0.000000e+00> : vector<8x32xf32>
    %281 = tpu.matmul %279, %280, %cst_100 {dimension_numbers = #tpu.dot_dimension_numbers<[1], [0], [0], [1], [0, 0, 1, 1], [], []>} : vector<8x32xf32>, vector<32x32xf32>, vector<8x32xf32> -> vector<8x32xf32>
    %282 = arith.addf %155, %281 : vector<8x32xf32>
    %c0_101 = arith.constant 0 : index
    %c0_102 = arith.constant 0 : index
    %283 = vector.load %arg15[%c0_101, %c0_102] : memref<1x32xf32, #tpu.memory_space<vmem>>, vector<1x32xf32>
    %c0_103 = arith.constant 0 : index
    %c0_104 = arith.constant 0 : index
    %284 = vector.load %arg16[%c0_103, %c0_104] : memref<1x32xf32, #tpu.memory_space<vmem>>, vector<1x32xf32>
    %cst_105 = arith.constant dense<0.000000e+00> : vector<8xf32>
    %285 = vector.multi_reduction <add>, %282, %cst_105 [1] : vector<8x32xf32> to vector<8xf32>
    %286 = vector.shape_cast %285 : vector<8xf32> to vector<8x1xf32>
    %cst_106 = arith.constant 3.200000e+01 : f32
    %287 = vector.broadcast %cst_106 : f32 to vector<8x1xf32>
    %288 = arith.divf %286, %287 : vector<8x1xf32>
    %289 = vector.broadcast %288 : vector<8x1xf32> to vector<8x32xf32>
    %290 = arith.subf %282, %289 : vector<8x32xf32>
    %291 = arith.mulf %290, %290 : vector<8x32xf32>
    %cst_107 = arith.constant dense<0.000000e+00> : vector<8xf32>
    %292 = vector.multi_reduction <add>, %291, %cst_107 [1] : vector<8x32xf32> to vector<8xf32>
    %293 = vector.shape_cast %292 : vector<8xf32> to vector<8x1xf32>
    %cst_108 = arith.constant 3.200000e+01 : f32
    %294 = vector.broadcast %cst_108 : f32 to vector<8x1xf32>
    %295 = arith.divf %293, %294 : vector<8x1xf32>
    %296 = vector.broadcast %288 : vector<8x1xf32> to vector<8x32xf32>
    %297 = arith.subf %282, %296 : vector<8x32xf32>
    %cst_109 = arith.constant 9.99999974E-6 : f32
    %298 = vector.broadcast %cst_109 : f32 to vector<8x1xf32>
    %299 = arith.addf %295, %298 : vector<8x1xf32>
    %300 = math.rsqrt %299 : vector<8x1xf32>
    %301 = vector.broadcast %300 : vector<8x1xf32> to vector<8x32xf32>
    %302 = arith.mulf %297, %301 : vector<8x32xf32>
    %303 = vector.broadcast %283 : vector<1x32xf32> to vector<8x32xf32>
    %304 = arith.mulf %302, %303 : vector<8x32xf32>
    %305 = vector.broadcast %284 : vector<1x32xf32> to vector<8x32xf32>
    %306 = arith.addf %304, %305 : vector<8x32xf32>
    %c0_110 = arith.constant 0 : index
    %c0_111 = arith.constant 0 : index
    %307 = vector.load %arg17[%c0_110, %c0_111] : memref<32x64xf32, #tpu.memory_space<vmem>>, vector<32x64xf32>
    %cst_112 = arith.constant dense<0.000000e+00> : vector<8x64xf32>
    %308 = tpu.matmul %306, %307, %cst_112 {dimension_numbers = #tpu.dot_dimension_numbers<[1], [0], [0], [1], [0, 0, 1, 1], [], []>} : vector<8x32xf32>, vector<32x64xf32>, vector<8x64xf32> -> vector<8x64xf32>
    %c0_113 = arith.constant 0 : index
    %c0_114 = arith.constant 0 : index
    %309 = vector.load %arg18[%c0_113, %c0_114] : memref<1x64xf32, #tpu.memory_space<vmem>>, vector<1x64xf32>
    %310 = vector.broadcast %309 : vector<1x64xf32> to vector<8x64xf32>
    %311 = arith.addf %308, %310 : vector<8x64xf32>
    %cst_115 = arith.constant 0.000000e+00 : f32
    %312 = vector.broadcast %cst_115 : f32 to vector<8x64xf32>
    %313 = arith.maximumf %311, %312 : vector<8x64xf32>
    %c0_116 = arith.constant 0 : index
    %c0_117 = arith.constant 0 : index
    %314 = vector.load %arg19[%c0_116, %c0_117] : memref<64x32xf32, #tpu.memory_space<vmem>>, vector<64x32xf32>
    %cst_118 = arith.constant dense<0.000000e+00> : vector<8x32xf32>
    %315 = tpu.matmul %313, %314, %cst_118 {dimension_numbers = #tpu.dot_dimension_numbers<[1], [0], [0], [1], [0, 0, 1, 1], [], []>} : vector<8x64xf32>, vector<64x32xf32>, vector<8x32xf32> -> vector<8x32xf32>
    %c0_119 = arith.constant 0 : index
    %c0_120 = arith.constant 0 : index
    %316 = vector.load %arg20[%c0_119, %c0_120] : memref<1x32xf32, #tpu.memory_space<vmem>>, vector<1x32xf32>
    %317 = vector.broadcast %316 : vector<1x32xf32> to vector<8x32xf32>
    %318 = arith.addf %315, %317 : vector<8x32xf32>
    %319 = arith.addf %306, %318 : vector<8x32xf32>
    %c0_121 = arith.constant 0 : index
    %c0_122 = arith.constant 0 : index
    %320 = vector.load %arg21[%c0_121, %c0_122] : memref<1x32xf32, #tpu.memory_space<vmem>>, vector<1x32xf32>
    %c0_123 = arith.constant 0 : index
    %c0_124 = arith.constant 0 : index
    %321 = vector.load %arg22[%c0_123, %c0_124] : memref<1x32xf32, #tpu.memory_space<vmem>>, vector<1x32xf32>
    %cst_125 = arith.constant dense<0.000000e+00> : vector<8xf32>
    %322 = vector.multi_reduction <add>, %319, %cst_125 [1] : vector<8x32xf32> to vector<8xf32>
    %323 = vector.shape_cast %322 : vector<8xf32> to vector<8x1xf32>
    %cst_126 = arith.constant 3.200000e+01 : f32
    %324 = vector.broadcast %cst_126 : f32 to vector<8x1xf32>
    %325 = arith.divf %323, %324 : vector<8x1xf32>
    %326 = vector.broadcast %325 : vector<8x1xf32> to vector<8x32xf32>
    %327 = arith.subf %319, %326 : vector<8x32xf32>
    %328 = arith.mulf %327, %327 : vector<8x32xf32>
    %cst_127 = arith.constant dense<0.000000e+00> : vector<8xf32>
    %329 = vector.multi_reduction <add>, %328, %cst_127 [1] : vector<8x32xf32> to vector<8xf32>
    %330 = vector.shape_cast %329 : vector<8xf32> to vector<8x1xf32>
    %cst_128 = arith.constant 3.200000e+01 : f32
    %331 = vector.broadcast %cst_128 : f32 to vector<8x1xf32>
    %332 = arith.divf %330, %331 : vector<8x1xf32>
    %333 = vector.broadcast %325 : vector<8x1xf32> to vector<8x32xf32>
    %334 = arith.subf %319, %333 : vector<8x32xf32>
    %cst_129 = arith.constant 9.99999974E-6 : f32
    %335 = vector.broadcast %cst_129 : f32 to vector<8x1xf32>
    %336 = arith.addf %332, %335 : vector<8x1xf32>
    %337 = math.rsqrt %336 : vector<8x1xf32>
    %338 = vector.broadcast %337 : vector<8x1xf32> to vector<8x32xf32>
    %339 = arith.mulf %334, %338 : vector<8x32xf32>
    %340 = vector.broadcast %320 : vector<1x32xf32> to vector<8x32xf32>
    %341 = arith.mulf %339, %340 : vector<8x32xf32>
    %342 = vector.broadcast %321 : vector<1x32xf32> to vector<8x32xf32>
    %343 = arith.addf %341, %342 : vector<8x32xf32>
    %c0_130 = arith.constant 0 : index
    %c0_131 = arith.constant 0 : index
    %c0_132 = arith.constant 0 : index
    %344 = vector.load %arg23[%c0_130, %c0_131, %c0_132] : memref<1x8x32xf32, #tpu.memory_space<vmem>>, vector<1x8x32xf32>
    %345 = vector.shape_cast %344 : vector<1x8x32xf32> to vector<8x32xf32>
    %346 = vector.shape_cast %343 : vector<8x32xf32> to vector<1x8x32xf32>
    tpu.vector_store %arg23[%c0_130, %c0_131, %c0_132], %346 {strides = array<i32>} : memref<1x8x32xf32, #tpu.memory_space<vmem>>, vector<1x8x32xf32>,
    return
  }
  func.func @transform_0(%arg0: i32, %arg1: memref<2xi32, #tpu.memory_space<smem>>) -> (i32, i32, i32) {
    %c0_i32 = arith.constant 0 : i32
    %c0_i32_0 = arith.constant 0 : i32
    %c0_i32_1 = arith.constant 0 : i32
    return %arg0, %c0_i32, %c0_i32_0 : i32, i32, i32
  }
  func.func @transform_1(%arg0: i32, %arg1: memref<2xi32, #tpu.memory_space<smem>>) -> (i32, i32, i32) {
    %c0_i32 = arith.constant 0 : i32
    %c0_i32_0 = arith.constant 0 : i32
    %c0_i32_1 = arith.constant 0 : i32
    return %arg0, %c0_i32, %c0_i32_0 : i32, i32, i32
  }
  func.func @transform_2(%arg0: i32, %arg1: memref<2xi32, #tpu.memory_space<smem>>) -> (i32, i32, i32) {
    %c0_i32 = arith.constant 0 : i32
    %c0_i32_0 = arith.constant 0 : i32
    %c0_i32_1 = arith.constant 0 : i32
    return %arg0, %c0_i32, %c0_i32_0 : i32, i32, i32
  }
  func.func @transform_3(%arg0: i32, %arg1: memref<2xi32, #tpu.memory_space<smem>>) -> (i32, i32) {
    %c0_i32 = arith.constant 0 : i32
    %c0_i32_0 = arith.constant 0 : i32
    %c0_i32_1 = arith.constant 0 : i32
    return %c0_i32, %c0_i32_0 : i32, i32
  }
  func.func @transform_4(%arg0: i32, %arg1: memref<2xi32, #tpu.memory_space<smem>>) -> (i32, i32) {
    %c0_i32 = arith.constant 0 : i32
    %c0_i32_0 = arith.constant 0 : i32
    %c0_i32_1 = arith.constant 0 : i32
    return %c0_i32, %c0_i32_0 : i32, i32
  }
  func.func @transform_5(%arg0: i32, %arg1: memref<2xi32, #tpu.memory_space<smem>>) -> (i32, i32) {
    %c0_i32 = arith.constant 0 : i32
    %c0_i32_0 = arith.constant 0 : i32
    %c0_i32_1 = arith.constant 0 : i32
    return %c0_i32, %c0_i32_0 : i32, i32
  }
  func.func @transform_6(%arg0: i32, %arg1: memref<2xi32, #tpu.memory_space<smem>>) -> (i32, i32) {
    %c0_i32 = arith.constant 0 : i32
    %c0_i32_0 = arith.constant 0 : i32
    %c0_i32_1 = arith.constant 0 : i32
    return %c0_i32, %c0_i32_0 : i32, i32
  }
  func.func @transform_7(%arg0: i32, %arg1: memref<2xi32, #tpu.memory_space<smem>>) -> (i32, i32) {
    %c0_i32 = arith.constant 0 : i32
    %c0_i32_0 = arith.constant 0 : i32
    %c0_i32_1 = arith.constant 0 : i32
    return %c0_i32, %c0_i32_0 : i32, i32
  }
  func.func @transform_8(%arg0: i32, %arg1: memref<2xi32, #tpu.memory_space<smem>>) -> (i32, i32) {
    %c0_i32 = arith.constant 0 : i32
    %c0_i32_0 = arith.constant 0 : i32
    %c0_i32_1 = arith.constant 0 : i32
    return %c0_i32, %c0_i32_0 : i32, i32
  }
  func.func @transform_9(%arg0: i32, %arg1: memref<2xi32, #tpu.memory_space<smem>>) -> (i32, i32) {
    %c0_i32 = arith.constant 0 : i32
    %c0_i32_0 = arith.constant 0 : i32
    %c0_i32_1 = arith.constant 0 : i32
    return %c0_i32, %c0_i32_0 : i32, i32
  }
  func.func @transform_10(%arg0: i32, %arg1: memref<2xi32, #tpu.memory_space<smem>>) -> (i32, i32) {
    %c0_i32 = arith.constant 0 : i32
    %c0_i32_0 = arith.constant 0 : i32
    %c0_i32_1 = arith.constant 0 : i32
    return %c0_i32, %c0_i32_0 : i32, i32
  }
  func.func @transform_11(%arg0: i32, %arg1: memref<2xi32, #tpu.memory_space<smem>>) -> (i32, i32) {
    %c0_i32 = arith.constant 0 : i32
    %c0_i32_0 = arith.constant 0 : i32
    %c0_i32_1 = arith.constant 0 : i32
    return %c0_i32, %c0_i32_0 : i32, i32
  }
  func.func @transform_12(%arg0: i32, %arg1: memref<2xi32, #tpu.memory_space<smem>>) -> (i32, i32) {
    %c0_i32 = arith.constant 0 : i32
    %c0_i32_0 = arith.constant 0 : i32
    %c0_i32_1 = arith.constant 0 : i32
    return %c0_i32, %c0_i32_0 : i32, i32
  }
  func.func @transform_13(%arg0: i32, %arg1: memref<2xi32, #tpu.memory_space<smem>>) -> (i32, i32) {
    %c0_i32 = arith.constant 0 : i32
    %c0_i32_0 = arith.constant 0 : i32
    %c0_i32_1 = arith.constant 0 : i32
    return %c0_i32, %c0_i32_0 : i32, i32
  }
  func.func @transform_14(%arg0: i32, %arg1: memref<2xi32, #tpu.memory_space<smem>>) -> (i32, i32) {
    %c0_i32 = arith.constant 0 : i32
    %c0_i32_0 = arith.constant 0 : i32
    %c0_i32_1 = arith.constant 0 : i32
    return %c0_i32, %c0_i32_0 : i32, i32
  }
  func.func @transform_15(%arg0: i32, %arg1: memref<2xi32, #tpu.memory_space<smem>>) -> (i32, i32) {
    %c0_i32 = arith.constant 0 : i32
    %c0_i32_0 = arith.constant 0 : i32
    %c0_i32_1 = arith.constant 0 : i32
    return %c0_i32, %c0_i32_0 : i32, i32
  }
  func.func @transform_16(%arg0: i32, %arg1: memref<2xi32, #tpu.memory_space<smem>>) -> (i32, i32) {
    %c0_i32 = arith.constant 0 : i32
    %c0_i32_0 = arith.constant 0 : i32
    %c0_i32_1 = arith.constant 0 : i32
    return %c0_i32, %c0_i32_0 : i32, i32
  }
  func.func @transform_17(%arg0: i32, %arg1: memref<2xi32, #tpu.memory_space<smem>>) -> (i32, i32) {
    %c0_i32 = arith.constant 0 : i32
    %c0_i32_0 = arith.constant 0 : i32
    %c0_i32_1 = arith.constant 0 : i32
    return %c0_i32, %c0_i32_0 : i32, i32
  }
  func.func @transform_18(%arg0: i32, %arg1: memref<2xi32, #tpu.memory_space<smem>>) -> (i32, i32) {
    %c0_i32 = arith.constant 0 : i32
    %c0_i32_0 = arith.constant 0 : i32
    %c0_i32_1 = arith.constant 0 : i32
    return %c0_i32, %c0_i32_0 : i32, i32
  }
  func.func @transform_19(%arg0: i32, %arg1: memref<2xi32, #tpu.memory_space<smem>>) -> (i32, i32) {
    %c0_i32 = arith.constant 0 : i32
    %c0_i32_0 = arith.constant 0 : i32
    %c0_i32_1 = arith.constant 0 : i32
    return %c0_i32, %c0_i32_0 : i32, i32
  }
  func.func @transform_20(%arg0: i32, %arg1: memref<2xi32, #tpu.memory_space<smem>>) -> (i32, i32) {
    %c0_i32 = arith.constant 0 : i32
    %c0_i32_0 = arith.constant 0 : i32
    %c0_i32_1 = arith.constant 0 : i32
    return %c0_i32, %c0_i32_0 : i32, i32
  }
  func.func @transform_21(%arg0: i32, %arg1: memref<2xi32, #tpu.memory_space<smem>>) -> (i32, i32, i32) {
    %c0_i32 = arith.constant 0 : i32
    %c0_i32_0 = arith.constant 0 : i32
    %c0_i32_1 = arith.constant 0 : i32
    return %arg0, %c0_i32, %c0_i32_0 : i32, i32, i32
  }
}

</mosaic_0001>

<bundles_post_ra>
// kernel: bert_decoder_forward.3
= control target key start
LH: loop header
LB: loop body
LE: loop exit
PB: predicated region body
PF: predicated region fallthrough
CT: control target
= control target key end

     0   :  { %s4186_s0 = inlined_call_operand.vmem [shape: s32[2], index: 0, kind: input, shape index: {}]   ;;  %s4187_s1 = inlined_call_operand.vmem [shape: f32[2,8,32], index: 1, kind: input, shape index: {}]   ;;  %s4188_s2 = inlined_call_operand.vmem [shape: f32[2,8,32], index: 2, kind: input, shape index: {}]   ;;  %s4189_s3 = inlined_call_operand.vmem [shape: f32[2,8,32], index: 3, kind: input, shape index: {}]   ;;  %s4190_s4 = inlined_call_operand.vmem [shape: f32[32,32], index: 4, kind: input, shape index: {}]   ;;  %s4191_s5 = inlined_call_operand.vmem [shape: f32[32,32], index: 5, kind: input, shape index: {}]   ;;  %s4192_s6 = inlined_call_operand.vmem [shape: f32[32,32], index: 6, kind: input, shape index: {}]   ;;  %s4193_s7 = inlined_call_operand.vmem [shape: f32[32,32], index: 7, kind: input, shape index: {}]   ;;  %s4194_s8 = inlined_call_operand.vmem [shape: f32[1,32], index: 8, kind: input, shape index: {}]   ;;  %s4195_s9 = inlined_call_operand.vmem [shape: f32[1,32], index: 9, kind: input, shape index: {}]   ;;  %s4196_s10 = inlined_call_operand.vmem [shape: f32[32,32], index: 10, kind: input, shape index: {}]   ;;  %s4197_s11 = inlined_call_operand.vmem [shape: f32[32,32], index: 11, kind: input, shape index: {}]   ;;  %s4198_s12 = inlined_call_operand.vmem [shape: f32[32,32], index: 12, kind: input, shape index: {}]   ;;  %s4199_s13 = inlined_call_operand.vmem [shape: f32[32,32], index: 13, kind: input, shape index: {}]   ;;  %s4200_s14 = inlined_call_operand.vmem [shape: f32[1,32], index: 14, kind: input, shape index: {}]   ;;  %s4201_s15 = inlined_call_operand.vmem [shape: f32[1,32], index: 15, kind: input, shape index: {}]   ;;  %s4202_s16 = inlined_call_operand.vmem [shape: f32[32,64], index: 16, kind: input, shape index: {}]   ;;  %s4203_s17 = inlined_call_operand.vmem [shape: f32[1,64], index: 17, kind: input, shape index: {}]   ;;  %s4204_s18 = inlined_call_operand.vmem [shape: f32[64,32], index: 18, kind: input, shape index: {}]   ;;  %s4205_s19 = inlined_call_operand.vmem [shape: f32[1,32], index: 19, kind: input, shape index: {}]   ;;  %s4206_s20 = inlined_call_operand.vmem [shape: f32[1,32], index: 20, kind: input, shape index: {}]   ;;  %s4207_s21 = inlined_call_operand.vmem [shape: f32[1,32], index: 21, kind: input, shape index: {}]   ;;  %s4208_s22 = inlined_call_operand.hbm [shape: f32[2,8,32], index: 22, kind: output, shape index: {}]  }
   0x1   :  { %4221 = sst [smem:[#allocation14_spill]] %s4186_s0 }
   0x2   :  { %4222 = sst [smem:[#allocation15_spill]] %s4187_s1  ;;  %s4231_s29 = sld [smem:[#allocation14_spill]] }
   0x3   :  { %4223 = sst [smem:[#allocation16_spill]] %s4188_s2 }
   0x4   :  { %4224 = sst [smem:[#allocation17_spill]] %s4189_s3 }
   0x5   :  { %4225 = sst [smem:[#allocation18_spill]] %s4190_s4 }
   0x6   :  { %4226 = sst [smem:[#allocation19_spill]] %s4191_s5 }
   0x7   :  { %4227 = sst [smem:[#allocation20_spill]] %s4192_s6 }
   0x8   :  { %4228 = sst [smem:[#allocation21_spill]] %s4201_s15  ;;  %s27_s15 = sshll.u32 %s4231_s29, 4  ;;  %s28_s15 = int_to_ptr.vmem [resolvable:$true] %s27_s15 }
   0x9   :  { %4229 = sst [smem:[#allocation22_spill]] %s4207_s21  ;;  %s3498_s30 = scalar_lea.vmem %s28_s15, 16 }
   0xa   :  { %4230 = sst [smem:[#allocation23_spill]] %s4208_s22  ;;  %p3499_p0 = scmp.ne.s32.totalorder %s28_s15, %s3498_s30 }
   0xb   :  { %p3503_p1 = scmp.lt.s32.totalorder %s28_s15, %s28_s15  ;;  %p3504_p2 = scmp.lt.s32.totalorder %s3498_s30, %s3498_s30 }
   0xd   :  { %p3505_p3 = por %p3504_p2, %p3503_p1 }
   0xf   :  { %p3506_p4 = pnand %p3505_p3, %p3499_p0 }
  0x11   :  { %3509 = shalt.err (!%p3506_p4)  }
  0x12   :  { %s3576_s4 = smov [#allocation3]  }
  0x13   :  { %30 = dma.vmem_to_smem %s28_s15, 16, %s3576_s4, [#allocation2] }
  0x14   :  { %3554 = dma.done.wait [#allocation2], 16 }
  0x15   :  { %3555 = vsyncadd [#allocation2], 4294967280 }
  0x16   :  { %32 = sfence }
  0x17   :  { %33 = vsyncpa [#allocation5], 0 }
  0x18   :  { %35 = vsyncpa [#allocation5 + $0x1], 0  ;;  %s3699_s0 = smov 0   ;;  %s3701_s23 = smov 0  }
  0x19   :  { %s3703_s1 = smov 0   ;;  %s3705_s5 = smov 0  }
  0x1a LB: > { %4232 = sst [smem:[#allocation8_spill]] %s3562_s0  ;;  %s3720_s15 = sadd.s32 4294967295, %s3574_s5   ;;  %s3574_s5 = sphi %s3705_s5, %s4254_s5   ;;  %s3570_s1 = sphi %s3703_s1, %s4256_s1   ;;  %s3566_s23 = sphi %s3701_s23, %s4258_s23   ;;  %s3562_s0 = sphi %s3699_s0, %s4257_s0  }
  0x1b   : > { %4233 = sst [smem:[#allocation9_spill]] %s3570_s1  ;;  %s2997_s24 = sadd.s32 4294967294, %s3574_s5  }
  0x1c   : > { %4234 = sst [smem:[#allocation10_spill]] %s3574_s5  ;;  %s3724_s6 = sadd.s32 1, %s3574_s5  }
  0x1d   : > { %4235 = sst [smem:[#allocation11_spill]] %s3724_s6  ;;  %s504_s25 = sadd.s32 1, %s3570_s1 }
  0x1e   : > { %s501_s26 = ssub.s32 %s3574_s5, %s3724_s6  ;;  %p514_p5 = scmp.ne.s32.totalorder %s3570_s1, %s3566_s23 }
  0x1f   : > { %p502_p6 = scmp.eq.s32.totalorder %s501_s26, 0  ;;  %p515_p7 = scmp.eq.s32.totalorder %s3720_s15, 1 }
  0x20   : > { %p520_p8 = scmp.ne.s32.totalorder %s3566_s23, %s3562_s0  ;;  %p521_p9 = scmp.eq.s32.totalorder %s2997_s24, 1 }
  0x21   : > { %s3735_s2 = scalar_select %p502_p6, %s3570_s1, %s504_s25  }
  0x22   : > { %p3737_p10 = por %p515_p7, %p514_p5  ;;  %p3741_p11 = por %p521_p9, %p520_p8 }
  0x23   : > { %4236 = sst [smem:[#allocation12_spill]] %s3735_s2  ;;  %p3000_p12 = scmp.ge.s32.totalorder %s3574_s5, 1 }
  0x24   : > { %s4238_s3 = scalar_select %p3741_p11, 1, 0 }
  0x25   : > { %p614_p13 = scmp.lt.s32.totalorder %s3574_s5, 3 }
  0x26   : > { %4239 = sst [smem:[#allocation13_spill]] %s4238_s3 }
  0x27   : > { %p615_p0 = pnand %p3000_p12, %p614_p13 }
  0x28   : > { %s4240_s30 = sld [smem:[#allocation19_spill]] (!%p615_p0)  ;;  %s4241_s2 = sld [smem:[#allocation18_spill]] (!%p615_p0)  ;;  %v3577_v3 = vmov (!%p615_p0), 0.0|0.0   ;;  %vm3578_vm0 = vmmov (!%p615_p0), 0   ;;  %v3579_v11 = vmov (!%p615_p0), 0.0   ;;  %vm705_vm1 = vcmask (!%p615_p0), 261120  }
  0x29   : > { %618 = sbr.rel (%p615_p0) target bundleno = 3832 (0xef8), region = 104  ;;  %3345 = vmatprep.subr.bf16.mxu1 (!%p615_p0), %v3577_v3  ;;  %3339 = vmatprep.subr.bf16.mxu0 (!%p615_p0), %v3577_v3  ;;  %p681_p1 = scmp.lt.s32.totalorder (!%p615_p0), %s3720_s15, 1  ;;  %v696_v22 = vlaneseq (!%p615_p0)  ;;  %vm1014_vm13 = vcmask (!%p615_p0), 64512   ;;  %vm2795_vm15 = vcmask (!%p615_p0), 523264  }
  0x2a   : > { %3160 = vmatprep.mubr.msk.f32.mxu1 (!%p615_p0), %vm3578_vm0, %v3579_v11  ;;  %3149 = vmatprep.mubr.msk.f32.mxu0 (!%p615_p0), %vm3578_vm0, %v3579_v11  ;;  %s4242_s28 = sld [smem:[#allocation20_spill]] (!%p615_p0)  ;;  %s4243_s26 = sld [smem:[#allocation16_spill]] (!%p615_p0) }
  0x2b   : > { %s4244_s22 = sld [smem:[#allocation15_spill]] (!%p615_p0)  ;;  %v3819_v23 = vand.u32 (!%p615_p0), 127, %v696_v22  ;;  %v699_v39 = vshrl.u32 (!%p615_p0), %v696_v22, 7  ;;  %s4249_s4 = sld [smem:[#allocation22_spill]] (!%p615_p0) }
  0x2c   : > { %s3052_s24 = sshll.u32 (!%p615_p0), %s3720_s15, 7  ;;  %s4250_s3 = sld [smem:[#allocation23_spill]] (!%p615_p0) }
  0x2d   : > { %vm1027_vm2 = vcmp.ge.s32.totalorder (!%p615_p0), %v3819_v23, 8  ;;  %vm1028_vm3 = vcmp.lt.s32.totalorder (!%p615_p0), %v3819_v23, 16  ;;  %vm931_vm4 = vcmp.lt.s32.totalorder (!%p615_p0), %v3819_v23, 8  ;;  %vm1266_vm6 = vcmp.ge.s32.totalorder (!%p615_p0), %v3819_v23, 16 }
  0x2e   : > { %v779_v0 = vld [vmem:[%s4240_s30] sm:$0xff] (!%p615_p0)  ;;  %v780_v1 = vld [vmem:[%s4240_s30 + $0x8] sm:$0xff] (!%p615_p0)  ;;  %v781_v6 = vld [vmem:[%s4240_s30 + $0x10] sm:$0xff] (!%p615_p0)  ;;  %vm1267_vm7 = vcmp.lt.s32.totalorder (!%p615_p0), %v3819_v23, 24  ;;  %v3827_v24 = vsel (!%p615_p0), %vm931_vm4, 1.0, %v3579_v11  ;;  %vm1433_vm9 = vcmp.ge.s32.totalorder (!%p615_p0), %v3819_v23, 24  ;;  %vm700_vm12 = vcmp.le.s32.totalorder (!%p615_p0), %v3819_v23, %v699_v39 }
  0x2f   : > { %v701_v2 = vld [vmem:[%s4241_s2] sm:$0xff] (!%p615_p0)  ;;  %v3346_v4 = vpack.c.bf16 (!%p615_p0), %v780_v1, %v779_v0  ;;  %v702_v5 = vld [vmem:[%s4241_s2 + $0x8] sm:$0xff] (!%p615_p0)  ;;  %v782_v7 = vld [vmem:[%s4240_s30 + $0x18] sm:$0xff] (!%p615_p0)  ;;  %vm1434_vm10 = vcmp.lt.s32.totalorder (!%p615_p0), %v3819_v23, 32  ;;  %s4248_s30 = sld [smem:[#allocation21_spill]] (!%p615_p0) }
  0x30   : > { %v3340_v8 = vpack.c.bf16 %v702_v5, %v701_v2  ;;  %v703_v9 = vld [vmem:[%s4241_s2 + $0x10] sm:$0xff]  ;;  %v704_v10 = vld [vmem:[%s4241_s2 + $0x18] sm:$0xff]  ;;  %v3349_v12 = vpack.c.bf16 %v782_v7, %v781_v6  ;;  %s682_s1 = scalar_select %p681_p1, %s3720_s15, 1  ;;  %v856_v14 = vld [vmem:[%s4242_s28] sm:$0xff] }
  0x31   : > { %3347 = vmatpush3.bf16.msra.mxu1 %v3346_v4  ;;  %v3343_v13 = vpack.c.bf16 %v704_v10, %v703_v9  ;;  %v857_v15 = vld [vmem:[%s4242_s28 + $0x8] sm:$0xff]  ;;  %v858_v19 = vld [vmem:[%s4242_s28 + $0x10] sm:$0xff]  ;;  %v859_v20 = vld [vmem:[%s4242_s28 + $0x18] sm:$0xff] }
  0x32   : > { %3341 = vmatpush3.bf16.msra.mxu0 %v3340_v8  ;;  %3348 = vmatprep.subr.bf16.mxu1 %v3577_v3  ;;  %s3781_s6 = sshll.u32 %s682_s1, 3  ;;  %v3352_v18 = vpack.c.bf16 %v857_v15, %v856_v14  ;;  %v3355_v21 = vpack.c.bf16 %v859_v20, %v858_v19  ;;  %vm1029_vm5 = vmand %vm1027_vm2, %vm1028_vm3  ;;  %v1600_v19 = vld [vmem:[%s4193_s7] sm:$0xff]  ;;  %v1601_v20 = vld [vmem:[%s4193_s7 + $0x8] sm:$0xff]  ;;  %s4143_s29 = scalar_lea.hbm %s4250_s3, %s3052_s24 }
  0x33   : > { %3342 = vmatprep.subr.bf16.mxu0 %v3577_v3  ;;  %s688_s2 = scalar_lea.vmem %s4243_s26, %s3781_s6  ;;  %s684_s21 = scalar_lea.vmem %s4244_s22, %s3781_s6  ;;  %v3830_v25 = vsel %vm1029_vm5, 1.0, %v3579_v11  ;;  %vm1268_vm8 = vmand %vm1266_vm6, %vm1267_vm7  ;;  %v3358_v22 = vpack.c.bf16 %v1601_v20, %v1600_v19 }
  0x34   : > { %v694_v16 = vld [vmem:[%s688_s2] sm:$0xff]  ;;  %v3840_v32 = vsel %vm1268_vm8, 1.0, %v3579_v11  ;;  %vm1435_vm11 = vmand %vm1433_vm9, %vm1434_vm10 }
  0x35   : > { %3350 = vmatpush3.bf16.msra.mxu1 %v3349_v12  ;;  %v3797_v17 = vld [vmem:[%s684_s21] sm:$0xff]  ;;  %v3853_v34 = vsel %vm1435_vm11, 1.0, %v3579_v11  ;;  %s4245_s21 = sld [smem:[#allocation17_spill]] }
  0x36   : > { %3344 = vmatpush3.bf16.msra.mxu0 %v3343_v13  ;;  %3179 = vmatprep.subr.mxu1 %v3579_v11 }
  0x37   : > { %3351 = vmatprep.subr.bf16.mxu0 %v3577_v3 }
  0x38   : > { %3161 = vmatmul.mubr.msk.f32.vlgmr.msra.gmra.mrb[0].mxu1 %vm705_vm1, %v694_v16 }
  0x39   : > { %3150 = vmatmul.mubr.msk.f32.vlgmr.msra.gmra.mrb[0].mxu0 %vm705_vm1, %v3797_v17  ;;  %3181 = vmatprep.mubr.msk.f32.mxu1 %vm3578_vm0, %v3579_v11 }
  0x3a   : > { %3353 = vmatpush3.bf16.msra.mxu0 %v3352_v18  ;;  %3171 = vmatprep.mubr.msk.f32.mxu0 %vm3578_vm0, %v3579_v11 }
  0x3b   : > { %3354 = vmatprep.subr.bf16.mxu0 %v3577_v3  ;;  %s692_s22 = scalar_lea.vmem %s4245_s21, %s3781_s6  ;;  %s1708_s21 = sld [smem:[#allocation3 + %s3720_s15]] }
  0x3c   : > { %s3580_s15 = smov [#allocation4]  }
  0x3e   : > { %3356 = vmatpush3.bf16.msra.mxu0 %v3355_v21  ;;  %v1602_v21 = vld [vmem:[%s4193_s7 + $0x10] sm:$0xff] }
  0x3f   : > { %3174 = vmatprep.subr.mxu0 %v3579_v11 }
  0x41   : > { %3172 = vmatmul.mubr.msk.f32.vlgmr.msra.gmra.mrb[2].mxu0 %vm705_vm1, %v694_v16 }
  0x42   : > { %3176 = vmatprep.mubr.msk.f32.mxu0 %vm3578_vm0, %v3579_v11 }
 0x10b   : > { %v852_v26 = vpop.f32.mrb[0].mxu1 }
 0x10c   : > { %v775_v27 = vpop.f32.mrb[0].mxu0  ;;  %v3162_v28 = vpop.f32.mrb[1].mxu1  ;;  %3175 = vmatpush3.xpose.msk.msra.mxu0 %vm705_vm1, %v852_v26  ;;  %3180 = vmatpush3.xpose.msk.msra.mxu1 %vm705_vm1, %v852_v26 }
 0x10d   : > { %v935_v29 = vmul.f32 %v3827_v24, %v775_v27  ;;  %v1032_v30 = vmul.f32 %v3830_v25, %v775_v27  ;;  %v3151_v31 = vpop.f32.mrb[1].mxu0  ;;  %3194 = vmatprep.subr.mxu1 %v3579_v11  ;;  %3184 = vmatprep.subr.mxu0 %v3579_v11  ;;  %v1271_v33 = vmul.f32 %v3840_v32, %v775_v27 }
 0x10e   : > { %v1438_v36 = vmul.f32 %v3853_v34, %v775_v27 }
 0x10f   : > { %3177 = vmatmul.mubr.msk.f32.vlgmr.msra.gmra.mrb[4].mxu0 %vm705_vm1, %v935_v29  ;;  %3182 = vmatmul.mubr.msk.f32.vlgmr.msra.gmra.mrb[2].mxu1 %vm705_vm1, %v1032_v30 }
 0x110   : > { %3195 = vmatpush3.xpose.msk.msra.mxu1 %vm705_vm1, %v852_v26  ;;  %3196 = vmatprep.mubr.msk.f32.mxu1 %vm3578_vm0, %v3579_v11 }
 0x111   : > { %3204 = vmatprep.subr.mxu1 %v3579_v11  ;;  %3186 = vmatprep.mubr.msk.f32.mxu0 %vm3578_vm0, %v3579_v11 }
 0x113   : > { %3197 = vmatmul.mubr.msk.f32.vlgmr.msra.gmra.mrb[4].mxu1 %vm705_vm1, %v1271_v33 }
 0x114   : > { %3205 = vmatpush3.xpose.msk.msra.mxu1 %vm705_vm1, %v852_v26  ;;  %3206 = vmatprep.mubr.msk.f32.mxu1 %vm3578_vm0, %v3579_v11  ;;  %v3859_v35 = vpop.f32.mrb[2].mxu0  ;;  %v1603_v26 = vld [vmem:[%s4193_s7 + $0x18] sm:$0xff] }
 0x115   : > { %v1119_v37 = vmul.f32 %v3830_v25, %v3859_v35  ;;  %v3173_v38 = vpop.f32.mrb[3].mxu0  ;;  %3357 = vmatprep.subr.bf16.mxu1 %v3577_v3  ;;  %v3361_v27 = vpack.c.bf16 %v1603_v26, %v1602_v21 }
 0x117   : > { %3207 = vmatmul.mubr.msk.f32.vlgmr.msra.gmra.mrb[6].mxu1 %vm705_vm1, %v1438_v36  ;;  %3185 = vmatpush3.msra.mxu0 %v1119_v37  ;;  %v1026_v36 = vmul.f32 %v3827_v24, %v3859_v35 }
 0x118   : > { %3189 = vmatprep.subr.mxu0 %v3579_v11  ;;  %3222 = vmatprep.mubr.msk.f32.mxu1 %vm3578_vm0, %v3579_v11 }
 0x119   : > { %3359 = vmatpush3.bf16.msra.mxu1 %v3358_v22 }
 0x11a   : > { %3360 = vmatprep.subr.bf16.mxu1 %v3577_v3 }
 0x11d   : > { %3362 = vmatpush3.bf16.msra.mxu1 %v3361_v27  ;;  %v1865_v27 = vld [vmem:[%s4198_s12] sm:$0xff] }
 0x11e   : > { %3369 = vmatprep.subr.bf16.mxu1 %v3577_v3 }
 0x1e2   : > { %v1008_v40 = vpop.f32.mrb[4].mxu0  ;;  %v1102_v41 = vpop.f32.mrb[2].mxu1 }
 0x1e3   : > { %v1012_v42 = vmul.f32 0.35355338, %v1008_v40  ;;  %v1106_v43 = vmul.f32 0.35355338, %v1102_v41  ;;  %v3178_v44 = vpop.f32.mrb[5].mxu0  ;;  %v3183_v45 = vpop.f32.mrb[3].mxu1  ;;  %v1358_v40 = vmul.f32 %v3840_v32, %v3859_v35 }
 0x1e5   : > { %v1107_v46 = vsel %vm700_vm12, %v1106_v43, -1000000.0  ;;  %v1013_v51 = vsel %vm700_vm12, %v1012_v42, -1000000.0  ;;  %v1525_v43 = vmul.f32 %v3853_v34, %v3859_v35 }
 0x1e6   : > { %v1341_v47 = vpop.f32.mrb[4].mxu1  ;;  %v1108_v48 = vsel %vm1014_vm13, %v1107_v46, -inf  ;;  %v1015_v55 = vsel %vm1014_vm13, %v1013_v51, -inf }
 0x1e7   : > { %v1345_v49 = vmul.f32 0.35355338, %v1341_v47  ;;  %1109 = vmax.xlane.f32.xlu0 %v1108_v48  ;;  %v3198_v50 = vpop.f32.mrb[5].mxu1 }
 0x1e9   : > { %v1346_v52 = vsel %vm700_vm12, %v1345_v49, -1000000.0 }
 0x1ea   : > { %v1508_v53 = vpop.f32.mrb[6].mxu1  ;;  %v1347_v54 = vsel %vm1014_vm13, %v1346_v52, -inf }
 0x1eb   : > { %v1512_v56 = vmul.f32 0.35355338, %v1508_v53  ;;  %1348 = vmax.xlane.f32.xlu1 %v1347_v54  ;;  %v3208_v57 = vpop.f32.mrb[7].mxu1  ;;  %1016 = vmax.xlane.f32.xlu0 %v1015_v55 }
 0x1ed   : > { %v1513_v58 = vsel %vm700_vm12, %v1512_v56, -1000000.0  ;;  %v1788_v56 = vld [vmem:[%s4197_s11] sm:$0xff] }
 0x1ee   : > { %v1514_v59 = vsel %vm1014_vm13, %v1513_v58, -inf }
 0x1ef   : > { %1515 = vmax.xlane.f32.xlu1 %v1514_v59  ;;  %v1712_v59 = vld [vmem:[%s4196_s10 + $0x8] sm:$0xff] }
 0x274   : > { %v1110_v60 = vpop.xlane.xlu0 %1109 }
 0x275   : > { %v1111_v61 = vsub.f32 %v1107_v46, %v1110_v60 }
 0x277   : > { %v1112_v62 = vmul.f32 1.442695, %v1111_v61  ;;  %v1790_v61 = vld [vmem:[%s4197_s11 + $0x10] sm:$0xff] }
 0x278   : > { %v1349_v63 = vpop.xlane.xlu1 %1348  ;;  %v1017_v0 = vpop.xlane.xlu0 %1016 }
 0x279   : > { %3460 = vpow2.f32 %v1112_v62  ;;  %v1350_v1 = vsub.f32 %v1346_v52, %v1349_v63  ;;  %v1018_v2 = vsub.f32 %v1013_v51, %v1017_v0  ;;  %v1791_v62 = vld [vmem:[%s4197_s11 + $0x18] sm:$0xff]  ;;  %v1713_v0 = vld [vmem:[%s4196_s10 + $0x10] sm:$0xff] }
 0x27a   : > { %v3373_v63 = vpack.c.bf16 %v1791_v62, %v1790_v61 }
 0x27b   : > { %v1351_v4 = vmul.f32 1.442695, %v1350_v1  ;;  %v1019_v5 = vmul.f32 1.442695, %v1018_v2  ;;  %v1714_v1 = vld [vmem:[%s4196_s10 + $0x18] sm:$0xff] }
 0x27c   : > { %v1516_v6 = vpop.xlane.xlu1 %1515  ;;  %v3367_v2 = vpack.c.bf16 %v1714_v1, %v1713_v0 }
 0x27d   : > { %3462 = vpow2.f32 %v1351_v4  ;;  %v1517_v7 = vsub.f32 %v1513_v58, %v1516_v6  ;;  %v1711_v58 = vld [vmem:[%s4196_s10] sm:$0xff] }
 0x27e   : > { %3464 = vpow2.f32 %v1019_v5  ;;  %v3364_v60 = vpack.c.bf16 %v1712_v59, %v1711_v58  ;;  %v695_v4 = vld [vmem:[%s692_s22] sm:$0xff] }
 0x27f   : > { %v1518_v8 = vmul.f32 1.442695, %v1517_v7 }
 0x281   : > { %3466 = vpow2.f32 %v1518_v8 }
 0x283   : > { %v3461_v9 = vpop.eup %3460 }
 0x284   : > { %v1114_v10 = vsel %vm1014_vm13, %v3461_v9, 0.0 }
 0x285   : > { %1115 = vadd.xlane.f32.xlu0 %v1114_v10 }
 0x287   : > { %v3463_v12 = vpop.eup %3462 }
 0x288   : > { %v3465_v13 = vpop.eup %3464  ;;  %v1353_v14 = vsel %vm1014_vm13, %v3463_v12, 0.0 }
 0x289   : > { %1354 = vadd.xlane.f32.xlu0 %v1353_v14  ;;  %v1021_v15 = vsel %vm1014_vm13, %v3465_v13, 0.0 }
 0x28a   : > { %1022 = vadd.xlane.f32.xlu1 %v1021_v15 }
 0x28b   : > { %v3467_v16 = vpop.eup %3466 }
 0x28c   : > { %v1520_v18 = vsel %vm1014_vm13, %v3467_v16, 0.0 }
 0x28e   : > { %1521 = vadd.xlane.f32.xlu1 %v1520_v18 }
 0x312   : > { %v1116_v28 = vpop.xlane.xlu0 %1115 }
 0x313   : > { %3468 = vrcp.f32 %v1116_v28  ;;  %v1866_v28 = vld [vmem:[%s4198_s12 + $0x8] sm:$0xff] }
 0x316   : > { %v1355_v33 = vpop.xlane.xlu0 %1354 }
 0x317   : > { %v1023_v29 = vpop.xlane.xlu1 %1022 }
 0x318   : > { %3470 = vrcp.f32 %v1023_v29  ;;  %v1867_v29 = vld [vmem:[%s4198_s12 + $0x10] sm:$0xff] }
 0x319   : > { %3472 = vrcp.f32 %v1355_v33 }
 0x31b   : > { %v1522_v39 = vpop.xlane.xlu1 %1521 }
 0x31c   : > { %3474 = vrcp.f32 %v1522_v39 }
 0x31d   : > { %v3469_v30 = vpop.eup %3468 }
 0x31e   : > { %v1118_v31 = vmul.f32 %v3469_v30, %v3461_v9  ;;  %v3025_v9 = vld [vmem:[%s4194_s8] ss:$0 sm:$0xff]  ;;  %v3376_v30 = vpack.c.bf16 %v1866_v28, %v1865_v27 }
 0x320   : > { %3187 = vmatmul.mubr.msk.f32.vlgmr.msra.gmra.mrb[6].mxu0 %vm1014_vm13, %v1118_v31  ;;  %v1868_v31 = vld [vmem:[%s4198_s12 + $0x18] sm:$0xff] }
 0x321   : > { %3190 = vmatpush3.msra.mxu0 %v1026_v36  ;;  %3191 = vmatprep.mubr.msk.f32.mxu0 %vm3578_vm0, %v3579_v11  ;;  %v3379_v33 = vpack.c.bf16 %v1868_v31, %v1867_v29  ;;  %v1709_v36 = vstv %s1708_s21  ;;  %s678_s21 = sand.u32 1, %s3566_s23  }
 0x322   : > { %3199 = vmatprep.subr.mxu0 %v3579_v11  ;;  %v3471_v37 = vpop.eup %3470  ;;  %vm4017_vm14 = vcmp.lt.s32.totalorder %v3819_v23, %v1709_v36  ;;  %s3001_s22 = sshll.u32 %s678_s21, 3  ;;  %s2901_s6 = scalar_lea.sflag [#allocation5], %s678_s21 }
 0x323   : > { %v1025_v38 = vmul.f32 %v3471_v37, %v3465_v13  ;;  %v3473_v41 = vpop.eup %3472  ;;  %s680_s25 = scalar_lea.vmem [#allocation4], %s3001_s22  ;;  %s3514_s22 = sshll.u32 %s3580_s15, 4  ;;  %s3515_s22 = int_to_ptr.vmem [resolvable:$false] %s3514_s22 }
 0x324   : > { %v1357_v42 = vmul.f32 %v3473_v41, %v3463_v12  ;;  %v3026_v12 = vld [vmem:[%s4195_s9] ss:$0 sm:$0xff]  ;;  %s2914_s26 = sshll.u32 %s680_s25, 4  ;;  %s3516_s2 = scalar_lea.vmem %s3515_s22, 256  ;;  %s4145_s26 = int_to_ptr.vmem [resolvable:$true] %s2914_s26 }
 0x325   : > { %s3510_s5 = scalar_lea.vmem %s4145_s26, 128  ;;  %p3517_p5 = scmp.lt.s32.totalorder %s4145_s26, %s3515_s22 }
 0x326   : > { %v3475_v44 = vpop.eup %3474  ;;  %p3511_p2 = scmp.ne.s32.totalorder %s4145_s26, %s3510_s5  ;;  %p3518_p6 = scmp.lt.s32.totalorder %s3516_s2, %s3510_s5 }
 0x327   : > { %v1524_v45 = vmul.f32 %v3475_v44, %v3467_v16 }
 0x328   : > { %3192 = vmatmul.mubr.msk.f32.vlgmr.msra.gmra.mrb[6].mxu0 %vm1014_vm13, %v1025_v38  ;;  %p3512_p3 = pnand %p3511_p2, %p3737_p10  ;;  %p3519_p7 = por %p3518_p6, %p3517_p5 }
 0x329   : > { %3200 = vmatpush3.msra.mxu0 %v1358_v40  ;;  %3201 = vmatprep.mubr.msk.f32.mxu0 %vm3578_vm0, %v3579_v11 }
 0x32a   : > { %3209 = vmatprep.subr.mxu0 %v3579_v11  ;;  %p3513_p4 = pneg %p3512_p3 }
 0x32c   : > { %p3520_p8 = pnand %p3519_p7, %p3513_p4 }
 0x330   : > { %3202 = vmatmul.mubr.msk.f32.vlgmr.msra.gmra.mrb[6].mxu0 %vm1014_vm13, %v1357_v42 }
 0x331   : > { %3210 = vmatpush3.msra.mxu0 %v1525_v43  ;;  %3211 = vmatprep.mubr.msk.f32.mxu0 %vm3578_vm0, %v3579_v11 }
 0x332   : > { %3363 = vmatprep.subr.bf16.mxu0 %v3577_v3 }
 0x338   : > { %3212 = vmatmul.mubr.msk.f32.vlgmr.msra.gmra.mrb[6].mxu0 %vm1014_vm13, %v1524_v45 }
 0x339   : > { %3233 = vmatprep.mubr.msk.f32.mxu0 %vm3578_vm0, %v3579_v11  ;;  %3365 = vmatpush3.bf16.msra.mxu0 %v3364_v60 }
 0x33a   : > { %3366 = vmatprep.subr.bf16.mxu0 %v3577_v3 }
 0x33d   : > { %3368 = vmatpush3.bf16.msra.mxu0 %v3367_v2 }
 0x33e   : > { %3375 = vmatprep.subr.bf16.mxu0 %v3577_v3 }
 0x40b   : > { %v1595_v46 = vpop.f32.mrb[6].mxu0 }
 0x40c   : > { %v3213_v47 = vpop.f32.mrb[7].mxu0  ;;  %3223 = vmatmul.mubr.msk.f32.vlgmr.msra.gmra.mrb[8].mxu1 %vm705_vm1, %v1595_v46 }
 0x40d   : > { %3244 = vmatprep.mubr.msk.f32.mxu1 %vm3578_vm0, %v3579_v11 }
 0x4df   : > { %v1673_v35 = vpop.f32.mrb[8].mxu1 }
 0x4e0   : > { %v1677_v48 = vadd.f32 %v1673_v35, %v3797_v17  ;;  %v3224_v49 = vpop.f32.mrb[9].mxu1  ;;  %v1789_v17 = vld [vmem:[%s4197_s11 + $0x8] sm:$0xff] }
 0x4e1   : > { %v3370_v57 = vpack.c.bf16 %v1789_v17, %v1788_v56 }
 0x4e2   : > { %v1680_v50 = vsel %vm705_vm1, %v1677_v48, 0.0 }
 0x4e3   : > { %1681 = vadd.xlane.f32.xlu0 %v1680_v50  ;;  %3371 = vmatpush3.bf16.msra.mxu1 %v3370_v57 }
 0x4e4   : > { %3372 = vmatprep.subr.bf16.mxu1 %v3577_v3 }
 0x4e7   : > { %3374 = vmatpush3.bf16.msra.mxu1 %v3373_v63 }
 0x4e8   : > { %3258 = vmatprep.subr.mxu1 %v3579_v11 }
 0x4ea   : > { %3245 = vmatmul.mubr.msk.f32.vlgmr.msra.gmra.mrb[10].mxu1 %vm705_vm1, %v695_v4 }
 0x4eb   : > { %3260 = vmatprep.mubr.msk.f32.mxu1 %vm3578_vm0, %v3579_v11 }
 0x570   : > { %v1682_v51 = vpop.xlane.xlu0 %1681 }
 0x571   : > { %v1684_v52 = vmul.f32 0.03125, %v1682_v51 }
 0x573   : > { %v1685_v53 = vsub.f32 %v1677_v48, %v1684_v52 }
 0x575   : > { %v1686_v54 = vmul.f32 %v1685_v53, %v1685_v53 }
 0x577   : > { %v1687_v55 = vsel %vm705_vm1, %v1686_v54, 0.0 }
 0x578   : > { %1688 = vadd.xlane.f32.xlu1 %v1687_v55 }
 0x5bd   : > { %v1861_v15 = vpop.f32.mrb[10].mxu1 }
 0x5be   : > { %v3246_v16 = vpop.f32.mrb[11].mxu1  ;;  %3259 = vmatpush3.xpose.msk.msra.mxu1 %vm705_vm1, %v1861_v15 }
 0x5bf   : > { %3263 = vmatprep.subr.mxu1 %v3579_v11 }
 0x605   : > { %v1689_v5 = vpop.xlane.xlu1 %1688 }
 0x606   : > { %v1690_v6 = vmul.f32 0.03125, %v1689_v5 }
 0x608   : > { %v1691_v7 = vadd.f32 1e-05, %v1690_v6 }
 0x60a   : > { %3476 = vrsqrt.f32 %v1691_v7 }
 0x614   : > { %v3477_v8 = vpop.eup %3476 }
 0x615   : > { %v1693_v10 = vmul.f32 %v3477_v8, %v1685_v53 }
 0x617   : > { %v1700_v13 = vmul.f32 %v3025_v9, %v1693_v10 }
 0x619   : > { %v3968_v14 = vadd.f32 %v3026_v12, %v1700_v13 }
 0x61b   : > { %3234 = vmatmul.mubr.msk.f32.vlgmr.msra.gmra.mrb[8].mxu0 %vm705_vm1, %v3968_v14 }
 0x61c   : > { %3255 = vmatprep.mubr.msk.f32.mxu0 %vm3578_vm0, %v3579_v11  ;;  %3377 = vmatpush3.bf16.msra.mxu0 %v3376_v30 }
 0x61d   : > { %3378 = vmatprep.subr.bf16.mxu0 %v3577_v3 }
 0x620   : > { %3380 = vmatpush3.bf16.msra.mxu0 %v3379_v33 }
 0x621   : > { %3268 = vmatprep.subr.mxu0 %v3579_v11 }
 0x623   : > { %3256 = vmatmul.mubr.msk.f32.vlgmr.msra.gmra.mrb[10].mxu0 %vm705_vm1, %v695_v4 }
 0x624   : > { %3270 = vmatprep.mubr.msk.f32.mxu0 %vm3578_vm0, %v3579_v11 }
 0x6ee   : > { %v1784_v18 = vpop.f32.mrb[8].mxu0 }
 0x6ef   : > { %v1939_v19 = vmul.f32 %v3827_v24, %v1784_v18  ;;  %v3235_v20 = vpop.f32.mrb[9].mxu0  ;;  %v2030_v21 = vmul.f32 %v3830_v25, %v1784_v18  ;;  %v2264_v22 = vmul.f32 %v3840_v32, %v1784_v18  ;;  %v2426_v26 = vmul.f32 %v3853_v34, %v1784_v18  ;;  %v2588_v18 = vld [vmem:[%s4199_s13] sm:$0xff] }
 0x6f0   : > { %v2590_v20 = vld [vmem:[%s4199_s13 + $0x10] sm:$0xff] }
 0x6f1   : > { %3261 = vmatmul.mubr.msk.f32.vlgmr.msra.gmra.mrb[12].mxu1 %vm705_vm1, %v1939_v19  ;;  %v2589_v19 = vld [vmem:[%s4199_s13 + $0x8] sm:$0xff] }
 0x6f2   : > { %3264 = vmatpush3.xpose.msk.msra.mxu1 %vm705_vm1, %v1861_v15  ;;  %3265 = vmatprep.mubr.msk.f32.mxu1 %vm3578_vm0, %v3579_v11 }
 0x6f3   : > { %3278 = vmatprep.subr.mxu1 %v3579_v11 }
 0x6f5   : > { %3266 = vmatmul.mubr.msk.f32.vlgmr.msra.gmra.mrb[14].mxu1 %vm705_vm1, %v2030_v21  ;;  %v3382_v21 = vpack.c.bf16 %v2589_v19, %v2588_v18  ;;  %v3047_v18 = vld [vmem:[%s4205_s19] ss:$0 sm:$0xff] }
 0x6f6   : > { %3279 = vmatpush3.xpose.msk.msra.mxu1 %vm705_vm1, %v1861_v15  ;;  %3280 = vmatprep.mubr.msk.f32.mxu1 %vm3578_vm0, %v3579_v11  ;;  %v1935_v13 = vpop.f32.mrb[10].mxu0 }
 0x6f7   : > { %3288 = vmatprep.subr.mxu1 %v3579_v11  ;;  %v3257_v16 = vpop.f32.mrb[11].mxu0  ;;  %v2029_v29 = vmul.f32 %v3827_v24, %v1935_v13  ;;  %v2351_v38 = vmul.f32 %v3840_v32, %v1935_v13 }
 0x6f9   : > { %3281 = vmatmul.mubr.msk.f32.vlgmr.msra.gmra.mrb[16].mxu1 %vm705_vm1, %v2264_v22 }
 0x6fa   : > { %3289 = vmatpush3.xpose.msk.msra.mxu1 %vm705_vm1, %v1861_v15  ;;  %3290 = vmatprep.mubr.msk.f32.mxu1 %vm3578_vm0, %v3579_v11  ;;  %v2117_v15 = vmul.f32 %v3830_v25, %v1935_v13  ;;  %v2591_v25 = vld [vmem:[%s4199_s13 + $0x18] sm:$0xff] }
 0x6fb   : > { %3381 = vmatprep.subr.bf16.mxu1 %v3577_v3  ;;  %v3385_v22 = vpack.c.bf16 %v2591_v25, %v2590_v20 }
 0x6fc   : > { %3269 = vmatpush3.msra.mxu0 %v2117_v15 }
 0x6fd   : > { %3291 = vmatmul.mubr.msk.f32.vlgmr.msra.gmra.mrb[18].mxu1 %vm705_vm1, %v2426_v26  ;;  %3273 = vmatprep.subr.mxu0 %v3579_v11 }
 0x6fe   : > { %3306 = vmatprep.mubr.msk.f32.mxu1 %vm3578_vm0, %v3579_v11  ;;  %3383 = vmatpush3.bf16.msra.mxu1 %v3382_v21 }
 0x6ff   : > { %3384 = vmatprep.subr.bf16.mxu1 %v3577_v3 }
 0x702   : > { %3386 = vmatpush3.bf16.msra.mxu1 %v3385_v22 }
 0x703   : > { %3393 = vmatprep.subr.bf16.mxu1 %v3577_v3 }
 0x7c4   : > { %v2012_v37 = vpop.f32.mrb[12].mxu1 }
 0x7c5   : > { %v2016_v39 = vmul.f32 0.35355338, %v2012_v37  ;;  %v3262_v40 = vpop.f32.mrb[13].mxu1 }
 0x7c6   : > { %v2513_v40 = vmul.f32 %v3853_v34, %v1935_v13 }
 0x7c7   : > { %v2017_v41 = vsel %vm4017_vm14, %v2016_v39, -1000000.0 }
 0x7c8   : > { %v2100_v42 = vpop.f32.mrb[14].mxu1  ;;  %v2018_v43 = vsel %vm1014_vm13, %v2017_v41, -inf }
 0x7c9   : > { %v2104_v44 = vmul.f32 0.35355338, %v2100_v42  ;;  %2019 = vmax.xlane.f32.xlu1 %v2018_v43  ;;  %v3267_v45 = vpop.f32.mrb[15].mxu1 }
 0x7cb   : > { %v2105_v46 = vsel %vm4017_vm14, %v2104_v44, -1000000.0 }
 0x7cc   : > { %v2334_v47 = vpop.f32.mrb[16].mxu1  ;;  %v2106_v23 = vsel %vm1014_vm13, %v2105_v46, -inf }
 0x7cd   : > { %v2338_v35 = vmul.f32 0.35355338, %v2334_v47  ;;  %2107 = vmax.xlane.f32.xlu0 %v2106_v23  ;;  %v3282_v48 = vpop.f32.mrb[17].mxu1 }
 0x7cf   : > { %v2339_v49 = vsel %vm4017_vm14, %v2338_v35, -1000000.0 }
 0x7d0   : > { %v2496_v50 = vpop.f32.mrb[18].mxu1  ;;  %v2340_v51 = vsel %vm1014_vm13, %v2339_v49, -inf }
 0x7d1   : > { %v2500_v52 = vmul.f32 0.35355338, %v2496_v50  ;;  %2341 = vmax.xlane.f32.xlu0 %v2340_v51  ;;  %v3292_v53 = vpop.f32.mrb[19].mxu1  ;;  %v2695_v50 = vld [vmem:[%s4202_s16] sm:$0xff]  ;;  %v2697_v51 = vld [vmem:[%s4202_s16 + $0x10] sm:$0xff] }
 0x7d3   : > { %v2501_v54 = vsel %vm4017_vm14, %v2500_v52, -1000000.0  ;;  %v2698_v52 = vld [vmem:[%s4202_s16 + $0x18] sm:$0xff] }
 0x7d4   : > { %v2502_v55 = vsel %vm1014_vm13, %v2501_v54, -inf  ;;  %v3391_v53 = vpack.c.bf16 %v2698_v52, %v2697_v51 }
 0x7d5   : > { %2503 = vmax.xlane.f32.xlu1 %v2502_v55  ;;  %v2781_v55 = vld [vmem:[%s4204_s18 + $0x8] sm:$0xff] }
 0x856   : > { %v2020_v56 = vpop.xlane.xlu1 %2019 }
 0x857   : > { %v2021_v17 = vsub.f32 %v2017_v41, %v2020_v56  ;;  %v2782_v56 = vld [vmem:[%s4204_s18 + $0x10] sm:$0xff] }
 0x859   : > { %v2022_v57 = vmul.f32 1.442695, %v2021_v17 }
 0x85a   : > { %v2108_v58 = vpop.xlane.xlu0 %2107 }
 0x85b   : > { %3478 = vpow2.f32 %v2022_v57  ;;  %v2109_v59 = vsub.f32 %v2105_v46, %v2108_v58  ;;  %v2783_v57 = vld [vmem:[%s4204_s18 + $0x18] sm:$0xff] }
 0x85c   : > { %v3397_v58 = vpack.c.bf16 %v2783_v57, %v2782_v56 }
 0x85d   : > { %v2110_v60 = vmul.f32 1.442695, %v2109_v59  ;;  %v2784_v59 = vld [vmem:[%s4204_s18 + $0x20] sm:$0xff] }
 0x85e   : > { %v2342_v61 = vpop.xlane.xlu0 %2341 }
 0x85f   : > { %3480 = vpow2.f32 %v2110_v60  ;;  %v2343_v62 = vsub.f32 %v2339_v49, %v2342_v61  ;;  %v2785_v60 = vld [vmem:[%s4204_s18 + $0x28] sm:$0xff] }
 0x860   : > { %v3400_v61 = vpack.c.bf16 %v2785_v60, %v2784_v59 }
 0x861   : > { %v2344_v63 = vmul.f32 1.442695, %v2343_v62 }
 0x862   : > { %v2504_v0 = vpop.xlane.xlu1 %2503 }
 0x863   : > { %3482 = vpow2.f32 %v2344_v63  ;;  %v2505_v1 = vsub.f32 %v2501_v54, %v2504_v0  ;;  %v2780_v54 = vld [vmem:[%s4204_s18] sm:$0xff] }
 0x864   : > { %v3394_v17 = vpack.c.bf16 %v2781_v55, %v2780_v54 }
 0x865   : > { %v3479_v2 = vpop.eup %3478  ;;  %v2506_v4 = vmul.f32 1.442695, %v2505_v1 }
 0x866   : > { %v2024_v5 = vsel %vm1014_vm13, %v3479_v2, 0.0 }
 0x867   : > { %3484 = vpow2.f32 %v2506_v4  ;;  %2025 = vadd.xlane.f32.xlu1 %v2024_v5  ;;  %v3044_v5 = vld [vmem:[%s4248_s30] ss:$0 sm:$0xff] }
 0x869   : > { %v3481_v6 = vpop.eup %3480 }
 0x86a   : > { %v2112_v7 = vsel %vm1014_vm13, %v3481_v6, 0.0 }
 0x86b   : > { %2113 = vadd.xlane.f32.xlu0 %v2112_v7 }
 0x86d   : > { %v3483_v8 = vpop.eup %3482 }
 0x86e   : > { %v2346_v9 = vsel %vm1014_vm13, %v3483_v8, 0.0 }
 0x86f   : > { %2347 = vadd.xlane.f32.xlu0 %v2346_v9 }
 0x871   : > { %v3485_v10 = vpop.eup %3484 }
 0x872   : > { %v2508_v12 = vsel %vm1014_vm13, %v3485_v10, 0.0 }
 0x873   : > { %2509 = vadd.xlane.f32.xlu1 %v2508_v12 }
 0x8f4   : > { %v2026_v27 = vpop.xlane.xlu1 %2025 }
 0x8f8   : > { %v2114_v26 = vpop.xlane.xlu0 %2113 }
 0x8f9   : > { %3486 = vrcp.f32 %v2114_v26 }
 0x8fa   : > { %3488 = vrcp.f32 %v2026_v27 }
 0x8fc   : > { %v2348_v31 = vpop.xlane.xlu0 %2347 }
 0x8fd   : > { %3490 = vrcp.f32 %v2348_v31 }
 0x900   : > { %v2510_v37 = vpop.xlane.xlu1 %2509 }
 0x901   : > { %3492 = vrcp.f32 %v2510_v37 }
 0x903   : > { %v3487_v28 = vpop.eup %3486 }
 0x904   : > { %v2116_v30 = vmul.f32 %v3487_v28, %v3481_v6  ;;  %v3489_v33 = vpop.eup %3488 }
 0x905   : > { %v2028_v36 = vmul.f32 %v3489_v33, %v3479_v2  ;;  %v3043_v2 = vld [vmem:[%s4200_s14] ss:$0 sm:$0xff] }
 0x906   : > { %3271 = vmatmul.mubr.msk.f32.vlgmr.msra.gmra.mrb[12].mxu0 %vm1014_vm13, %v2116_v30 }
 0x907   : > { %3274 = vmatpush3.msra.mxu0 %v2029_v29  ;;  %3275 = vmatprep.mubr.msk.f32.mxu0 %vm3578_vm0, %v3579_v11  ;;  %v3491_v24 = vpop.eup %3490 }
 0x908   : > { %3283 = vmatprep.subr.mxu0 %v3579_v11  ;;  %v2350_v39 = vmul.f32 %v3491_v24, %v3483_v8  ;;  %v2787_v8 = vld [vmem:[%s4204_s18 + $0x38] sm:$0xff] }
 0x90b   : > { %v3493_v32 = vpop.eup %3492 }
 0x90c   : > { %v2512_v41 = vmul.f32 %v3493_v32, %v3485_v10  ;;  %v3045_v10 = vld [vmem:[%s4203_s17] ss:$0 sm:$0xff] }
 0x90e   : > { %3276 = vmatmul.mubr.msk.f32.vlgmr.msra.gmra.mrb[12].mxu0 %vm1014_vm13, %v2028_v36 }
 0x90f   : > { %3284 = vmatpush3.msra.mxu0 %v2351_v38  ;;  %3285 = vmatprep.mubr.msk.f32.mxu0 %vm3578_vm0, %v3579_v11  ;;  %v3049_v38 = vld [vmem:[%s4206_s20] ss:$0 sm:$0xff] }
 0x910   : > { %3293 = vmatprep.subr.mxu0 %v3579_v11 }
 0x916   : > { %3286 = vmatmul.mubr.msk.f32.vlgmr.msra.gmra.mrb[12].mxu0 %vm1014_vm13, %v2350_v39  ;;  %v3050_v39 = vld [vmem:[%s4249_s4] ss:$0 sm:$0xff] }
 0x917   : > { %3294 = vmatpush3.msra.mxu0 %v2513_v40  ;;  %3295 = vmatprep.mubr.msk.f32.mxu0 %vm3578_vm0, %v3579_v11 }
 0x918   : > { %3387 = vmatprep.subr.bf16.mxu0 %v3577_v3 }
 0x91e   : > { %3296 = vmatmul.mubr.msk.f32.vlgmr.msra.gmra.mrb[12].mxu0 %vm1014_vm13, %v2512_v41 }
 0x91f   : > { %3317 = vmatprep.mubr.msk.f32.mxu0 %vm3578_vm0, %v3579_v11 }
 0x9f1   : > { %v2583_v42 = vpop.f32.mrb[12].mxu0 }
 0x9f2   : > { %v3297_v43 = vpop.f32.mrb[13].mxu0  ;;  %3307 = vmatmul.mubr.msk.f32.vlgmr.msra.gmra.mrb[20].mxu1 %vm705_vm1, %v2583_v42 }
 0x9f3   : > { %3336 = vmatprep.mubr.msk.f32.mxu1 %vm3578_vm0, %v3579_v11  ;;  %v2696_v11 = vld [vmem:[%s4202_s16 + $0x8] sm:$0xff]  ;;  %3395 = vmatpush3.bf16.msra.mxu1 %v3394_v17 }
 0x9f4   : > { %3396 = vmatprep.subr.bf16.mxu1 %v3577_v3 }
 0x9f7   : > { %3398 = vmatpush3.bf16.msra.mxu1 %v3397_v58 }
 0x9f8   : > { %3399 = vmatprep.subr.bf16.mxu1 %v3577_v3 }
 0x9fb   : > { %3401 = vmatpush3.bf16.msra.mxu1 %v3400_v61 }
 0x9fc   : > { %3402 = vmatprep.subr.bf16.mxu1 %v3577_v3 }
 0xac5   : > { %v2661_v34 = vpop.f32.mrb[20].mxu1 }
 0xac6   : > { %v2665_v44 = vadd.f32 %v2661_v34, %v3968_v14  ;;  %v3308_v45 = vpop.f32.mrb[21].mxu1  ;;  %v3388_v14 = vpack.c.bf16 %v2696_v11, %v2695_v50 }
 0xac8   : > { %v2668_v46 = vsel %vm705_vm1, %v2665_v44, 0.0  ;;  %3389 = vmatpush3.bf16.msra.mxu0 %v3388_v14 }
 0xac9   : > { %2669 = vadd.xlane.f32.xlu0 %v2668_v46  ;;  %3390 = vmatprep.subr.bf16.mxu0 %v3577_v3  ;;  %v2786_v3 = vld [vmem:[%s4204_s18 + $0x30] sm:$0xff] }
 0xaca   : > { %v3403_v9 = vpack.c.bf16 %v2787_v8, %v2786_v3 }
 0xacc   : > { %3392 = vmatpush3.bf16.msra.mxu0 %v3391_v53  ;;  %3404 = vmatpush3.bf16.msra.mxu1 %v3403_v9 }
 0xb56   : > { %v2670_v47 = vpop.xlane.xlu0 %2669 }
 0xb57   : > { %v2671_v23 = vmul.f32 0.03125, %v2670_v47 }
 0xb59   : > { %v2672_v35 = vsub.f32 %v2665_v44, %v2671_v23 }
 0xb5b   : > { %v2673_v48 = vmul.f32 %v2672_v35, %v2672_v35 }
 0xb5d   : > { %v2674_v49 = vsel %vm705_vm1, %v2673_v48, 0.0 }
 0xb5e   : > { %2675 = vadd.xlane.f32.xlu1 %v2674_v49 }
 0xbeb   : > { %v2676_v62 = vpop.xlane.xlu1 %2675 }
 0xbec   : > { %v2677_v63 = vmul.f32 0.03125, %v2676_v62 }
 0xbee   : > { %v2678_v0 = vadd.f32 1e-05, %v2677_v63 }
 0xbf0   : > { %3494 = vrsqrt.f32 %v2678_v0 }
 0xbfa   : > { %v3495_v1 = vpop.eup %3494 }
 0xbfb   : > { %v2680_v4 = vmul.f32 %v3495_v1, %v2672_v35 }
 0xbfd   : > { %v2687_v6 = vmul.f32 %v3043_v2, %v2680_v4 }
 0xbff   : > { %v2694_v7 = vadd.f32 %v3044_v5, %v2687_v6 }
 0xc01   : > { %3318 = vmatmul.mubr.msk.f32.vlgmr.msra.gmra.mrb[14].mxu0 %vm705_vm1, %v2694_v7 }
 0xcd4   : > { %v2775_v12 = vpop.f32.mrb[14].mxu0 }
 0xcd5   : > { %v2776_v13 = vadd.f32 %v3045_v10, %v2775_v12  ;;  %v3319_v15 = vpop.f32.mrb[15].mxu0 }
 0xcd7   : > { %v2779_v16 = vmax.f32 %v2776_v13, 0.0 }
 0xcd9   : > { %3337 = vmatmul.mubr.msk.f32.vlgmr.msra.gmra.mrb[22].mxu1 %vm2795_vm15, %v2779_v16 }
 0xdac   : > { %v2865_v19 = vpop.f32.mrb[22].mxu1 }
 0xdad   : > { %v2866_v20 = vadd.f32 %v3047_v18, %v2865_v19  ;;  %v3338_v21 = vpop.f32.mrb[23].mxu1 }
 0xdaf   : > { %v2869_v25 = vadd.f32 %v2866_v20, %v2694_v7 }
 0xdb1   : > { %v2872_v22 = vsel %vm705_vm1, %v2869_v25, 0.0 }
 0xdb2   : > { %2873 = vadd.xlane.f32.xlu0 %v2872_v22 }
 0xe3f   : > { %v2874_v26 = vpop.xlane.xlu0 %2873 }
 0xe40   : > { %v2875_v27 = vmul.f32 0.03125, %v2874_v26 }
 0xe42   : > { %v2876_v28 = vsub.f32 %v2869_v25, %v2875_v27 }
 0xe44   : > { %v2877_v29 = vmul.f32 %v2876_v28, %v2876_v28 }
 0xe46   : > { %v2878_v30 = vsel %vm705_vm1, %v2877_v29, 0.0 }
 0xe47   : > { %2879 = vadd.xlane.f32.xlu1 %v2878_v30 }
 0xed4   : > { %v2880_v31 = vpop.xlane.xlu1 %2879 }
 0xed5   : > { %v2881_v33 = vmul.f32 0.03125, %v2880_v31 }
 0xed7   : > { %v2882_v36 = vadd.f32 1e-05, %v2881_v33 }
 0xed9   : > { %3496 = vrsqrt.f32 %v2882_v36 }
 0xee3   : > { %v3497_v37 = vpop.eup %3496 }
 0xee4   : > { %v2884_v24 = vmul.f32 %v3497_v37, %v2876_v28 }
 0xee6   : > { %v2891_v40 = vmul.f32 %v3049_v38, %v2884_v24 }
 0xee8   : > { %v2898_v32 = vadd.f32 %v3050_v39, %v2891_v40 }
 0xeea   : > { %2899 = vst.msk [vmem:[%s680_s25] sm:$0xff] %vm705_vm1, %v2898_v32 }
 0xeeb   : > { %3523 = shalt.err (!%p3520_p8)
}
 0xeec   : > { %s3524_s21 = scalar_lea.hbm %s4143_s29, 128  ;;  %s3528_s24 = scalar_lea.hbm %s4250_s3, 256 }
 0xeed   : > { %p3525_p9 = scmp.ne.s32.totalorder %s4143_s29, %s3524_s21  ;;  %p3529_p0 = scmp.lt.u32.totalorder %s4143_s29, %s4250_s3 }
 0xeee   : > { %p3530_p1 = scmp.lt.u32.totalorder %s3528_s24, %s3524_s21  ;;  %p3532_p3 = scmp.lt.u32.totalorder %s3524_s21, %s4143_s29 }
 0xeef   : > { %p3526_p12 = pnand %p3525_p9, %p3737_p10 }
 0xef0   : > { %p3531_p2 = por %p3530_p1, %p3529_p0 }
 0xef1   : > { %p3527_p13 = pneg %p3526_p12 }
 0xef2   : > { %p3533_p4 = por %p3532_p3, %p3531_p2 }
 0xef4   : > { %p3534_p5 = pnand %p3533_p4, %p3527_p13 }
 0xef6   : > { %3537 = shalt.err (!%p3534_p5)
}
 0xef7   : > { %3417 = dma.vmem_to_hbm [thread:$0]  (%p3737_p10), %s4145_s26, 128, %s4143_s29, %s2901_s6  }
 0xef8 PF: > { %s4251_s0 = sld [smem:[#allocation10_spill]]  ;;  %s4252_s5 = sld [smem:[#allocation8_spill]] }
 0xefe   : > { %p3423_p6 = scmp.ge.s32.totalorder %s4251_s0, 2  ;;  %s2926_s22 = sand.u32 1, %s4252_s5  }
 0xeff   : > { %s2927_s2 = scalar_lea.sflag [#allocation5], %s2926_s22 }
 0xf00   : > { %p3420_p7 = pnand %p3423_p6, %p3741_p11 }
 0xf02   : > { %3557 = dma.done.wait (!%p3420_p7), %s2927_s2, 128  }
 0xf03   : > { %3559 = vsyncadd (!%p3420_p7), %s2927_s2, 4294967168  ;;  %s4254_s5 = sld [smem:[#allocation11_spill]]  ;;  %s4255_s21 = sld [smem:[#allocation9_spill]] }
 0xf04   : > { %s4256_s1 = sld [smem:[#allocation12_spill]]  ;;  %s4257_s0 = smov %s3566_s23 }
 0xf09   : > { %p38_p8 = scmp.ge.s32.totalorder %s4254_s5, 4   ;;  %s4258_s23 = smov %s4255_s21 }
 0xf0b   :  { %40 = sbr.rel (!%p38_p8) target bundleno = 26 (0x1a), region = 145 }
 0xf12   :  { %2932 = vsyncpa [#allocation5], 1 }
 0xf13   :  { %2934 = vsyncpa [#allocation5 + $0x1], 1 }

// kernel: bert_decoder_forward.2
= control target key start
LH: loop header
LB: loop body
LE: loop exit
PB: predicated region body
PF: predicated region fallthrough
CT: control target
= control target key end

     0   :  { %s3999_s0 = inlined_call_operand.vmem [shape: s32[2], index: 0, kind: input, shape index: {}]   ;;  %s4000_s1 = inlined_call_operand.vmem [shape: f32[2,8,32], index: 1, kind: input, shape index: {}, may-alias: {1,2}]   ;;  %s4001_s2 = inlined_call_operand.vmem [shape: f32[2,8,32], index: 2, kind: input, shape index: {}, may-alias: {1,2}]   ;;  %s4002_s3 = inlined_call_operand.vmem [shape: f32[2,8,32], index: 3, kind: input, shape index: {}]   ;;  %s4003_s4 = inlined_call_operand.vmem [shape: f32[32,32], index: 4, kind: input, shape index: {}]   ;;  %s4004_s5 = inlined_call_operand.vmem [shape: f32[32,32], index: 5, kind: input, shape index: {}]   ;;  %s4005_s6 = inlined_call_operand.vmem [shape: f32[32,32], index: 6, kind: input, shape index: {}]   ;;  %s4006_s7 = inlined_call_operand.vmem [shape: f32[32,32], index: 7, kind: input, shape index: {}]   ;;  %s4007_s8 = inlined_call_operand.vmem [shape: f32[1,32], index: 8, kind: input, shape index: {}]   ;;  %s4008_s9 = inlined_call_operand.vmem [shape: f32[1,32], index: 9, kind: input, shape index: {}]   ;;  %s4009_s10 = inlined_call_operand.vmem [shape: f32[32,32], index: 10, kind: input, shape index: {}]   ;;  %s4010_s11 = inlined_call_operand.vmem [shape: f32[32,32], index: 11, kind: input, shape index: {}]   ;;  %s4011_s12 = inlined_call_operand.vmem [shape: f32[32,32], index: 12, kind: input, shape index: {}]   ;;  %s4012_s13 = inlined_call_operand.vmem [shape: f32[32,32], index: 13, kind: input, shape index: {}]   ;;  %s4013_s14 = inlined_call_operand.vmem [shape: f32[1,32], index: 14, kind: input, shape index: {}]   ;;  %s4014_s15 = inlined_call_operand.vmem [shape: f32[1,32], index: 15, kind: input, shape index: {}]   ;;  %s4015_s16 = inlined_call_operand.vmem [shape: f32[32,64], index: 16, kind: input, shape index: {}]   ;;  %s4016_s17 = inlined_call_operand.vmem [shape: f32[1,64], index: 17, kind: input, shape index: {}]   ;;  %s4017_s18 = inlined_call_operand.vmem [shape: f32[64,32], index: 18, kind: input, shape index: {}]   ;;  %s4018_s19 = inlined_call_operand.vmem [shape: f32[1,32], index: 19, kind: input, shape index: {}]   ;;  %s4019_s20 = inlined_call_operand.vmem [shape: f32[1,32], index: 20, kind: input, shape index: {}]   ;;  %s4020_s21 = inlined_call_operand.vmem [shape: f32[1,32], index: 21, kind: input, shape index: {}]   ;;  %s4021_s22 = inlined_call_operand.vmem [shape: f32[2,8,32], index: 22, kind: output, shape index: {}]  }
   0x1   :  { %4027 = sst [smem:[#allocation5_spill]] %s3999_s0 }
   0x2   :  { %4028 = sst [smem:[#allocation6_spill]] %s4000_s1  ;;  %s4035_s29 = sld [smem:[#allocation5_spill]] }
   0x3   :  { %4029 = sst [smem:[#allocation7_spill]] %s4001_s2 }
   0x4   :  { %4030 = sst [smem:[#allocation8_spill]] %s4002_s3 }
   0x5   :  { %4031 = sst [smem:[#allocation9_spill]] %s4003_s4 }
   0x6   :  { %4032 = sst [smem:[#allocation10_spill]] %s4004_s5 }
   0x7   :  { %4033 = sst [smem:[#allocation11_spill]] %s4005_s6 }
   0x8   :  { %4034 = sst [smem:[#allocation12_spill]] %s4014_s15  ;;  %s27_s15 = sshll.u32 %s4035_s29, 4  ;;  %s28_s15 = int_to_ptr.vmem [resolvable:$true] %s27_s15 }
   0x9   :  { %s3446_s30 = scalar_lea.vmem %s28_s15, 16  ;;  %p3451_p1 = scmp.lt.s32.totalorder %s28_s15, %s28_s15 }
   0xa   :  { %p3447_p0 = scmp.ne.s32.totalorder %s28_s15, %s3446_s30  ;;  %p3452_p2 = scmp.lt.s32.totalorder %s3446_s30, %s3446_s30 }
   0xc   :  { %p3453_p3 = por %p3452_p2, %p3451_p1 }
   0xe   :  { %p3454_p4 = pnand %p3453_p3, %p3447_p0 }
  0x10   :  { %3457 = shalt.err (!%p3454_p4)  }
  0x11   :  { %s3468_s4 = smov [#allocation3]  }
  0x12   :  { %30 = dma.vmem_to_smem %s28_s15, 16, %s3468_s4, [#allocation2] }
  0x13   :  { %3462 = dma.done.wait [#allocation2], 16 }
  0x14   :  { %3463 = vsyncadd [#allocation2], 4294967280 }
  0x15   :  { %32 = sfence }
  0x16   :  { %s3590_s0 = smov 0  }
  0x17 LB: > { %s3596_s23 = sadd.s32 4294967295, %s3466_s0   ;;  %p2981_p5 = scmp.ge.s32.totalorder %s3466_s0, 1  ;;  %s3466_s0 = sphi %s3590_s0, %s38_s0  }
  0x18   : > { %p611_p6 = scmp.lt.s32.totalorder %s3466_s0, 3 }
  0x1a   : > { %p612_p7 = pnand %p2981_p5, %p611_p6 }
  0x1b   : > { %s4036_s5 = sld [smem:[#allocation10_spill]] (!%p612_p7)  ;;  %s4037_s2 = sld [smem:[#allocation9_spill]] (!%p612_p7)  ;;  %v3469_v3 = vmov (!%p612_p7), 0.0|0.0   ;;  %vm3470_vm0 = vmmov (!%p612_p7), 0   ;;  %v3471_v11 = vmov (!%p612_p7), 0.0   ;;  %vm705_vm1 = vcmask (!%p612_p7), 261120  }
  0x1c   : > { %615 = sbr.rel (%p612_p7) target bundleno = 3806 (0xede), region = 104  ;;  %3324 = vmatprep.subr.bf16.mxu1 (!%p612_p7), %v3469_v3  ;;  %3318 = vmatprep.subr.bf16.mxu0 (!%p612_p7), %v3469_v3  ;;  %p677_p8 = scmp.lt.s32.totalorder (!%p612_p7), %s3596_s23, 1  ;;  %v696_v22 = vlaneseq (!%p612_p7)  ;;  %vm1014_vm13 = vcmask (!%p612_p7), 64512   ;;  %vm2795_vm15 = vcmask (!%p612_p7), 523264  }
  0x1d   : > { %3139 = vmatprep.mubr.msk.f32.mxu1 (!%p612_p7), %vm3470_vm0, %v3471_v11  ;;  %3128 = vmatprep.mubr.msk.f32.mxu0 (!%p612_p7), %vm3470_vm0, %v3471_v11  ;;  %s4038_s28 = sld [smem:[#allocation11_spill]] (!%p612_p7)  ;;  %s4039_s1 = sld [smem:[#allocation7_spill]] (!%p612_p7) }
  0x1e   : > { %v3672_v23 = vand.u32 (!%p612_p7), 127, %v696_v22  ;;  %v699_v39 = vshrl.u32 (!%p612_p7), %v696_v22, 7  ;;  %s4041_s4 = sld [smem:[#allocation8_spill]] (!%p612_p7)  ;;  %s4044_s29 = sld [smem:[#allocation12_spill]] (!%p612_p7) }
  0x20   : > { %vm1027_vm2 = vcmp.ge.s32.totalorder (!%p612_p7), %v3672_v23, 8  ;;  %vm1028_vm3 = vcmp.lt.s32.totalorder (!%p612_p7), %v3672_v23, 16  ;;  %vm931_vm4 = vcmp.lt.s32.totalorder (!%p612_p7), %v3672_v23, 8  ;;  %vm1266_vm6 = vcmp.ge.s32.totalorder (!%p612_p7), %v3672_v23, 16 }
  0x21   : > { %v779_v0 = vld [vmem:[%s4036_s5] sm:$0xff] (!%p612_p7)  ;;  %v780_v1 = vld [vmem:[%s4036_s5 + $0x8] sm:$0xff] (!%p612_p7)  ;;  %v781_v6 = vld [vmem:[%s4036_s5 + $0x10] sm:$0xff] (!%p612_p7)  ;;  %vm1267_vm7 = vcmp.lt.s32.totalorder (!%p612_p7), %v3672_v23, 24  ;;  %v3680_v24 = vsel (!%p612_p7), %vm931_vm4, 1.0, %v3471_v11  ;;  %vm1433_vm9 = vcmp.ge.s32.totalorder (!%p612_p7), %v3672_v23, 24  ;;  %vm700_vm12 = vcmp.le.s32.totalorder (!%p612_p7), %v3672_v23, %v699_v39 }
  0x22   : > { %v701_v2 = vld [vmem:[%s4037_s2] sm:$0xff] (!%p612_p7)  ;;  %v3325_v4 = vpack.c.bf16 (!%p612_p7), %v780_v1, %v779_v0  ;;  %v702_v5 = vld [vmem:[%s4037_s2 + $0x8] sm:$0xff] (!%p612_p7)  ;;  %v782_v7 = vld [vmem:[%s4036_s5 + $0x18] sm:$0xff] (!%p612_p7)  ;;  %vm1434_vm10 = vcmp.lt.s32.totalorder (!%p612_p7), %v3672_v23, 32 }
  0x23   : > { %v3319_v8 = vpack.c.bf16 %v702_v5, %v701_v2  ;;  %v703_v9 = vld [vmem:[%s4037_s2 + $0x10] sm:$0xff]  ;;  %v704_v10 = vld [vmem:[%s4037_s2 + $0x18] sm:$0xff]  ;;  %v3328_v12 = vpack.c.bf16 %v782_v7, %v781_v6  ;;  %s678_s25 = scalar_select %p677_p8, %s3596_s23, 1  ;;  %v856_v14 = vld [vmem:[%s4038_s28] sm:$0xff] }
  0x24   : > { %3326 = vmatpush3.bf16.msra.mxu1 %v3325_v4  ;;  %v3322_v13 = vpack.c.bf16 %v704_v10, %v703_v9  ;;  %v857_v15 = vld [vmem:[%s4038_s28 + $0x8] sm:$0xff]  ;;  %s4040_s2 = sld [smem:[#allocation6_spill]]  ;;  %v858_v19 = vld [vmem:[%s4038_s28 + $0x10] sm:$0xff]  ;;  %v859_v20 = vld [vmem:[%s4038_s28 + $0x18] sm:$0xff] }
  0x25   : > { %3320 = vmatpush3.bf16.msra.mxu0 %v3319_v8  ;;  %3327 = vmatprep.subr.bf16.mxu1 %v3469_v3  ;;  %s3634_s26 = sshll.u32 %s678_s25, 3  ;;  %v3331_v18 = vpack.c.bf16 %v857_v15, %v856_v14  ;;  %v3334_v21 = vpack.c.bf16 %v859_v20, %v858_v19  ;;  %vm1029_vm5 = vmand %vm1027_vm2, %vm1028_vm3  ;;  %v1600_v19 = vld [vmem:[%s4006_s7] sm:$0xff]  ;;  %v1601_v20 = vld [vmem:[%s4006_s7 + $0x8] sm:$0xff] }
  0x26   : > { %3321 = vmatprep.subr.bf16.mxu0 %v3469_v3  ;;  %s684_s24 = scalar_lea.vmem %s4039_s1, %s3634_s26  ;;  %v3683_v25 = vsel %vm1029_vm5, 1.0, %v3471_v11  ;;  %vm1268_vm8 = vmand %vm1266_vm6, %vm1267_vm7  ;;  %v3337_v22 = vpack.c.bf16 %v1601_v20, %v1600_v19  ;;  %s688_s15 = scalar_lea.vmem %s4041_s4, %s3634_s26 }
  0x27   : > { %v694_v16 = vld [vmem:[%s684_s24] sm:$0xff]  ;;  %v3693_v32 = vsel %vm1268_vm8, 1.0, %v3471_v11  ;;  %vm1435_vm11 = vmand %vm1433_vm9, %vm1434_vm10  ;;  %s1708_s1 = sld [smem:[#allocation3 + %s3596_s23]] }
  0x28   : > { %3329 = vmatpush3.bf16.msra.mxu1 %v3328_v12  ;;  %v3706_v34 = vsel %vm1435_vm11, 1.0, %v3471_v11 }
  0x29   : > { %3323 = vmatpush3.bf16.msra.mxu0 %v3322_v13  ;;  %3158 = vmatprep.subr.mxu1 %v3471_v11 }
  0x2a   : > { %s680_s5 = scalar_lea.vmem %s4040_s2, %s3634_s26  ;;  %3330 = vmatprep.subr.bf16.mxu0 %v3469_v3 }
  0x2b   : > { %v3650_v17 = vld [vmem:[%s680_s5] sm:$0xff]  ;;  %3140 = vmatmul.mubr.msk.f32.vlgmr.msra.gmra.mrb[0].mxu1 %vm705_vm1, %v694_v16  ;;  %s692_s5 = scalar_lea.vmem %s4021_s22, %s3634_s26 }
  0x2c   : > { %3129 = vmatmul.mubr.msk.f32.vlgmr.msra.gmra.mrb[0].mxu0 %vm705_vm1, %v3650_v17  ;;  %3160 = vmatprep.mubr.msk.f32.mxu1 %vm3470_vm0, %v3471_v11 }
  0x2d   : > { %3332 = vmatpush3.bf16.msra.mxu0 %v3331_v18  ;;  %3150 = vmatprep.mubr.msk.f32.mxu0 %vm3470_vm0, %v3471_v11 }
  0x2e   : > { %3333 = vmatprep.subr.bf16.mxu0 %v3469_v3 }
  0x31   : > { %3335 = vmatpush3.bf16.msra.mxu0 %v3334_v21  ;;  %v1602_v21 = vld [vmem:[%s4006_s7 + $0x10] sm:$0xff] }
  0x32   : > { %3153 = vmatprep.subr.mxu0 %v3471_v11 }
  0x34   : > { %3151 = vmatmul.mubr.msk.f32.vlgmr.msra.gmra.mrb[2].mxu0 %vm705_vm1, %v694_v16 }
  0x35   : > { %3155 = vmatprep.mubr.msk.f32.mxu0 %vm3470_vm0, %v3471_v11 }
  0xfe   : > { %v852_v26 = vpop.f32.mrb[0].mxu1 }
  0xff   : > { %v775_v27 = vpop.f32.mrb[0].mxu0  ;;  %v3141_v28 = vpop.f32.mrb[1].mxu1  ;;  %3154 = vmatpush3.xpose.msk.msra.mxu0 %vm705_vm1, %v852_v26  ;;  %3159 = vmatpush3.xpose.msk.msra.mxu1 %vm705_vm1, %v852_v26 }
 0x100   : > { %v935_v29 = vmul.f32 %v3680_v24, %v775_v27  ;;  %v1032_v30 = vmul.f32 %v3683_v25, %v775_v27  ;;  %v3130_v31 = vpop.f32.mrb[1].mxu0  ;;  %3173 = vmatprep.subr.mxu1 %v3471_v11  ;;  %3163 = vmatprep.subr.mxu0 %v3471_v11  ;;  %v1271_v33 = vmul.f32 %v3693_v32, %v775_v27 }
 0x101   : > { %v1438_v36 = vmul.f32 %v3706_v34, %v775_v27 }
 0x102   : > { %3156 = vmatmul.mubr.msk.f32.vlgmr.msra.gmra.mrb[4].mxu0 %vm705_vm1, %v935_v29  ;;  %3161 = vmatmul.mubr.msk.f32.vlgmr.msra.gmra.mrb[2].mxu1 %vm705_vm1, %v1032_v30 }
 0x103   : > { %3174 = vmatpush3.xpose.msk.msra.mxu1 %vm705_vm1, %v852_v26  ;;  %3175 = vmatprep.mubr.msk.f32.mxu1 %vm3470_vm0, %v3471_v11 }
 0x104   : > { %3183 = vmatprep.subr.mxu1 %v3471_v11  ;;  %3165 = vmatprep.mubr.msk.f32.mxu0 %vm3470_vm0, %v3471_v11 }
 0x106   : > { %3176 = vmatmul.mubr.msk.f32.vlgmr.msra.gmra.mrb[4].mxu1 %vm705_vm1, %v1271_v33 }
 0x107   : > { %3184 = vmatpush3.xpose.msk.msra.mxu1 %vm705_vm1, %v852_v26  ;;  %3185 = vmatprep.mubr.msk.f32.mxu1 %vm3470_vm0, %v3471_v11  ;;  %v3712_v35 = vpop.f32.mrb[2].mxu0  ;;  %v1603_v26 = vld [vmem:[%s4006_s7 + $0x18] sm:$0xff] }
 0x108   : > { %v1119_v37 = vmul.f32 %v3683_v25, %v3712_v35  ;;  %v3152_v38 = vpop.f32.mrb[3].mxu0  ;;  %3336 = vmatprep.subr.bf16.mxu1 %v3469_v3  ;;  %v3340_v27 = vpack.c.bf16 %v1603_v26, %v1602_v21 }
 0x10a   : > { %3186 = vmatmul.mubr.msk.f32.vlgmr.msra.gmra.mrb[6].mxu1 %vm705_vm1, %v1438_v36  ;;  %3164 = vmatpush3.msra.mxu0 %v1119_v37  ;;  %v1026_v36 = vmul.f32 %v3680_v24, %v3712_v35 }
 0x10b   : > { %3168 = vmatprep.subr.mxu0 %v3471_v11  ;;  %3201 = vmatprep.mubr.msk.f32.mxu1 %vm3470_vm0, %v3471_v11 }
 0x10c   : > { %3338 = vmatpush3.bf16.msra.mxu1 %v3337_v22 }
 0x10d   : > { %3339 = vmatprep.subr.bf16.mxu1 %v3469_v3 }
 0x110   : > { %3341 = vmatpush3.bf16.msra.mxu1 %v3340_v27  ;;  %v1865_v27 = vld [vmem:[%s4011_s12] sm:$0xff] }
 0x111   : > { %3348 = vmatprep.subr.bf16.mxu1 %v3469_v3 }
 0x1d5   : > { %v1008_v40 = vpop.f32.mrb[4].mxu0  ;;  %v1102_v41 = vpop.f32.mrb[2].mxu1 }
 0x1d6   : > { %v1012_v42 = vmul.f32 0.35355338, %v1008_v40  ;;  %v1106_v43 = vmul.f32 0.35355338, %v1102_v41  ;;  %v3157_v44 = vpop.f32.mrb[5].mxu0  ;;  %v3162_v45 = vpop.f32.mrb[3].mxu1  ;;  %v1358_v40 = vmul.f32 %v3693_v32, %v3712_v35 }
 0x1d8   : > { %v1107_v46 = vsel %vm700_vm12, %v1106_v43, -1000000.0  ;;  %v1013_v51 = vsel %vm700_vm12, %v1012_v42, -1000000.0  ;;  %v1525_v43 = vmul.f32 %v3706_v34, %v3712_v35 }
 0x1d9   : > { %v1341_v47 = vpop.f32.mrb[4].mxu1  ;;  %v1108_v48 = vsel %vm1014_vm13, %v1107_v46, -inf  ;;  %v1015_v55 = vsel %vm1014_vm13, %v1013_v51, -inf }
 0x1da   : > { %v1345_v49 = vmul.f32 0.35355338, %v1341_v47  ;;  %1109 = vmax.xlane.f32.xlu0 %v1108_v48  ;;  %v3177_v50 = vpop.f32.mrb[5].mxu1 }
 0x1dc   : > { %v1346_v52 = vsel %vm700_vm12, %v1345_v49, -1000000.0 }
 0x1dd   : > { %v1508_v53 = vpop.f32.mrb[6].mxu1  ;;  %v1347_v54 = vsel %vm1014_vm13, %v1346_v52, -inf }
 0x1de   : > { %v1512_v56 = vmul.f32 0.35355338, %v1508_v53  ;;  %1348 = vmax.xlane.f32.xlu1 %v1347_v54  ;;  %v3187_v57 = vpop.f32.mrb[7].mxu1  ;;  %1016 = vmax.xlane.f32.xlu0 %v1015_v55 }
 0x1e0   : > { %v1513_v58 = vsel %vm700_vm12, %v1512_v56, -1000000.0  ;;  %v1788_v56 = vld [vmem:[%s4010_s11] sm:$0xff] }
 0x1e1   : > { %v1514_v59 = vsel %vm1014_vm13, %v1513_v58, -inf }
 0x1e2   : > { %1515 = vmax.xlane.f32.xlu1 %v1514_v59  ;;  %v1712_v59 = vld [vmem:[%s4009_s10 + $0x8] sm:$0xff] }
 0x267   : > { %v1110_v60 = vpop.xlane.xlu0 %1109 }
 0x268   : > { %v1111_v61 = vsub.f32 %v1107_v46, %v1110_v60 }
 0x26a   : > { %v1112_v62 = vmul.f32 1.442695, %v1111_v61  ;;  %v1790_v61 = vld [vmem:[%s4010_s11 + $0x10] sm:$0xff] }
 0x26b   : > { %v1349_v63 = vpop.xlane.xlu1 %1348  ;;  %v1017_v0 = vpop.xlane.xlu0 %1016 }
 0x26c   : > { %3408 = vpow2.f32 %v1112_v62  ;;  %v1350_v1 = vsub.f32 %v1346_v52, %v1349_v63  ;;  %v1018_v2 = vsub.f32 %v1013_v51, %v1017_v0  ;;  %v1791_v62 = vld [vmem:[%s4010_s11 + $0x18] sm:$0xff]  ;;  %v1713_v0 = vld [vmem:[%s4009_s10 + $0x10] sm:$0xff] }
 0x26d   : > { %v3352_v63 = vpack.c.bf16 %v1791_v62, %v1790_v61 }
 0x26e   : > { %v1351_v4 = vmul.f32 1.442695, %v1350_v1  ;;  %v1019_v5 = vmul.f32 1.442695, %v1018_v2  ;;  %v1714_v1 = vld [vmem:[%s4009_s10 + $0x18] sm:$0xff] }
 0x26f   : > { %v1516_v6 = vpop.xlane.xlu1 %1515  ;;  %v3346_v2 = vpack.c.bf16 %v1714_v1, %v1713_v0 }
 0x270   : > { %3410 = vpow2.f32 %v1351_v4  ;;  %v1517_v7 = vsub.f32 %v1513_v58, %v1516_v6  ;;  %v1711_v58 = vld [vmem:[%s4009_s10] sm:$0xff] }
 0x271   : > { %3412 = vpow2.f32 %v1019_v5  ;;  %v3343_v60 = vpack.c.bf16 %v1712_v59, %v1711_v58  ;;  %v695_v4 = vld [vmem:[%s688_s15] sm:$0xff] }
 0x272   : > { %v1518_v8 = vmul.f32 1.442695, %v1517_v7 }
 0x274   : > { %3414 = vpow2.f32 %v1518_v8 }
 0x276   : > { %v3409_v9 = vpop.eup %3408 }
 0x277   : > { %v1114_v10 = vsel %vm1014_vm13, %v3409_v9, 0.0 }
 0x278   : > { %1115 = vadd.xlane.f32.xlu0 %v1114_v10 }
 0x27a   : > { %v3411_v12 = vpop.eup %3410 }
 0x27b   : > { %v3413_v13 = vpop.eup %3412  ;;  %v1353_v14 = vsel %vm1014_vm13, %v3411_v12, 0.0 }
 0x27c   : > { %1354 = vadd.xlane.f32.xlu0 %v1353_v14  ;;  %v1021_v15 = vsel %vm1014_vm13, %v3413_v13, 0.0 }
 0x27d   : > { %1022 = vadd.xlane.f32.xlu1 %v1021_v15 }
 0x27e   : > { %v3415_v16 = vpop.eup %3414 }
 0x27f   : > { %v1520_v18 = vsel %vm1014_vm13, %v3415_v16, 0.0 }
 0x281   : > { %1521 = vadd.xlane.f32.xlu1 %v1520_v18 }
 0x305   : > { %v1116_v28 = vpop.xlane.xlu0 %1115 }
 0x306   : > { %3416 = vrcp.f32 %v1116_v28  ;;  %v1866_v28 = vld [vmem:[%s4011_s12 + $0x8] sm:$0xff] }
 0x309   : > { %v1355_v33 = vpop.xlane.xlu0 %1354 }
 0x30a   : > { %v1023_v29 = vpop.xlane.xlu1 %1022 }
 0x30b   : > { %3418 = vrcp.f32 %v1023_v29  ;;  %v1867_v29 = vld [vmem:[%s4011_s12 + $0x10] sm:$0xff] }
 0x30c   : > { %3420 = vrcp.f32 %v1355_v33 }
 0x30e   : > { %v1522_v39 = vpop.xlane.xlu1 %1521 }
 0x30f   : > { %3422 = vrcp.f32 %v1522_v39 }
 0x310   : > { %v3417_v30 = vpop.eup %3416 }
 0x311   : > { %v1118_v31 = vmul.f32 %v3417_v30, %v3409_v9  ;;  %v3006_v9 = vld [vmem:[%s4007_s8] ss:$0 sm:$0xff]  ;;  %v3355_v30 = vpack.c.bf16 %v1866_v28, %v1865_v27 }
 0x313   : > { %3166 = vmatmul.mubr.msk.f32.vlgmr.msra.gmra.mrb[6].mxu0 %vm1014_vm13, %v1118_v31  ;;  %v1868_v31 = vld [vmem:[%s4011_s12 + $0x18] sm:$0xff] }
 0x314   : > { %3169 = vmatpush3.msra.mxu0 %v1026_v36  ;;  %3170 = vmatprep.mubr.msk.f32.mxu0 %vm3470_vm0, %v3471_v11  ;;  %v3358_v33 = vpack.c.bf16 %v1868_v31, %v1867_v29  ;;  %v1709_v36 = vstv %s1708_s1 }
 0x315   : > { %3178 = vmatprep.subr.mxu0 %v3471_v11  ;;  %v3419_v37 = vpop.eup %3418  ;;  %vm3870_vm14 = vcmp.lt.s32.totalorder %v3672_v23, %v1709_v36 }
 0x316   : > { %v1025_v38 = vmul.f32 %v3419_v37, %v3413_v13  ;;  %v3421_v41 = vpop.eup %3420 }
 0x317   : > { %v1357_v42 = vmul.f32 %v3421_v41, %v3411_v12  ;;  %v3007_v12 = vld [vmem:[%s4008_s9] ss:$0 sm:$0xff] }
 0x319   : > { %v3423_v44 = vpop.eup %3422 }
 0x31a   : > { %v1524_v45 = vmul.f32 %v3423_v44, %v3415_v16 }
 0x31b   : > { %3171 = vmatmul.mubr.msk.f32.vlgmr.msra.gmra.mrb[6].mxu0 %vm1014_vm13, %v1025_v38 }
 0x31c   : > { %3179 = vmatpush3.msra.mxu0 %v1358_v40  ;;  %3180 = vmatprep.mubr.msk.f32.mxu0 %vm3470_vm0, %v3471_v11 }
 0x31d   : > { %3188 = vmatprep.subr.mxu0 %v3471_v11 }
 0x323   : > { %3181 = vmatmul.mubr.msk.f32.vlgmr.msra.gmra.mrb[6].mxu0 %vm1014_vm13, %v1357_v42 }
 0x324   : > { %3189 = vmatpush3.msra.mxu0 %v1525_v43  ;;  %3190 = vmatprep.mubr.msk.f32.mxu0 %vm3470_vm0, %v3471_v11 }
 0x325   : > { %3342 = vmatprep.subr.bf16.mxu0 %v3469_v3 }
 0x32b   : > { %3191 = vmatmul.mubr.msk.f32.vlgmr.msra.gmra.mrb[6].mxu0 %vm1014_vm13, %v1524_v45 }
 0x32c   : > { %3212 = vmatprep.mubr.msk.f32.mxu0 %vm3470_vm0, %v3471_v11  ;;  %3344 = vmatpush3.bf16.msra.mxu0 %v3343_v60 }
 0x32d   : > { %3345 = vmatprep.subr.bf16.mxu0 %v3469_v3 }
 0x330   : > { %3347 = vmatpush3.bf16.msra.mxu0 %v3346_v2 }
 0x331   : > { %3354 = vmatprep.subr.bf16.mxu0 %v3469_v3 }
 0x3fe   : > { %v1595_v46 = vpop.f32.mrb[6].mxu0 }
 0x3ff   : > { %v3192_v47 = vpop.f32.mrb[7].mxu0  ;;  %3202 = vmatmul.mubr.msk.f32.vlgmr.msra.gmra.mrb[8].mxu1 %vm705_vm1, %v1595_v46 }
 0x400   : > { %3223 = vmatprep.mubr.msk.f32.mxu1 %vm3470_vm0, %v3471_v11 }
 0x4d2   : > { %v1673_v35 = vpop.f32.mrb[8].mxu1 }
 0x4d3   : > { %v1677_v48 = vadd.f32 %v1673_v35, %v3650_v17  ;;  %v3203_v49 = vpop.f32.mrb[9].mxu1  ;;  %v1789_v17 = vld [vmem:[%s4010_s11 + $0x8] sm:$0xff] }
 0x4d4   : > { %v3349_v57 = vpack.c.bf16 %v1789_v17, %v1788_v56 }
 0x4d5   : > { %v1680_v50 = vsel %vm705_vm1, %v1677_v48, 0.0 }
 0x4d6   : > { %1681 = vadd.xlane.f32.xlu0 %v1680_v50  ;;  %3350 = vmatpush3.bf16.msra.mxu1 %v3349_v57 }
 0x4d7   : > { %3351 = vmatprep.subr.bf16.mxu1 %v3469_v3 }
 0x4da   : > { %3353 = vmatpush3.bf16.msra.mxu1 %v3352_v63 }
 0x4db   : > { %3237 = vmatprep.subr.mxu1 %v3471_v11 }
 0x4dd   : > { %3224 = vmatmul.mubr.msk.f32.vlgmr.msra.gmra.mrb[10].mxu1 %vm705_vm1, %v695_v4 }
 0x4de   : > { %3239 = vmatprep.mubr.msk.f32.mxu1 %vm3470_vm0, %v3471_v11 }
 0x563   : > { %v1682_v51 = vpop.xlane.xlu0 %1681 }
 0x564   : > { %v1684_v52 = vmul.f32 0.03125, %v1682_v51 }
 0x566   : > { %v1685_v53 = vsub.f32 %v1677_v48, %v1684_v52 }
 0x568   : > { %v1686_v54 = vmul.f32 %v1685_v53, %v1685_v53 }
 0x56a   : > { %v1687_v55 = vsel %vm705_vm1, %v1686_v54, 0.0 }
 0x56b   : > { %1688 = vadd.xlane.f32.xlu1 %v1687_v55 }
 0x5b0   : > { %v1861_v15 = vpop.f32.mrb[10].mxu1 }
 0x5b1   : > { %v3225_v16 = vpop.f32.mrb[11].mxu1  ;;  %3238 = vmatpush3.xpose.msk.msra.mxu1 %vm705_vm1, %v1861_v15 }
 0x5b2   : > { %3242 = vmatprep.subr.mxu1 %v3471_v11 }
 0x5f8   : > { %v1689_v5 = vpop.xlane.xlu1 %1688 }
 0x5f9   : > { %v1690_v6 = vmul.f32 0.03125, %v1689_v5 }
 0x5fb   : > { %v1691_v7 = vadd.f32 1e-05, %v1690_v6 }
 0x5fd   : > { %3424 = vrsqrt.f32 %v1691_v7 }
 0x607   : > { %v3425_v8 = vpop.eup %3424 }
 0x608   : > { %v1693_v10 = vmul.f32 %v3425_v8, %v1685_v53 }
 0x60a   : > { %v1700_v13 = vmul.f32 %v3006_v9, %v1693_v10 }
 0x60c   : > { %v3821_v14 = vadd.f32 %v3007_v12, %v1700_v13 }
 0x60e   : > { %3213 = vmatmul.mubr.msk.f32.vlgmr.msra.gmra.mrb[8].mxu0 %vm705_vm1, %v3821_v14 }
 0x60f   : > { %3234 = vmatprep.mubr.msk.f32.mxu0 %vm3470_vm0, %v3471_v11  ;;  %3356 = vmatpush3.bf16.msra.mxu0 %v3355_v30 }
 0x610   : > { %3357 = vmatprep.subr.bf16.mxu0 %v3469_v3 }
 0x613   : > { %3359 = vmatpush3.bf16.msra.mxu0 %v3358_v33 }
 0x614   : > { %3247 = vmatprep.subr.mxu0 %v3471_v11 }
 0x616   : > { %3235 = vmatmul.mubr.msk.f32.vlgmr.msra.gmra.mrb[10].mxu0 %vm705_vm1, %v695_v4 }
 0x617   : > { %3249 = vmatprep.mubr.msk.f32.mxu0 %vm3470_vm0, %v3471_v11 }
 0x6e1   : > { %v1784_v18 = vpop.f32.mrb[8].mxu0 }
 0x6e2   : > { %v1939_v19 = vmul.f32 %v3680_v24, %v1784_v18  ;;  %v3214_v20 = vpop.f32.mrb[9].mxu0  ;;  %v2030_v21 = vmul.f32 %v3683_v25, %v1784_v18  ;;  %v2264_v22 = vmul.f32 %v3693_v32, %v1784_v18  ;;  %v2426_v26 = vmul.f32 %v3706_v34, %v1784_v18  ;;  %v2588_v18 = vld [vmem:[%s4012_s13] sm:$0xff] }
 0x6e3   : > { %v2590_v20 = vld [vmem:[%s4012_s13 + $0x10] sm:$0xff] }
 0x6e4   : > { %3240 = vmatmul.mubr.msk.f32.vlgmr.msra.gmra.mrb[12].mxu1 %vm705_vm1, %v1939_v19  ;;  %v2589_v19 = vld [vmem:[%s4012_s13 + $0x8] sm:$0xff] }
 0x6e5   : > { %3243 = vmatpush3.xpose.msk.msra.mxu1 %vm705_vm1, %v1861_v15  ;;  %3244 = vmatprep.mubr.msk.f32.mxu1 %vm3470_vm0, %v3471_v11 }
 0x6e6   : > { %3257 = vmatprep.subr.mxu1 %v3471_v11 }
 0x6e8   : > { %3245 = vmatmul.mubr.msk.f32.vlgmr.msra.gmra.mrb[14].mxu1 %vm705_vm1, %v2030_v21  ;;  %v3361_v21 = vpack.c.bf16 %v2589_v19, %v2588_v18  ;;  %v3028_v18 = vld [vmem:[%s4018_s19] ss:$0 sm:$0xff] }
 0x6e9   : > { %3258 = vmatpush3.xpose.msk.msra.mxu1 %vm705_vm1, %v1861_v15  ;;  %3259 = vmatprep.mubr.msk.f32.mxu1 %vm3470_vm0, %v3471_v11  ;;  %v1935_v13 = vpop.f32.mrb[10].mxu0 }
 0x6ea   : > { %3267 = vmatprep.subr.mxu1 %v3471_v11  ;;  %v3236_v16 = vpop.f32.mrb[11].mxu0  ;;  %v2029_v29 = vmul.f32 %v3680_v24, %v1935_v13  ;;  %v2351_v38 = vmul.f32 %v3693_v32, %v1935_v13 }
 0x6ec   : > { %3260 = vmatmul.mubr.msk.f32.vlgmr.msra.gmra.mrb[16].mxu1 %vm705_vm1, %v2264_v22 }
 0x6ed   : > { %3268 = vmatpush3.xpose.msk.msra.mxu1 %vm705_vm1, %v1861_v15  ;;  %3269 = vmatprep.mubr.msk.f32.mxu1 %vm3470_vm0, %v3471_v11  ;;  %v2117_v15 = vmul.f32 %v3683_v25, %v1935_v13  ;;  %v2591_v25 = vld [vmem:[%s4012_s13 + $0x18] sm:$0xff] }
 0x6ee   : > { %3360 = vmatprep.subr.bf16.mxu1 %v3469_v3  ;;  %v3364_v22 = vpack.c.bf16 %v2591_v25, %v2590_v20 }
 0x6ef   : > { %3248 = vmatpush3.msra.mxu0 %v2117_v15 }
 0x6f0   : > { %3270 = vmatmul.mubr.msk.f32.vlgmr.msra.gmra.mrb[18].mxu1 %vm705_vm1, %v2426_v26  ;;  %3252 = vmatprep.subr.mxu0 %v3471_v11 }
 0x6f1   : > { %3285 = vmatprep.mubr.msk.f32.mxu1 %vm3470_vm0, %v3471_v11  ;;  %3362 = vmatpush3.bf16.msra.mxu1 %v3361_v21 }
 0x6f2   : > { %3363 = vmatprep.subr.bf16.mxu1 %v3469_v3 }
 0x6f5   : > { %3365 = vmatpush3.bf16.msra.mxu1 %v3364_v22 }
 0x6f6   : > { %3372 = vmatprep.subr.bf16.mxu1 %v3469_v3 }
 0x7b7   : > { %v2012_v37 = vpop.f32.mrb[12].mxu1 }
 0x7b8   : > { %v2016_v39 = vmul.f32 0.35355338, %v2012_v37  ;;  %v3241_v40 = vpop.f32.mrb[13].mxu1 }
 0x7b9   : > { %v2513_v40 = vmul.f32 %v3706_v34, %v1935_v13 }
 0x7ba   : > { %v2017_v41 = vsel %vm3870_vm14, %v2016_v39, -1000000.0 }
 0x7bb   : > { %v2100_v42 = vpop.f32.mrb[14].mxu1  ;;  %v2018_v43 = vsel %vm1014_vm13, %v2017_v41, -inf }
 0x7bc   : > { %v2104_v44 = vmul.f32 0.35355338, %v2100_v42  ;;  %2019 = vmax.xlane.f32.xlu1 %v2018_v43  ;;  %v3246_v45 = vpop.f32.mrb[15].mxu1 }
 0x7be   : > { %v2105_v46 = vsel %vm3870_vm14, %v2104_v44, -1000000.0 }
 0x7bf   : > { %v2334_v47 = vpop.f32.mrb[16].mxu1  ;;  %v2106_v23 = vsel %vm1014_vm13, %v2105_v46, -inf }
 0x7c0   : > { %v2338_v35 = vmul.f32 0.35355338, %v2334_v47  ;;  %2107 = vmax.xlane.f32.xlu0 %v2106_v23  ;;  %v3261_v48 = vpop.f32.mrb[17].mxu1 }
 0x7c2   : > { %v2339_v49 = vsel %vm3870_vm14, %v2338_v35, -1000000.0 }
 0x7c3   : > { %v2496_v50 = vpop.f32.mrb[18].mxu1  ;;  %v2340_v51 = vsel %vm1014_vm13, %v2339_v49, -inf }
 0x7c4   : > { %v2500_v52 = vmul.f32 0.35355338, %v2496_v50  ;;  %2341 = vmax.xlane.f32.xlu0 %v2340_v51  ;;  %v3271_v53 = vpop.f32.mrb[19].mxu1  ;;  %v2695_v50 = vld [vmem:[%s4015_s16] sm:$0xff]  ;;  %v2697_v51 = vld [vmem:[%s4015_s16 + $0x10] sm:$0xff] }
 0x7c6   : > { %v2501_v54 = vsel %vm3870_vm14, %v2500_v52, -1000000.0  ;;  %v2698_v52 = vld [vmem:[%s4015_s16 + $0x18] sm:$0xff] }
 0x7c7   : > { %v2502_v55 = vsel %vm1014_vm13, %v2501_v54, -inf  ;;  %v3370_v53 = vpack.c.bf16 %v2698_v52, %v2697_v51 }
 0x7c8   : > { %2503 = vmax.xlane.f32.xlu1 %v2502_v55  ;;  %v2781_v55 = vld [vmem:[%s4017_s18 + $0x8] sm:$0xff] }
 0x849   : > { %v2020_v56 = vpop.xlane.xlu1 %2019 }
 0x84a   : > { %v2021_v17 = vsub.f32 %v2017_v41, %v2020_v56  ;;  %v2782_v56 = vld [vmem:[%s4017_s18 + $0x10] sm:$0xff] }
 0x84c   : > { %v2022_v57 = vmul.f32 1.442695, %v2021_v17 }
 0x84d   : > { %v2108_v58 = vpop.xlane.xlu0 %2107 }
 0x84e   : > { %3426 = vpow2.f32 %v2022_v57  ;;  %v2109_v59 = vsub.f32 %v2105_v46, %v2108_v58  ;;  %v2783_v57 = vld [vmem:[%s4017_s18 + $0x18] sm:$0xff] }
 0x84f   : > { %v3376_v58 = vpack.c.bf16 %v2783_v57, %v2782_v56 }
 0x850   : > { %v2110_v60 = vmul.f32 1.442695, %v2109_v59  ;;  %v2784_v59 = vld [vmem:[%s4017_s18 + $0x20] sm:$0xff] }
 0x851   : > { %v2342_v61 = vpop.xlane.xlu0 %2341 }
 0x852   : > { %3428 = vpow2.f32 %v2110_v60  ;;  %v2343_v62 = vsub.f32 %v2339_v49, %v2342_v61  ;;  %v2785_v60 = vld [vmem:[%s4017_s18 + $0x28] sm:$0xff] }
 0x853   : > { %v3379_v61 = vpack.c.bf16 %v2785_v60, %v2784_v59 }
 0x854   : > { %v2344_v63 = vmul.f32 1.442695, %v2343_v62 }
 0x855   : > { %v2504_v0 = vpop.xlane.xlu1 %2503 }
 0x856   : > { %3430 = vpow2.f32 %v2344_v63  ;;  %v2505_v1 = vsub.f32 %v2501_v54, %v2504_v0  ;;  %v2780_v54 = vld [vmem:[%s4017_s18] sm:$0xff] }
 0x857   : > { %v3373_v17 = vpack.c.bf16 %v2781_v55, %v2780_v54 }
 0x858   : > { %v3427_v2 = vpop.eup %3426  ;;  %v2506_v4 = vmul.f32 1.442695, %v2505_v1 }
 0x859   : > { %v2024_v5 = vsel %vm1014_vm13, %v3427_v2, 0.0 }
 0x85a   : > { %3432 = vpow2.f32 %v2506_v4  ;;  %2025 = vadd.xlane.f32.xlu1 %v2024_v5  ;;  %v3025_v5 = vld [vmem:[%s4044_s29] ss:$0 sm:$0xff] }
 0x85c   : > { %v3429_v6 = vpop.eup %3428 }
 0x85d   : > { %v2112_v7 = vsel %vm1014_vm13, %v3429_v6, 0.0 }
 0x85e   : > { %2113 = vadd.xlane.f32.xlu0 %v2112_v7 }
 0x860   : > { %v3431_v8 = vpop.eup %3430 }
 0x861   : > { %v2346_v9 = vsel %vm1014_vm13, %v3431_v8, 0.0 }
 0x862   : > { %2347 = vadd.xlane.f32.xlu0 %v2346_v9 }
 0x864   : > { %v3433_v10 = vpop.eup %3432 }
 0x865   : > { %v2508_v12 = vsel %vm1014_vm13, %v3433_v10, 0.0 }
 0x866   : > { %2509 = vadd.xlane.f32.xlu1 %v2508_v12 }
 0x8e7   : > { %v2026_v27 = vpop.xlane.xlu1 %2025 }
 0x8eb   : > { %v2114_v26 = vpop.xlane.xlu0 %2113 }
 0x8ec   : > { %3434 = vrcp.f32 %v2114_v26 }
 0x8ed   : > { %3436 = vrcp.f32 %v2026_v27 }
 0x8ef   : > { %v2348_v31 = vpop.xlane.xlu0 %2347 }
 0x8f0   : > { %3438 = vrcp.f32 %v2348_v31 }
 0x8f3   : > { %v2510_v37 = vpop.xlane.xlu1 %2509 }
 0x8f4   : > { %3440 = vrcp.f32 %v2510_v37 }
 0x8f6   : > { %v3435_v28 = vpop.eup %3434 }
 0x8f7   : > { %v2116_v30 = vmul.f32 %v3435_v28, %v3429_v6  ;;  %v3437_v33 = vpop.eup %3436 }
 0x8f8   : > { %v2028_v36 = vmul.f32 %v3437_v33, %v3427_v2  ;;  %v3024_v2 = vld [vmem:[%s4013_s14] ss:$0 sm:$0xff] }
 0x8f9   : > { %3250 = vmatmul.mubr.msk.f32.vlgmr.msra.gmra.mrb[12].mxu0 %vm1014_vm13, %v2116_v30 }
 0x8fa   : > { %3253 = vmatpush3.msra.mxu0 %v2029_v29  ;;  %3254 = vmatprep.mubr.msk.f32.mxu0 %vm3470_vm0, %v3471_v11  ;;  %v3439_v24 = vpop.eup %3438 }
 0x8fb   : > { %3262 = vmatprep.subr.mxu0 %v3471_v11  ;;  %v2350_v39 = vmul.f32 %v3439_v24, %v3431_v8  ;;  %v2787_v8 = vld [vmem:[%s4017_s18 + $0x38] sm:$0xff] }
 0x8fe   : > { %v3441_v32 = vpop.eup %3440 }
 0x8ff   : > { %v2512_v41 = vmul.f32 %v3441_v32, %v3433_v10  ;;  %v3026_v10 = vld [vmem:[%s4016_s17] ss:$0 sm:$0xff] }
 0x901   : > { %3255 = vmatmul.mubr.msk.f32.vlgmr.msra.gmra.mrb[12].mxu0 %vm1014_vm13, %v2028_v36 }
 0x902   : > { %3263 = vmatpush3.msra.mxu0 %v2351_v38  ;;  %3264 = vmatprep.mubr.msk.f32.mxu0 %vm3470_vm0, %v3471_v11  ;;  %v3030_v38 = vld [vmem:[%s4019_s20] ss:$0 sm:$0xff] }
 0x903   : > { %3272 = vmatprep.subr.mxu0 %v3471_v11 }
 0x909   : > { %3265 = vmatmul.mubr.msk.f32.vlgmr.msra.gmra.mrb[12].mxu0 %vm1014_vm13, %v2350_v39  ;;  %v3031_v39 = vld [vmem:[%s4020_s21] ss:$0 sm:$0xff] }
 0x90a   : > { %3273 = vmatpush3.msra.mxu0 %v2513_v40  ;;  %3274 = vmatprep.mubr.msk.f32.mxu0 %vm3470_vm0, %v3471_v11 }
 0x90b   : > { %3366 = vmatprep.subr.bf16.mxu0 %v3469_v3 }
 0x911   : > { %3275 = vmatmul.mubr.msk.f32.vlgmr.msra.gmra.mrb[12].mxu0 %vm1014_vm13, %v2512_v41 }
 0x912   : > { %3296 = vmatprep.mubr.msk.f32.mxu0 %vm3470_vm0, %v3471_v11 }
 0x9e4   : > { %v2583_v42 = vpop.f32.mrb[12].mxu0 }
 0x9e5   : > { %v3276_v43 = vpop.f32.mrb[13].mxu0  ;;  %3286 = vmatmul.mubr.msk.f32.vlgmr.msra.gmra.mrb[20].mxu1 %vm705_vm1, %v2583_v42 }
 0x9e6   : > { %3315 = vmatprep.mubr.msk.f32.mxu1 %vm3470_vm0, %v3471_v11  ;;  %v2696_v11 = vld [vmem:[%s4015_s16 + $0x8] sm:$0xff]  ;;  %3374 = vmatpush3.bf16.msra.mxu1 %v3373_v17 }
 0x9e7   : > { %3375 = vmatprep.subr.bf16.mxu1 %v3469_v3 }
 0x9ea   : > { %3377 = vmatpush3.bf16.msra.mxu1 %v3376_v58 }
 0x9eb   : > { %3378 = vmatprep.subr.bf16.mxu1 %v3469_v3 }
 0x9ee   : > { %3380 = vmatpush3.bf16.msra.mxu1 %v3379_v61 }
 0x9ef   : > { %3381 = vmatprep.subr.bf16.mxu1 %v3469_v3 }
 0xab8   : > { %v2661_v34 = vpop.f32.mrb[20].mxu1 }
 0xab9   : > { %v2665_v44 = vadd.f32 %v2661_v34, %v3821_v14  ;;  %v3287_v45 = vpop.f32.mrb[21].mxu1  ;;  %v3367_v14 = vpack.c.bf16 %v2696_v11, %v2695_v50 }
 0xabb   : > { %v2668_v46 = vsel %vm705_vm1, %v2665_v44, 0.0  ;;  %3368 = vmatpush3.bf16.msra.mxu0 %v3367_v14 }
 0xabc   : > { %2669 = vadd.xlane.f32.xlu0 %v2668_v46  ;;  %3369 = vmatprep.subr.bf16.mxu0 %v3469_v3  ;;  %v2786_v3 = vld [vmem:[%s4017_s18 + $0x30] sm:$0xff] }
 0xabd   : > { %v3382_v9 = vpack.c.bf16 %v2787_v8, %v2786_v3 }
 0xabf   : > { %3371 = vmatpush3.bf16.msra.mxu0 %v3370_v53  ;;  %3383 = vmatpush3.bf16.msra.mxu1 %v3382_v9 }
 0xb49   : > { %v2670_v47 = vpop.xlane.xlu0 %2669 }
 0xb4a   : > { %v2671_v23 = vmul.f32 0.03125, %v2670_v47 }
 0xb4c   : > { %v2672_v35 = vsub.f32 %v2665_v44, %v2671_v23 }
 0xb4e   : > { %v2673_v48 = vmul.f32 %v2672_v35, %v2672_v35 }
 0xb50   : > { %v2674_v49 = vsel %vm705_vm1, %v2673_v48, 0.0 }
 0xb51   : > { %2675 = vadd.xlane.f32.xlu1 %v2674_v49 }
 0xbde   : > { %v2676_v62 = vpop.xlane.xlu1 %2675 }
 0xbdf   : > { %v2677_v63 = vmul.f32 0.03125, %v2676_v62 }
 0xbe1   : > { %v2678_v0 = vadd.f32 1e-05, %v2677_v63 }
 0xbe3   : > { %3442 = vrsqrt.f32 %v2678_v0 }
 0xbed   : > { %v3443_v1 = vpop.eup %3442 }
 0xbee   : > { %v2680_v4 = vmul.f32 %v3443_v1, %v2672_v35 }
 0xbf0   : > { %v2687_v6 = vmul.f32 %v3024_v2, %v2680_v4 }
 0xbf2   : > { %v2694_v7 = vadd.f32 %v3025_v5, %v2687_v6 }
 0xbf4   : > { %3297 = vmatmul.mubr.msk.f32.vlgmr.msra.gmra.mrb[14].mxu0 %vm705_vm1, %v2694_v7 }
 0xcc7   : > { %v2775_v12 = vpop.f32.mrb[14].mxu0 }
 0xcc8   : > { %v2776_v13 = vadd.f32 %v3026_v10, %v2775_v12  ;;  %v3298_v15 = vpop.f32.mrb[15].mxu0 }
 0xcca   : > { %v2779_v16 = vmax.f32 %v2776_v13, 0.0 }
 0xccc   : > { %3316 = vmatmul.mubr.msk.f32.vlgmr.msra.gmra.mrb[22].mxu1 %vm2795_vm15, %v2779_v16 }
 0xd9f   : > { %v2865_v19 = vpop.f32.mrb[22].mxu1 }
 0xda0   : > { %v2866_v20 = vadd.f32 %v3028_v18, %v2865_v19  ;;  %v3317_v21 = vpop.f32.mrb[23].mxu1 }
 0xda2   : > { %v2869_v25 = vadd.f32 %v2866_v20, %v2694_v7 }
 0xda4   : > { %v2872_v22 = vsel %vm705_vm1, %v2869_v25, 0.0 }
 0xda5   : > { %2873 = vadd.xlane.f32.xlu0 %v2872_v22 }
 0xe32   : > { %v2874_v26 = vpop.xlane.xlu0 %2873 }
 0xe33   : > { %v2875_v27 = vmul.f32 0.03125, %v2874_v26 }
 0xe35   : > { %v2876_v28 = vsub.f32 %v2869_v25, %v2875_v27 }
 0xe37   : > { %v2877_v29 = vmul.f32 %v2876_v28, %v2876_v28 }
 0xe39   : > { %v2878_v30 = vsel %vm705_vm1, %v2877_v29, 0.0 }
 0xe3a   : > { %2879 = vadd.xlane.f32.xlu1 %v2878_v30 }
 0xec7   : > { %v2880_v31 = vpop.xlane.xlu1 %2879 }
 0xec8   : > { %v2881_v33 = vmul.f32 0.03125, %v2880_v31 }
 0xeca   : > { %v2882_v36 = vadd.f32 1e-05, %v2881_v33 }
 0xecc   : > { %3444 = vrsqrt.f32 %v2882_v36 }
 0xed6   : > { %v3445_v37 = vpop.eup %3444 }
 0xed7   : > { %v2884_v24 = vmul.f32 %v3445_v37, %v2876_v28 }
 0xed9   : > { %v2891_v40 = vmul.f32 %v3030_v38, %v2884_v24 }
 0xedb   : > { %v2898_v32 = vadd.f32 %v3031_v39, %v2891_v40 }
 0xedd   : > { %2899 = vst.msk [vmem:[%s692_s5] sm:$0xff] %vm705_vm1, %v2898_v32 }
 0xede PF: > { %s38_s0 = sadd.s32 1, %s3466_s0  }
 0xedf   : > { %p35_p9 = scmp.ge.s32.totalorder %s38_s0, 4  }
 0xee1   :  { %37 = sbr.rel (!%p35_p9) target bundleno = 23 (0x17), region = 140 }

</bundles_post_ra>
